<compile_context>
chip_gen: v6e
topology: v6e:2x2x1
jax: 0.10.0
libtpu: 0.0.40
codegen_flags: <defaults>
</compile_context>

<pallas_src>
import functools

import jax
import jax.numpy as jnp
from jax import lax
from jax.experimental import pallas as pl
from jax.experimental.pallas import tpu as pltpu

NEG_INF = -10000.0

# tag vocabulary (len == tagset_size == C)
TAG_TO_IX = {"B": 0, "I": 1, "O": 2, "<START>": 3, "<STOP>": 4}
START_IDX = TAG_TO_IX["<START>"]
STOP_IDX = TAG_TO_IX["<STOP>"]

_VMEM = pl.BlockSpec(memory_space=pltpu.MemorySpace.VMEM)


# ----------------------------------------------------------------------------
# In-kernel BiLSTM + hidden2tag; returns feats [L*B, C] as a traced value.
# Shared by the training and eval kernels (fusion: feats stay in VMEM/vregs).
# ----------------------------------------------------------------------------
def _bilstm_feats(emb_ref, h0f_ref, c0f_ref, h0b_ref, c0b_ref,
                  wihf_ref, whhf_ref, bf_ref,
                  wihb_ref, whhb_ref, bb_ref,
                  wout_ref, bout_ref, hsf, hsb):
    B, Hh = h0f_ref.shape
    L = emb_ref.shape[0] // B

    # Hoisted input projections: one [L*B, E] @ [E, 4Hh] MXU matmul per
    # direction, off the serial recurrence. Bias (b_ih + b_hh) added once here.
    emb2d = emb_ref[...]
    xpf = jnp.dot(emb2d, wihf_ref[...], preferred_element_type=jnp.float32) + bf_ref[...]
    xpb = jnp.dot(emb2d, wihb_ref[...], preferred_element_type=jnp.float32) + bb_ref[...]

    whhf = whhf_ref[...]
    whhb = whhb_ref[...]

    def cell(gates, c):
        # PyTorch LSTM gate order: i, f, g, o
        # TODO(synk): at production sizes pad Hh to a 128-lane multiple so gate
        # slices are vreg-aligned instead of 16-lane sub-vreg slices.
        i_g = jax.nn.sigmoid(gates[:, 0:Hh])
        f_g = jax.nn.sigmoid(gates[:, Hh:2 * Hh])
        g_g = jnp.tanh(gates[:, 2 * Hh:3 * Hh])
        o_g = jax.nn.sigmoid(gates[:, 3 * Hh:4 * Hh])
        c_new = f_g * c + i_g * g_g
        h_new = o_g * jnp.tanh(c_new)
        return h_new, c_new

    hf, cf = h0f_ref[...], c0f_ref[...]
    hb, cb = h0b_ref[...], c0b_ref[...]

    # Forward (t) and backward (L-1-t) chains interleaved, fully unrolled
    # (L is a trace-time constant).  Only the tiny h @ W_hh matmul remains on
    # the serial critical path.
    # TODO(synk): for large L switch to lax.fori_loop(..., unroll=k) plus a
    # batch-parallel grid (dimension_semantics=("parallel",)) for v7x's 2 TCs.
    for t in range(L):
        tb = L - 1 - t
        gf = xpf[t * B:(t + 1) * B, :] + jnp.dot(
            hf, whhf, preferred_element_type=jnp.float32)
        gb = xpb[tb * B:(tb + 1) * B, :] + jnp.dot(
            hb, whhb, preferred_element_type=jnp.float32)
        hf, cf = cell(gf, cf)
        hb, cb = cell(gb, cb)
        hsf[t * B:(t + 1) * B, :] = hf
        hsb[tb * B:(tb + 1) * B, :] = hb

    # Deferred hidden2tag projection: two [L*B, Hh] @ [Hh, C] matmuls and one
    # bias add instead of 2L per-step matmuls + per-step read-modify-writes.
    wout_f = wout_ref[0:Hh, :]          # forward-direction rows of hidden2tag
    wout_b = wout_ref[Hh:2 * Hh, :]     # backward-direction rows of hidden2tag
    feats2d = (jnp.dot(hsf[...], wout_f, preferred_element_type=jnp.float32)
               + jnp.dot(hsb[...], wout_b, preferred_element_type=jnp.float32)
               + bout_ref[...])
    return feats2d, L, B


# ----------------------------------------------------------------------------
# Fused training kernel: BiLSTM feats + CRF forward algorithm (log partition)
# ----------------------------------------------------------------------------
def _train_kernel(start_idx, stop_idx,
                  emb_ref, h0f_ref, c0f_ref, h0b_ref, c0b_ref,
                  wihf_ref, whhf_ref, bf_ref,
                  wihb_ref, whhb_ref, bb_ref,
                  wout_ref, bout_ref, trans_ref,
                  feats_ref, fwd_ref,
                  hsf, hsb):
    feats2d, L, B = _bilstm_feats(emb_ref, h0f_ref, c0f_ref, h0b_ref, c0b_ref,
                                  wihf_ref, whhf_ref, bf_ref,
                                  wihb_ref, whhb_ref, bb_ref,
                                  wout_ref, bout_ref, hsf, hsb)
    C = trans_ref.shape[0]
    feats_ref[...] = feats2d            # exported once (gold-path scoring in JAX)

    trans = trans_ref[...]              # [C, C]
    trans_b = trans[None, :, :]         # hoisted loop-invariant broadcast
    col = lax.broadcasted_iota(jnp.int32, (B, C), 1)
    ms = jnp.where(col == start_idx, 0.0,
                   jnp.full((B, C), NEG_INF, jnp.float32))

    for t in range(L):                  # fully unrolled DP
        emit = feats2d[t * B:(t + 1) * B, :]                # [B, C]
        acc = ms[:, None, :] + trans_b                      # [B, C, C]
        mx = jnp.max(acc, axis=-1)                          # [B, C]
        # emission is constant over the reduced (prev-tag) axis -> add after lse
        ms = emit + mx + jnp.log(jnp.sum(jnp.exp(acc - mx[..., None]), axis=-1))

    final = ms + trans[stop_idx:stop_idx + 1, :]            # [B, C]
    mx = jnp.max(final, axis=-1, keepdims=True)
    fwd_ref[...] = mx + jnp.log(jnp.sum(jnp.exp(final - mx),
                                        axis=-1, keepdims=True))


# ----------------------------------------------------------------------------
# Fused eval kernel: BiLSTM feats + CRF Viterbi DP (max + backpointers)
# ----------------------------------------------------------------------------
def _viterbi_kernel(start_idx, stop_idx,
                    emb_ref, h0f_ref, c0f_ref, h0b_ref, c0b_ref,
                    wihf_ref, whhf_ref, bf_ref,
                    wihb_ref, whhb_ref, bb_ref,
                    wout_ref, bout_ref, trans_ref,
                    bps_ref, final_ref,
                    hsf, hsb):
    feats2d, L, B = _bilstm_feats(emb_ref, h0f_ref, c0f_ref, h0b_ref, c0b_ref,
                                  wihf_ref, whhf_ref, bf_ref,
                                  wihb_ref, whhb_ref, bb_ref,
                                  wout_ref, bout_ref, hsf, hsb)
    C = trans_ref.shape[0]

    trans = trans_ref[...]                                  # [C, C]
    trans_b = trans[None, :, :]                             # hoisted broadcast
    idx = lax.broadcasted_iota(jnp.int32, (B, C, C), 2)     # hoisted iota
    col = lax.broadcasted_iota(jnp.int32, (B, C), 1)
    ms = jnp.where(col == start_idx, 0.0,
                   jnp.full((B, C), NEG_INF, jnp.float32))

    for t in range(L):                  # fully unrolled DP
        emit = feats2d[t * B:(t + 1) * B, :]                # [B, C]
        acc = ms[:, None, :] + trans_b                      # [B, C, C]
        mx = jnp.max(acc, axis=-1)                          # [B, C]
        # first-occurrence argmax (matches torch.max index semantics); mx is an
        # exact element of acc so the equality compare is exact.
        bp = jnp.min(jnp.where(acc == mx[..., None], idx, C), axis=-1)
        bps_ref[t] = bp.astype(jnp.int32)
        ms = mx + emit

    final_ref[...] = ms + trans[stop_idx:stop_idx + 1, :]


# ----------------------------------------------------------------------------
# Wrappers
# ----------------------------------------------------------------------------
def _kernel_inputs(params, emb2d, h0, c0):
    return (emb2d, h0[0], c0[0], h0[1], c0[1],
            params["w_ih_f"], params["w_hh_f"], params["b_f"],
            params["w_ih_b"], params["w_hh_b"], params["b_b"],
            params["w_out"], params["b_out"], params["transitions"])


def crf_forward_fused(params, emb2d, h0, c0, L, B):
    C = params["transitions"].shape[0]
    Hh = h0.shape[-1]
    inputs = _kernel_inputs(params, emb2d, h0, c0)
    feats2d, fwd = pl.pallas_call(
        functools.partial(_train_kernel, START_IDX, STOP_IDX),
        out_shape=(jax.ShapeDtypeStruct((L * B, C), jnp.float32),
                   jax.ShapeDtypeStruct((B, 1), jnp.float32)),
        in_specs=[_VMEM] * len(inputs),
        out_specs=(_VMEM, _VMEM),
        scratch_shapes=[pltpu.VMEM((L * B, Hh), jnp.float32),   # fwd-dir h seq
                        pltpu.VMEM((L * B, Hh), jnp.float32)],  # bwd-dir h seq
    )(*inputs)
    return feats2d, fwd[:, 0]


def crf_viterbi_fused(params, emb2d, h0, c0, L, B):
    C = params["transitions"].shape[0]
    Hh = h0.shape[-1]
    inputs = _kernel_inputs(params, emb2d, h0, c0)
    bps, final = pl.pallas_call(
        functools.partial(_viterbi_kernel, START_IDX, STOP_IDX),
        out_shape=(jax.ShapeDtypeStruct((L, B, C), jnp.int32),
                   jax.ShapeDtypeStruct((B, C), jnp.float32)),
        in_specs=[_VMEM] * len(inputs),
        out_specs=(_VMEM, _VMEM),
        scratch_shapes=[pltpu.VMEM((L * B, Hh), jnp.float32),
                        pltpu.VMEM((L * B, Hh), jnp.float32)],
    )(*inputs)
    return bps, final


# ----------------------------------------------------------------------------
# Plain-JAX glue
# ----------------------------------------------------------------------------
def score_sentence(feats_blc, tags, transitions, start_idx, stop_idx):
    """Gold path score. feats_blc: [B, L, C]; tags: [B, L] int32."""
    B, L, _ = feats_blc.shape
    emit = jnp.take_along_axis(feats_blc, tags[..., None], axis=2)[..., 0]  # [B, L]
    start = jnp.full((B, 1), start_idx, dtype=tags.dtype)
    tags_ext = jnp.concatenate([start, tags], axis=1)                       # [B, L+1]
    trans_scores = transitions[tags_ext[:, 1:], tags_ext[:, :-1]]           # [B, L]
    return (jnp.sum(trans_scores + emit, axis=1)
            + transitions[stop_idx, tags_ext[:, -1]])


@functools.partial(jax.jit, static_argnames=("training",))
def bilstm_crf_forward(params, sentences, h0, c0, tags=None, training=False):
    """training=True -> scalar NLL loss; training=False -> (best_score [B], best_paths [B, L])."""
    B, L = sentences.shape
    C = params["transitions"].shape[0]
    embeds = params["emb"][sentences].astype(jnp.float32)           # [B, L, E]
    # time-major rows (t, b) so kernel operands stay 2-D
    emb2d = jnp.transpose(embeds, (1, 0, 2)).reshape(L * B, -1)     # [L*B, E]

    if training:
        feats2d, fwd = crf_forward_fused(params, emb2d, h0, c0, L, B)
        feats_blc = feats2d.reshape(L, B, C).transpose(1, 0, 2)     # [B, L, C]
        gold = score_sentence(feats_blc, tags.astype(jnp.int32),
                              params["transitions"], START_IDX, STOP_IDX)
        return jnp.mean(fwd - gold)

    bps, final = crf_viterbi_fused(params, emb2d, h0, c0, L, B)
    best_score = jnp.max(final, axis=-1)                            # [B]
    best_tag = jnp.argmax(final, axis=-1).astype(jnp.int32)         # [B]

    # On-device backtracking (reverse scan) instead of a host numpy loop.
    def bt_step(tag, bp_t):
        prev = jnp.take_along_axis(bp_t, tag[:, None], axis=1)[:, 0]
        return prev, tag                                            # emit tag at time t
    _, path = lax.scan(bt_step, best_tag, bps, reverse=True)        # [L, B]
    best_paths = jnp.transpose(path)                                # [B, L]
    return best_score, best_paths


# ----------------------------------------------------------------------------
# Deterministic parameter initialization (matches the module's shapes)
# ----------------------------------------------------------------------------
def init_params(key, vocab_size, E, H, C):
    Hh = H // 2
    ks = jax.random.split(key, 12)

    def randn(k, shape, scale=0.1):
        return scale * jax.random.normal(k, shape, jnp.float32)

    emb = randn(ks[0], (vocab_size, E), 1.0)
    w_ih_f = randn(ks[1], (4 * Hh, E))
    w_hh_f = randn(ks[2], (4 * Hh, Hh))
    b_ih_f = randn(ks[3], (4 * Hh,))
    b_hh_f = randn(ks[4], (4 * Hh,))
    w_ih_b = randn(ks[5], (4 * Hh, E))
    w_hh_b = randn(ks[6], (4 * Hh, Hh))
    b_ih_b = randn(ks[7], (4 * Hh,))
    b_hh_b = randn(ks[8], (4 * Hh,))
    w_out = randn(ks[9], (C, H))
    b_out = randn(ks[10], (C,))
    transitions = jax.random.normal(ks[11], (C, C), jnp.float32)
    transitions = transitions.at[START_IDX, :].set(NEG_INF)
    transitions = transitions.at[:, STOP_IDX].set(NEG_INF)

    # TODO(synk): at production sizes cast LSTM / hidden2tag weights to bf16 on
    # v6e/v7x (f32 accumulation kept via preferred_element_type).
    return dict(
        emb=emb,
        # pre-transposed so kernels compute x @ W (PyTorch stores W as [out, in])
        w_ih_f=w_ih_f.T, w_hh_f=w_hh_f.T, b_f=(b_ih_f + b_hh_f)[None, :],
        w_ih_b=w_ih_b.T, w_hh_b=w_hh_b.T, b_b=(b_ih_b + b_hh_b)[None, :],
        w_out=w_out.T, b_out=b_out[None, :],
        transitions=transitions,
    )


# ----------------------------------------------------------------------------
if __name__ == "__main__":
    vocab_size = 20
    E = 16            # embedding_dim
    H = 32            # hidden_dim (Hh = 16 per direction)
    C = len(TAG_TO_IX)
    B, L = 2, 8

    key = jax.random.PRNGKey(0)
    k_par, k_sent, k_tags, k_h0, k_c0 = jax.random.split(key, 5)

    params = init_params(k_par, vocab_size, E, H, C)
    sentences = jax.random.randint(k_sent, (B, L), 0, vocab_size, dtype=jnp.int32)
    tags = jax.random.randint(k_tags, (B, L), 0, 3, dtype=jnp.int32)  # real tags only
    # init_hidden() equivalent (torch.randn(2, B, H//2)), generated deterministically
    h0 = jax.random.normal(k_h0, (2, B, H // 2), jnp.float32)
    c0 = jax.random.normal(k_c0, (2, B, H // 2), jnp.float32)

    # eval-mode forward (fused BiLSTM + Viterbi, on-device backtracking)
    best_score, best_paths = bilstm_crf_forward(params, sentences, h0, c0,
                                                training=False)
    best_score, best_paths = jax.block_until_ready((best_score, best_paths))
    assert best_score.shape == (B,)
    assert best_paths.shape == (B, L)
    assert bool(jnp.all(jnp.isfinite(best_score)))
    assert bool(jnp.all((best_paths >= 0) & (best_paths < C)))

    # training-mode forward (fused BiLSTM + CRF forward-alg -> NLL loss)
    # NOTE: the original module branches on the global `model.training`;
    # here it is an explicit `training` flag.
    loss = bilstm_crf_forward(params, sentences, h0, c0, tags=tags, training=True)
    loss = jax.block_until_ready(loss)
    assert loss.shape == ()
    assert bool(jnp.isfinite(loss))

    print("KERNEL_OK")
</pallas_src>

<mosaic_0001>
module attributes {stable_mosaic.version = 11 : i64} {
  func.func @_viterbi_kernel(%arg0: memref<16x16xf32, #tpu.memory_space<vmem>>, %arg1: memref<2x16xf32, #tpu.memory_space<vmem>>, %arg2: memref<2x16xf32, #tpu.memory_space<vmem>>, %arg3: memref<2x16xf32, #tpu.memory_space<vmem>>, %arg4: memref<2x16xf32, #tpu.memory_space<vmem>>, %arg5: memref<16x64xf32, #tpu.memory_space<vmem>>, %arg6: memref<16x64xf32, #tpu.memory_space<vmem>>, %arg7: memref<1x64xf32, #tpu.memory_space<vmem>>, %arg8: memref<16x64xf32, #tpu.memory_space<vmem>>, %arg9: memref<16x64xf32, #tpu.memory_space<vmem>>, %arg10: memref<1x64xf32, #tpu.memory_space<vmem>>, %arg11: memref<32x5xf32, #tpu.memory_space<vmem>>, %arg12: memref<1x5xf32, #tpu.memory_space<vmem>>, %arg13: memref<5x5xf32, #tpu.memory_space<vmem>>, %arg14: memref<8x2x5xi32, #tpu.memory_space<vmem>>, %arg15: memref<2x5xf32, #tpu.memory_space<vmem>>, %arg16: memref<16x16xf32, #tpu.memory_space<vmem>>, %arg17: memref<16x16xf32, #tpu.memory_space<vmem>>) attributes {dimension_semantics = [], scalar_prefetch = 0 : i64, scratch_operands = 2 : i64, tpu.core_type = #tpu.core_type<tc>} {
    %c0 = arith.constant 0 : index
    %c0_0 = arith.constant 0 : index
    %0 = vector.load %arg0[%c0, %c0_0] : memref<16x16xf32, #tpu.memory_space<vmem>>, vector<16x16xf32>
    %c0_1 = arith.constant 0 : index
    %c0_2 = arith.constant 0 : index
    %1 = vector.load %arg5[%c0_1, %c0_2] : memref<16x64xf32, #tpu.memory_space<vmem>>, vector<16x64xf32>
    %cst = arith.constant dense<0.000000e+00> : vector<16x64xf32>
    %2 = tpu.matmul %0, %1, %cst {dimension_numbers = #tpu.dot_dimension_numbers<[1], [0], [0], [1], [0, 0, 1, 1], [], []>} : vector<16x16xf32>, vector<16x64xf32>, vector<16x64xf32> -> vector<16x64xf32>
    %c0_3 = arith.constant 0 : index
    %c0_4 = arith.constant 0 : index
    %3 = vector.load %arg7[%c0_3, %c0_4] : memref<1x64xf32, #tpu.memory_space<vmem>>, vector<1x64xf32>
    %4 = vector.broadcast %3 : vector<1x64xf32> to vector<16x64xf32>
    %5 = arith.addf %2, %4 : vector<16x64xf32>
    %c0_5 = arith.constant 0 : index
    %c0_6 = arith.constant 0 : index
    %6 = vector.load %arg8[%c0_5, %c0_6] : memref<16x64xf32, #tpu.memory_space<vmem>>, vector<16x64xf32>
    %cst_7 = arith.constant dense<0.000000e+00> : vector<16x64xf32>
    %7 = tpu.matmul %0, %6, %cst_7 {dimension_numbers = #tpu.dot_dimension_numbers<[1], [0], [0], [1], [0, 0, 1, 1], [], []>} : vector<16x16xf32>, vector<16x64xf32>, vector<16x64xf32> -> vector<16x64xf32>
    %c0_8 = arith.constant 0 : index
    %c0_9 = arith.constant 0 : index
    %8 = vector.load %arg10[%c0_8, %c0_9] : memref<1x64xf32, #tpu.memory_space<vmem>>, vector<1x64xf32>
    %9 = vector.broadcast %8 : vector<1x64xf32> to vector<16x64xf32>
    %10 = arith.addf %7, %9 : vector<16x64xf32>
    %c0_10 = arith.constant 0 : index
    %c0_11 = arith.constant 0 : index
    %11 = vector.load %arg6[%c0_10, %c0_11] : memref<16x64xf32, #tpu.memory_space<vmem>>, vector<16x64xf32>
    %c0_12 = arith.constant 0 : index
    %c0_13 = arith.constant 0 : index
    %12 = vector.load %arg9[%c0_12, %c0_13] : memref<16x64xf32, #tpu.memory_space<vmem>>, vector<16x64xf32>
    %c0_14 = arith.constant 0 : index
    %c0_15 = arith.constant 0 : index
    %13 = vector.load %arg1[%c0_14, %c0_15] : memref<2x16xf32, #tpu.memory_space<vmem>>, vector<2x16xf32>
    %c0_16 = arith.constant 0 : index
    %c0_17 = arith.constant 0 : index
    %14 = vector.load %arg2[%c0_16, %c0_17] : memref<2x16xf32, #tpu.memory_space<vmem>>, vector<2x16xf32>
    %c0_18 = arith.constant 0 : index
    %c0_19 = arith.constant 0 : index
    %15 = vector.load %arg3[%c0_18, %c0_19] : memref<2x16xf32, #tpu.memory_space<vmem>>, vector<2x16xf32>
    %c0_20 = arith.constant 0 : index
    %c0_21 = arith.constant 0 : index
    %16 = vector.load %arg4[%c0_20, %c0_21] : memref<2x16xf32, #tpu.memory_space<vmem>>, vector<2x16xf32>
    %17 = vector.extract_strided_slice %5 {offsets = [0, 0], sizes = [2, 64], strides = [1, 1]} : vector<16x64xf32> to vector<2x64xf32>
    %cst_22 = arith.constant dense<0.000000e+00> : vector<2x64xf32>
    %18 = tpu.matmul %13, %11, %cst_22 {dimension_numbers = #tpu.dot_dimension_numbers<[1], [0], [0], [1], [0, 0, 1, 1], [], []>} : vector<2x16xf32>, vector<16x64xf32>, vector<2x64xf32> -> vector<2x64xf32>
    %19 = arith.addf %17, %18 : vector<2x64xf32>
    %20 = vector.extract_strided_slice %10 {offsets = [14, 0], sizes = [2, 64], strides = [1, 1]} : vector<16x64xf32> to vector<2x64xf32>
    %cst_23 = arith.constant dense<0.000000e+00> : vector<2x64xf32>
    %21 = tpu.matmul %15, %12, %cst_23 {dimension_numbers = #tpu.dot_dimension_numbers<[1], [0], [0], [1], [0, 0, 1, 1], [], []>} : vector<2x16xf32>, vector<16x64xf32>, vector<2x64xf32> -> vector<2x64xf32>
    %22 = arith.addf %20, %21 : vector<2x64xf32>
    %23 = vector.extract_strided_slice %19 {offsets = [0, 0], sizes = [2, 16], strides = [1, 1]} : vector<2x64xf32> to vector<2x16xf32>
    %24 = arith.negf %23 : vector<2x16xf32>
    %25 = math.exp %24 : vector<2x16xf32>
    %cst_24 = arith.constant 1.000000e+00 : f32
    %26 = vector.broadcast %cst_24 : f32 to vector<2x16xf32>
    %27 = arith.addf %26, %25 : vector<2x16xf32>
    %28 = arith.divf %26, %27 : vector<2x16xf32>
    %29 = vector.extract_strided_slice %19 {offsets = [0, 16], sizes = [2, 16], strides = [1, 1]} : vector<2x64xf32> to vector<2x16xf32>
    %30 = arith.negf %29 : vector<2x16xf32>
    %31 = math.exp %30 : vector<2x16xf32>
    %cst_25 = arith.constant 1.000000e+00 : f32
    %32 = vector.broadcast %cst_25 : f32 to vector<2x16xf32>
    %33 = arith.addf %32, %31 : vector<2x16xf32>
    %34 = arith.divf %32, %33 : vector<2x16xf32>
    %35 = vector.extract_strided_slice %19 {offsets = [0, 32], sizes = [2, 16], strides = [1, 1]} : vector<2x64xf32> to vector<2x16xf32>
    %36 = math.tanh %35 : vector<2x16xf32>
    %37 = vector.extract_strided_slice %19 {offsets = [0, 48], sizes = [2, 16], strides = [1, 1]} : vector<2x64xf32> to vector<2x16xf32>
    %38 = arith.negf %37 : vector<2x16xf32>
    %39 = math.exp %38 : vector<2x16xf32>
    %cst_26 = arith.constant 1.000000e+00 : f32
    %40 = vector.broadcast %cst_26 : f32 to vector<2x16xf32>
    %41 = arith.addf %40, %39 : vector<2x16xf32>
    %42 = arith.divf %40, %41 : vector<2x16xf32>
    %43 = arith.mulf %34, %14 : vector<2x16xf32>
    %44 = arith.mulf %28, %36 : vector<2x16xf32>
    %45 = arith.addf %43, %44 : vector<2x16xf32>
    %46 = math.tanh %45 : vector<2x16xf32>
    %47 = arith.mulf %42, %46 : vector<2x16xf32>
    %48 = vector.extract_strided_slice %22 {offsets = [0, 0], sizes = [2, 16], strides = [1, 1]} : vector<2x64xf32> to vector<2x16xf32>
    %49 = arith.negf %48 : vector<2x16xf32>
    %50 = math.exp %49 : vector<2x16xf32>
    %cst_27 = arith.constant 1.000000e+00 : f32
    %51 = vector.broadcast %cst_27 : f32 to vector<2x16xf32>
    %52 = arith.addf %51, %50 : vector<2x16xf32>
    %53 = arith.divf %51, %52 : vector<2x16xf32>
    %54 = vector.extract_strided_slice %22 {offsets = [0, 16], sizes = [2, 16], strides = [1, 1]} : vector<2x64xf32> to vector<2x16xf32>
    %55 = arith.negf %54 : vector<2x16xf32>
    %56 = math.exp %55 : vector<2x16xf32>
    %cst_28 = arith.constant 1.000000e+00 : f32
    %57 = vector.broadcast %cst_28 : f32 to vector<2x16xf32>
    %58 = arith.addf %57, %56 : vector<2x16xf32>
    %59 = arith.divf %57, %58 : vector<2x16xf32>
    %60 = vector.extract_strided_slice %22 {offsets = [0, 32], sizes = [2, 16], strides = [1, 1]} : vector<2x64xf32> to vector<2x16xf32>
    %61 = math.tanh %60 : vector<2x16xf32>
    %62 = vector.extract_strided_slice %22 {offsets = [0, 48], sizes = [2, 16], strides = [1, 1]} : vector<2x64xf32> to vector<2x16xf32>
    %63 = arith.negf %62 : vector<2x16xf32>
    %64 = math.exp %63 : vector<2x16xf32>
    %cst_29 = arith.constant 1.000000e+00 : f32
    %65 = vector.broadcast %cst_29 : f32 to vector<2x16xf32>
    %66 = arith.addf %65, %64 : vector<2x16xf32>
    %67 = arith.divf %65, %66 : vector<2x16xf32>
    %68 = arith.mulf %59, %16 : vector<2x16xf32>
    %69 = arith.mulf %53, %61 : vector<2x16xf32>
    %70 = arith.addf %68, %69 : vector<2x16xf32>
    %71 = math.tanh %70 : vector<2x16xf32>
    %72 = arith.mulf %67, %71 : vector<2x16xf32>
    %c0_30 = arith.constant 0 : index
    %c0_31 = arith.constant 0 : index
    %73 = vector.load %arg16[%c0_30, %c0_31] : memref<16x16xf32, #tpu.memory_space<vmem>>, vector<2x16xf32>
    tpu.vector_store %arg16[%c0_30, %c0_31], %47 {strides = array<i32>} : memref<16x16xf32, #tpu.memory_space<vmem>>, vector<2x16xf32>,
    %c14 = arith.constant 14 : index
    %c0_32 = arith.constant 0 : index
    %74 = vector.load %arg17[%c14, %c0_32] : memref<16x16xf32, #tpu.memory_space<vmem>>, vector<2x16xf32>
    tpu.vector_store %arg17[%c14, %c0_32], %72 {strides = array<i32>} : memref<16x16xf32, #tpu.memory_space<vmem>>, vector<2x16xf32>,
    %75 = vector.extract_strided_slice %5 {offsets = [2, 0], sizes = [2, 64], strides = [1, 1]} : vector<16x64xf32> to vector<2x64xf32>
    %cst_33 = arith.constant dense<0.000000e+00> : vector<2x64xf32>
    %76 = tpu.matmul %47, %11, %cst_33 {dimension_numbers = #tpu.dot_dimension_numbers<[1], [0], [0], [1], [0, 0, 1, 1], [], []>} : vector<2x16xf32>, vector<16x64xf32>, vector<2x64xf32> -> vector<2x64xf32>
    %77 = arith.addf %75, %76 : vector<2x64xf32>
    %78 = vector.extract_strided_slice %10 {offsets = [12, 0], sizes = [2, 64], strides = [1, 1]} : vector<16x64xf32> to vector<2x64xf32>
    %cst_34 = arith.constant dense<0.000000e+00> : vector<2x64xf32>
    %79 = tpu.matmul %72, %12, %cst_34 {dimension_numbers = #tpu.dot_dimension_numbers<[1], [0], [0], [1], [0, 0, 1, 1], [], []>} : vector<2x16xf32>, vector<16x64xf32>, vector<2x64xf32> -> vector<2x64xf32>
    %80 = arith.addf %78, %79 : vector<2x64xf32>
    %81 = vector.extract_strided_slice %77 {offsets = [0, 0], sizes = [2, 16], strides = [1, 1]} : vector<2x64xf32> to vector<2x16xf32>
    %82 = arith.negf %81 : vector<2x16xf32>
    %83 = math.exp %82 : vector<2x16xf32>
    %cst_35 = arith.constant 1.000000e+00 : f32
    %84 = vector.broadcast %cst_35 : f32 to vector<2x16xf32>
    %85 = arith.addf %84, %83 : vector<2x16xf32>
    %86 = arith.divf %84, %85 : vector<2x16xf32>
    %87 = vector.extract_strided_slice %77 {offsets = [0, 16], sizes = [2, 16], strides = [1, 1]} : vector<2x64xf32> to vector<2x16xf32>
    %88 = arith.negf %87 : vector<2x16xf32>
    %89 = math.exp %88 : vector<2x16xf32>
    %cst_36 = arith.constant 1.000000e+00 : f32
    %90 = vector.broadcast %cst_36 : f32 to vector<2x16xf32>
    %91 = arith.addf %90, %89 : vector<2x16xf32>
    %92 = arith.divf %90, %91 : vector<2x16xf32>
    %93 = vector.extract_strided_slice %77 {offsets = [0, 32], sizes = [2, 16], strides = [1, 1]} : vector<2x64xf32> to vector<2x16xf32>
    %94 = math.tanh %93 : vector<2x16xf32>
    %95 = vector.extract_strided_slice %77 {offsets = [0, 48], sizes = [2, 16], strides = [1, 1]} : vector<2x64xf32> to vector<2x16xf32>
    %96 = arith.negf %95 : vector<2x16xf32>
    %97 = math.exp %96 : vector<2x16xf32>
    %cst_37 = arith.constant 1.000000e+00 : f32
    %98 = vector.broadcast %cst_37 : f32 to vector<2x16xf32>
    %99 = arith.addf %98, %97 : vector<2x16xf32>
    %100 = arith.divf %98, %99 : vector<2x16xf32>
    %101 = arith.mulf %92, %45 : vector<2x16xf32>
    %102 = arith.mulf %86, %94 : vector<2x16xf32>
    %103 = arith.addf %101, %102 : vector<2x16xf32>
    %104 = math.tanh %103 : vector<2x16xf32>
    %105 = arith.mulf %100, %104 : vector<2x16xf32>
    %106 = vector.extract_strided_slice %80 {offsets = [0, 0], sizes = [2, 16], strides = [1, 1]} : vector<2x64xf32> to vector<2x16xf32>
    %107 = arith.negf %106 : vector<2x16xf32>
    %108 = math.exp %107 : vector<2x16xf32>
    %cst_38 = arith.constant 1.000000e+00 : f32
    %109 = vector.broadcast %cst_38 : f32 to vector<2x16xf32>
    %110 = arith.addf %109, %108 : vector<2x16xf32>
    %111 = arith.divf %109, %110 : vector<2x16xf32>
    %112 = vector.extract_strided_slice %80 {offsets = [0, 16], sizes = [2, 16], strides = [1, 1]} : vector<2x64xf32> to vector<2x16xf32>
    %113 = arith.negf %112 : vector<2x16xf32>
    %114 = math.exp %113 : vector<2x16xf32>
    %cst_39 = arith.constant 1.000000e+00 : f32
    %115 = vector.broadcast %cst_39 : f32 to vector<2x16xf32>
    %116 = arith.addf %115, %114 : vector<2x16xf32>
    %117 = arith.divf %115, %116 : vector<2x16xf32>
    %118 = vector.extract_strided_slice %80 {offsets = [0, 32], sizes = [2, 16], strides = [1, 1]} : vector<2x64xf32> to vector<2x16xf32>
    %119 = math.tanh %118 : vector<2x16xf32>
    %120 = vector.extract_strided_slice %80 {offsets = [0, 48], sizes = [2, 16], strides = [1, 1]} : vector<2x64xf32> to vector<2x16xf32>
    %121 = arith.negf %120 : vector<2x16xf32>
    %122 = math.exp %121 : vector<2x16xf32>
    %cst_40 = arith.constant 1.000000e+00 : f32
    %123 = vector.broadcast %cst_40 : f32 to vector<2x16xf32>
    %124 = arith.addf %123, %122 : vector<2x16xf32>
    %125 = arith.divf %123, %124 : vector<2x16xf32>
    %126 = arith.mulf %117, %70 : vector<2x16xf32>
    %127 = arith.mulf %111, %119 : vector<2x16xf32>
    %128 = arith.addf %126, %127 : vector<2x16xf32>
    %129 = math.tanh %128 : vector<2x16xf32>
    %130 = arith.mulf %125, %129 : vector<2x16xf32>
    %c2 = arith.constant 2 : index
    %c0_41 = arith.constant 0 : index
    %131 = vector.load %arg16[%c2, %c0_41] : memref<16x16xf32, #tpu.memory_space<vmem>>, vector<2x16xf32>
    tpu.vector_store %arg16[%c2, %c0_41], %105 {strides = array<i32>} : memref<16x16xf32, #tpu.memory_space<vmem>>, vector<2x16xf32>,
    %c12 = arith.constant 12 : index
    %c0_42 = arith.constant 0 : index
    %132 = vector.load %arg17[%c12, %c0_42] : memref<16x16xf32, #tpu.memory_space<vmem>>, vector<2x16xf32>
    tpu.vector_store %arg17[%c12, %c0_42], %130 {strides = array<i32>} : memref<16x16xf32, #tpu.memory_space<vmem>>, vector<2x16xf32>,
    %133 = vector.extract_strided_slice %5 {offsets = [4, 0], sizes = [2, 64], strides = [1, 1]} : vector<16x64xf32> to vector<2x64xf32>
    %cst_43 = arith.constant dense<0.000000e+00> : vector<2x64xf32>
    %134 = tpu.matmul %105, %11, %cst_43 {dimension_numbers = #tpu.dot_dimension_numbers<[1], [0], [0], [1], [0, 0, 1, 1], [], []>} : vector<2x16xf32>, vector<16x64xf32>, vector<2x64xf32> -> vector<2x64xf32>
    %135 = arith.addf %133, %134 : vector<2x64xf32>
    %136 = vector.extract_strided_slice %10 {offsets = [10, 0], sizes = [2, 64], strides = [1, 1]} : vector<16x64xf32> to vector<2x64xf32>
    %cst_44 = arith.constant dense<0.000000e+00> : vector<2x64xf32>
    %137 = tpu.matmul %130, %12, %cst_44 {dimension_numbers = #tpu.dot_dimension_numbers<[1], [0], [0], [1], [0, 0, 1, 1], [], []>} : vector<2x16xf32>, vector<16x64xf32>, vector<2x64xf32> -> vector<2x64xf32>
    %138 = arith.addf %136, %137 : vector<2x64xf32>
    %139 = vector.extract_strided_slice %135 {offsets = [0, 0], sizes = [2, 16], strides = [1, 1]} : vector<2x64xf32> to vector<2x16xf32>
    %140 = arith.negf %139 : vector<2x16xf32>
    %141 = math.exp %140 : vector<2x16xf32>
    %cst_45 = arith.constant 1.000000e+00 : f32
    %142 = vector.broadcast %cst_45 : f32 to vector<2x16xf32>
    %143 = arith.addf %142, %141 : vector<2x16xf32>
    %144 = arith.divf %142, %143 : vector<2x16xf32>
    %145 = vector.extract_strided_slice %135 {offsets = [0, 16], sizes = [2, 16], strides = [1, 1]} : vector<2x64xf32> to vector<2x16xf32>
    %146 = arith.negf %145 : vector<2x16xf32>
    %147 = math.exp %146 : vector<2x16xf32>
    %cst_46 = arith.constant 1.000000e+00 : f32
    %148 = vector.broadcast %cst_46 : f32 to vector<2x16xf32>
    %149 = arith.addf %148, %147 : vector<2x16xf32>
    %150 = arith.divf %148, %149 : vector<2x16xf32>
    %151 = vector.extract_strided_slice %135 {offsets = [0, 32], sizes = [2, 16], strides = [1, 1]} : vector<2x64xf32> to vector<2x16xf32>
    %152 = math.tanh %151 : vector<2x16xf32>
    %153 = vector.extract_strided_slice %135 {offsets = [0, 48], sizes = [2, 16], strides = [1, 1]} : vector<2x64xf32> to vector<2x16xf32>
    %154 = arith.negf %153 : vector<2x16xf32>
    %155 = math.exp %154 : vector<2x16xf32>
    %cst_47 = arith.constant 1.000000e+00 : f32
    %156 = vector.broadcast %cst_47 : f32 to vector<2x16xf32>
    %157 = arith.addf %156, %155 : vector<2x16xf32>
    %158 = arith.divf %156, %157 : vector<2x16xf32>
    %159 = arith.mulf %150, %103 : vector<2x16xf32>
    %160 = arith.mulf %144, %152 : vector<2x16xf32>
    %161 = arith.addf %159, %160 : vector<2x16xf32>
    %162 = math.tanh %161 : vector<2x16xf32>
    %163 = arith.mulf %158, %162 : vector<2x16xf32>
    %164 = vector.extract_strided_slice %138 {offsets = [0, 0], sizes = [2, 16], strides = [1, 1]} : vector<2x64xf32> to vector<2x16xf32>
    %165 = arith.negf %164 : vector<2x16xf32>
    %166 = math.exp %165 : vector<2x16xf32>
    %cst_48 = arith.constant 1.000000e+00 : f32
    %167 = vector.broadcast %cst_48 : f32 to vector<2x16xf32>
    %168 = arith.addf %167, %166 : vector<2x16xf32>
    %169 = arith.divf %167, %168 : vector<2x16xf32>
    %170 = vector.extract_strided_slice %138 {offsets = [0, 16], sizes = [2, 16], strides = [1, 1]} : vector<2x64xf32> to vector<2x16xf32>
    %171 = arith.negf %170 : vector<2x16xf32>
    %172 = math.exp %171 : vector<2x16xf32>
    %cst_49 = arith.constant 1.000000e+00 : f32
    %173 = vector.broadcast %cst_49 : f32 to vector<2x16xf32>
    %174 = arith.addf %173, %172 : vector<2x16xf32>
    %175 = arith.divf %173, %174 : vector<2x16xf32>
    %176 = vector.extract_strided_slice %138 {offsets = [0, 32], sizes = [2, 16], strides = [1, 1]} : vector<2x64xf32> to vector<2x16xf32>
    %177 = math.tanh %176 : vector<2x16xf32>
    %178 = vector.extract_strided_slice %138 {offsets = [0, 48], sizes = [2, 16], strides = [1, 1]} : vector<2x64xf32> to vector<2x16xf32>
    %179 = arith.negf %178 : vector<2x16xf32>
    %180 = math.exp %179 : vector<2x16xf32>
    %cst_50 = arith.constant 1.000000e+00 : f32
    %181 = vector.broadcast %cst_50 : f32 to vector<2x16xf32>
    %182 = arith.addf %181, %180 : vector<2x16xf32>
    %183 = arith.divf %181, %182 : vector<2x16xf32>
    %184 = arith.mulf %175, %128 : vector<2x16xf32>
    %185 = arith.mulf %169, %177 : vector<2x16xf32>
    %186 = arith.addf %184, %185 : vector<2x16xf32>
    %187 = math.tanh %186 : vector<2x16xf32>
    %188 = arith.mulf %183, %187 : vector<2x16xf32>
    %c4 = arith.constant 4 : index
    %c0_51 = arith.constant 0 : index
    %189 = vector.load %arg16[%c4, %c0_51] : memref<16x16xf32, #tpu.memory_space<vmem>>, vector<2x16xf32>
    tpu.vector_store %arg16[%c4, %c0_51], %163 {strides = array<i32>} : memref<16x16xf32, #tpu.memory_space<vmem>>, vector<2x16xf32>,
    %c10 = arith.constant 10 : index
    %c0_52 = arith.constant 0 : index
    %190 = vector.load %arg17[%c10, %c0_52] : memref<16x16xf32, #tpu.memory_space<vmem>>, vector<2x16xf32>
    tpu.vector_store %arg17[%c10, %c0_52], %188 {strides = array<i32>} : memref<16x16xf32, #tpu.memory_space<vmem>>, vector<2x16xf32>,
    %191 = vector.extract_strided_slice %5 {offsets = [6, 0], sizes = [2, 64], strides = [1, 1]} : vector<16x64xf32> to vector<2x64xf32>
    %cst_53 = arith.constant dense<0.000000e+00> : vector<2x64xf32>
    %192 = tpu.matmul %163, %11, %cst_53 {dimension_numbers = #tpu.dot_dimension_numbers<[1], [0], [0], [1], [0, 0, 1, 1], [], []>} : vector<2x16xf32>, vector<16x64xf32>, vector<2x64xf32> -> vector<2x64xf32>
    %193 = arith.addf %191, %192 : vector<2x64xf32>
    %194 = vector.extract_strided_slice %10 {offsets = [8, 0], sizes = [2, 64], strides = [1, 1]} : vector<16x64xf32> to vector<2x64xf32>
    %cst_54 = arith.constant dense<0.000000e+00> : vector<2x64xf32>
    %195 = tpu.matmul %188, %12, %cst_54 {dimension_numbers = #tpu.dot_dimension_numbers<[1], [0], [0], [1], [0, 0, 1, 1], [], []>} : vector<2x16xf32>, vector<16x64xf32>, vector<2x64xf32> -> vector<2x64xf32>
    %196 = arith.addf %194, %195 : vector<2x64xf32>
    %197 = vector.extract_strided_slice %193 {offsets = [0, 0], sizes = [2, 16], strides = [1, 1]} : vector<2x64xf32> to vector<2x16xf32>
    %198 = arith.negf %197 : vector<2x16xf32>
    %199 = math.exp %198 : vector<2x16xf32>
    %cst_55 = arith.constant 1.000000e+00 : f32
    %200 = vector.broadcast %cst_55 : f32 to vector<2x16xf32>
    %201 = arith.addf %200, %199 : vector<2x16xf32>
    %202 = arith.divf %200, %201 : vector<2x16xf32>
    %203 = vector.extract_strided_slice %193 {offsets = [0, 16], sizes = [2, 16], strides = [1, 1]} : vector<2x64xf32> to vector<2x16xf32>
    %204 = arith.negf %203 : vector<2x16xf32>
    %205 = math.exp %204 : vector<2x16xf32>
    %cst_56 = arith.constant 1.000000e+00 : f32
    %206 = vector.broadcast %cst_56 : f32 to vector<2x16xf32>
    %207 = arith.addf %206, %205 : vector<2x16xf32>
    %208 = arith.divf %206, %207 : vector<2x16xf32>
    %209 = vector.extract_strided_slice %193 {offsets = [0, 32], sizes = [2, 16], strides = [1, 1]} : vector<2x64xf32> to vector<2x16xf32>
    %210 = math.tanh %209 : vector<2x16xf32>
    %211 = vector.extract_strided_slice %193 {offsets = [0, 48], sizes = [2, 16], strides = [1, 1]} : vector<2x64xf32> to vector<2x16xf32>
    %212 = arith.negf %211 : vector<2x16xf32>
    %213 = math.exp %212 : vector<2x16xf32>
    %cst_57 = arith.constant 1.000000e+00 : f32
    %214 = vector.broadcast %cst_57 : f32 to vector<2x16xf32>
    %215 = arith.addf %214, %213 : vector<2x16xf32>
    %216 = arith.divf %214, %215 : vector<2x16xf32>
    %217 = arith.mulf %208, %161 : vector<2x16xf32>
    %218 = arith.mulf %202, %210 : vector<2x16xf32>
    %219 = arith.addf %217, %218 : vector<2x16xf32>
    %220 = math.tanh %219 : vector<2x16xf32>
    %221 = arith.mulf %216, %220 : vector<2x16xf32>
    %222 = vector.extract_strided_slice %196 {offsets = [0, 0], sizes = [2, 16], strides = [1, 1]} : vector<2x64xf32> to vector<2x16xf32>
    %223 = arith.negf %222 : vector<2x16xf32>
    %224 = math.exp %223 : vector<2x16xf32>
    %cst_58 = arith.constant 1.000000e+00 : f32
    %225 = vector.broadcast %cst_58 : f32 to vector<2x16xf32>
    %226 = arith.addf %225, %224 : vector<2x16xf32>
    %227 = arith.divf %225, %226 : vector<2x16xf32>
    %228 = vector.extract_strided_slice %196 {offsets = [0, 16], sizes = [2, 16], strides = [1, 1]} : vector<2x64xf32> to vector<2x16xf32>
    %229 = arith.negf %228 : vector<2x16xf32>
    %230 = math.exp %229 : vector<2x16xf32>
    %cst_59 = arith.constant 1.000000e+00 : f32
    %231 = vector.broadcast %cst_59 : f32 to vector<2x16xf32>
    %232 = arith.addf %231, %230 : vector<2x16xf32>
    %233 = arith.divf %231, %232 : vector<2x16xf32>
    %234 = vector.extract_strided_slice %196 {offsets = [0, 32], sizes = [2, 16], strides = [1, 1]} : vector<2x64xf32> to vector<2x16xf32>
    %235 = math.tanh %234 : vector<2x16xf32>
    %236 = vector.extract_strided_slice %196 {offsets = [0, 48], sizes = [2, 16], strides = [1, 1]} : vector<2x64xf32> to vector<2x16xf32>
    %237 = arith.negf %236 : vector<2x16xf32>
    %238 = math.exp %237 : vector<2x16xf32>
    %cst_60 = arith.constant 1.000000e+00 : f32
    %239 = vector.broadcast %cst_60 : f32 to vector<2x16xf32>
    %240 = arith.addf %239, %238 : vector<2x16xf32>
    %241 = arith.divf %239, %240 : vector<2x16xf32>
    %242 = arith.mulf %233, %186 : vector<2x16xf32>
    %243 = arith.mulf %227, %235 : vector<2x16xf32>
    %244 = arith.addf %242, %243 : vector<2x16xf32>
    %245 = math.tanh %244 : vector<2x16xf32>
    %246 = arith.mulf %241, %245 : vector<2x16xf32>
    %c6 = arith.constant 6 : index
    %c0_61 = arith.constant 0 : index
    %247 = vector.load %arg16[%c6, %c0_61] : memref<16x16xf32, #tpu.memory_space<vmem>>, vector<2x16xf32>
    tpu.vector_store %arg16[%c6, %c0_61], %221 {strides = array<i32>} : memref<16x16xf32, #tpu.memory_space<vmem>>, vector<2x16xf32>,
    %c8 = arith.constant 8 : index
    %c0_62 = arith.constant 0 : index
    %248 = vector.load %arg17[%c8, %c0_62] : memref<16x16xf32, #tpu.memory_space<vmem>>, vector<2x16xf32>
    tpu.vector_store %arg17[%c8, %c0_62], %246 {strides = array<i32>} : memref<16x16xf32, #tpu.memory_space<vmem>>, vector<2x16xf32>,
    %249 = vector.extract_strided_slice %5 {offsets = [8, 0], sizes = [2, 64], strides = [1, 1]} : vector<16x64xf32> to vector<2x64xf32>
    %cst_63 = arith.constant dense<0.000000e+00> : vector<2x64xf32>
    %250 = tpu.matmul %221, %11, %cst_63 {dimension_numbers = #tpu.dot_dimension_numbers<[1], [0], [0], [1], [0, 0, 1, 1], [], []>} : vector<2x16xf32>, vector<16x64xf32>, vector<2x64xf32> -> vector<2x64xf32>
    %251 = arith.addf %249, %250 : vector<2x64xf32>
    %252 = vector.extract_strided_slice %10 {offsets = [6, 0], sizes = [2, 64], strides = [1, 1]} : vector<16x64xf32> to vector<2x64xf32>
    %cst_64 = arith.constant dense<0.000000e+00> : vector<2x64xf32>
    %253 = tpu.matmul %246, %12, %cst_64 {dimension_numbers = #tpu.dot_dimension_numbers<[1], [0], [0], [1], [0, 0, 1, 1], [], []>} : vector<2x16xf32>, vector<16x64xf32>, vector<2x64xf32> -> vector<2x64xf32>
    %254 = arith.addf %252, %253 : vector<2x64xf32>
    %255 = vector.extract_strided_slice %251 {offsets = [0, 0], sizes = [2, 16], strides = [1, 1]} : vector<2x64xf32> to vector<2x16xf32>
    %256 = arith.negf %255 : vector<2x16xf32>
    %257 = math.exp %256 : vector<2x16xf32>
    %cst_65 = arith.constant 1.000000e+00 : f32
    %258 = vector.broadcast %cst_65 : f32 to vector<2x16xf32>
    %259 = arith.addf %258, %257 : vector<2x16xf32>
    %260 = arith.divf %258, %259 : vector<2x16xf32>
    %261 = vector.extract_strided_slice %251 {offsets = [0, 16], sizes = [2, 16], strides = [1, 1]} : vector<2x64xf32> to vector<2x16xf32>
    %262 = arith.negf %261 : vector<2x16xf32>
    %263 = math.exp %262 : vector<2x16xf32>
    %cst_66 = arith.constant 1.000000e+00 : f32
    %264 = vector.broadcast %cst_66 : f32 to vector<2x16xf32>
    %265 = arith.addf %264, %263 : vector<2x16xf32>
    %266 = arith.divf %264, %265 : vector<2x16xf32>
    %267 = vector.extract_strided_slice %251 {offsets = [0, 32], sizes = [2, 16], strides = [1, 1]} : vector<2x64xf32> to vector<2x16xf32>
    %268 = math.tanh %267 : vector<2x16xf32>
    %269 = vector.extract_strided_slice %251 {offsets = [0, 48], sizes = [2, 16], strides = [1, 1]} : vector<2x64xf32> to vector<2x16xf32>
    %270 = arith.negf %269 : vector<2x16xf32>
    %271 = math.exp %270 : vector<2x16xf32>
    %cst_67 = arith.constant 1.000000e+00 : f32
    %272 = vector.broadcast %cst_67 : f32 to vector<2x16xf32>
    %273 = arith.addf %272, %271 : vector<2x16xf32>
    %274 = arith.divf %272, %273 : vector<2x16xf32>
    %275 = arith.mulf %266, %219 : vector<2x16xf32>
    %276 = arith.mulf %260, %268 : vector<2x16xf32>
    %277 = arith.addf %275, %276 : vector<2x16xf32>
    %278 = math.tanh %277 : vector<2x16xf32>
    %279 = arith.mulf %274, %278 : vector<2x16xf32>
    %280 = vector.extract_strided_slice %254 {offsets = [0, 0], sizes = [2, 16], strides = [1, 1]} : vector<2x64xf32> to vector<2x16xf32>
    %281 = arith.negf %280 : vector<2x16xf32>
    %282 = math.exp %281 : vector<2x16xf32>
    %cst_68 = arith.constant 1.000000e+00 : f32
    %283 = vector.broadcast %cst_68 : f32 to vector<2x16xf32>
    %284 = arith.addf %283, %282 : vector<2x16xf32>
    %285 = arith.divf %283, %284 : vector<2x16xf32>
    %286 = vector.extract_strided_slice %254 {offsets = [0, 16], sizes = [2, 16], strides = [1, 1]} : vector<2x64xf32> to vector<2x16xf32>
    %287 = arith.negf %286 : vector<2x16xf32>
    %288 = math.exp %287 : vector<2x16xf32>
    %cst_69 = arith.constant 1.000000e+00 : f32
    %289 = vector.broadcast %cst_69 : f32 to vector<2x16xf32>
    %290 = arith.addf %289, %288 : vector<2x16xf32>
    %291 = arith.divf %289, %290 : vector<2x16xf32>
    %292 = vector.extract_strided_slice %254 {offsets = [0, 32], sizes = [2, 16], strides = [1, 1]} : vector<2x64xf32> to vector<2x16xf32>
    %293 = math.tanh %292 : vector<2x16xf32>
    %294 = vector.extract_strided_slice %254 {offsets = [0, 48], sizes = [2, 16], strides = [1, 1]} : vector<2x64xf32> to vector<2x16xf32>
    %295 = arith.negf %294 : vector<2x16xf32>
    %296 = math.exp %295 : vector<2x16xf32>
    %cst_70 = arith.constant 1.000000e+00 : f32
    %297 = vector.broadcast %cst_70 : f32 to vector<2x16xf32>
    %298 = arith.addf %297, %296 : vector<2x16xf32>
    %299 = arith.divf %297, %298 : vector<2x16xf32>
    %300 = arith.mulf %291, %244 : vector<2x16xf32>
    %301 = arith.mulf %285, %293 : vector<2x16xf32>
    %302 = arith.addf %300, %301 : vector<2x16xf32>
    %303 = math.tanh %302 : vector<2x16xf32>
    %304 = arith.mulf %299, %303 : vector<2x16xf32>
    %c8_71 = arith.constant 8 : index
    %c0_72 = arith.constant 0 : index
    %305 = vector.load %arg16[%c8_71, %c0_72] : memref<16x16xf32, #tpu.memory_space<vmem>>, vector<2x16xf32>
    tpu.vector_store %arg16[%c8_71, %c0_72], %279 {strides = array<i32>} : memref<16x16xf32, #tpu.memory_space<vmem>>, vector<2x16xf32>,
    %c6_73 = arith.constant 6 : index
    %c0_74 = arith.constant 0 : index
    %306 = vector.load %arg17[%c6_73, %c0_74] : memref<16x16xf32, #tpu.memory_space<vmem>>, vector<2x16xf32>
    tpu.vector_store %arg17[%c6_73, %c0_74], %304 {strides = array<i32>} : memref<16x16xf32, #tpu.memory_space<vmem>>, vector<2x16xf32>,
    %307 = vector.extract_strided_slice %5 {offsets = [10, 0], sizes = [2, 64], strides = [1, 1]} : vector<16x64xf32> to vector<2x64xf32>
    %cst_75 = arith.constant dense<0.000000e+00> : vector<2x64xf32>
    %308 = tpu.matmul %279, %11, %cst_75 {dimension_numbers = #tpu.dot_dimension_numbers<[1], [0], [0], [1], [0, 0, 1, 1], [], []>} : vector<2x16xf32>, vector<16x64xf32>, vector<2x64xf32> -> vector<2x64xf32>
    %309 = arith.addf %307, %308 : vector<2x64xf32>
    %310 = vector.extract_strided_slice %10 {offsets = [4, 0], sizes = [2, 64], strides = [1, 1]} : vector<16x64xf32> to vector<2x64xf32>
    %cst_76 = arith.constant dense<0.000000e+00> : vector<2x64xf32>
    %311 = tpu.matmul %304, %12, %cst_76 {dimension_numbers = #tpu.dot_dimension_numbers<[1], [0], [0], [1], [0, 0, 1, 1], [], []>} : vector<2x16xf32>, vector<16x64xf32>, vector<2x64xf32> -> vector<2x64xf32>
    %312 = arith.addf %310, %311 : vector<2x64xf32>
    %313 = vector.extract_strided_slice %309 {offsets = [0, 0], sizes = [2, 16], strides = [1, 1]} : vector<2x64xf32> to vector<2x16xf32>
    %314 = arith.negf %313 : vector<2x16xf32>
    %315 = math.exp %314 : vector<2x16xf32>
    %cst_77 = arith.constant 1.000000e+00 : f32
    %316 = vector.broadcast %cst_77 : f32 to vector<2x16xf32>
    %317 = arith.addf %316, %315 : vector<2x16xf32>
    %318 = arith.divf %316, %317 : vector<2x16xf32>
    %319 = vector.extract_strided_slice %309 {offsets = [0, 16], sizes = [2, 16], strides = [1, 1]} : vector<2x64xf32> to vector<2x16xf32>
    %320 = arith.negf %319 : vector<2x16xf32>
    %321 = math.exp %320 : vector<2x16xf32>
    %cst_78 = arith.constant 1.000000e+00 : f32
    %322 = vector.broadcast %cst_78 : f32 to vector<2x16xf32>
    %323 = arith.addf %322, %321 : vector<2x16xf32>
    %324 = arith.divf %322, %323 : vector<2x16xf32>
    %325 = vector.extract_strided_slice %309 {offsets = [0, 32], sizes = [2, 16], strides = [1, 1]} : vector<2x64xf32> to vector<2x16xf32>
    %326 = math.tanh %325 : vector<2x16xf32>
    %327 = vector.extract_strided_slice %309 {offsets = [0, 48], sizes = [2, 16], strides = [1, 1]} : vector<2x64xf32> to vector<2x16xf32>
    %328 = arith.negf %327 : vector<2x16xf32>
    %329 = math.exp %328 : vector<2x16xf32>
    %cst_79 = arith.constant 1.000000e+00 : f32
    %330 = vector.broadcast %cst_79 : f32 to vector<2x16xf32>
    %331 = arith.addf %330, %329 : vector<2x16xf32>
    %332 = arith.divf %330, %331 : vector<2x16xf32>
    %333 = arith.mulf %324, %277 : vector<2x16xf32>
    %334 = arith.mulf %318, %326 : vector<2x16xf32>
    %335 = arith.addf %333, %334 : vector<2x16xf32>
    %336 = math.tanh %335 : vector<2x16xf32>
    %337 = arith.mulf %332, %336 : vector<2x16xf32>
    %338 = vector.extract_strided_slice %312 {offsets = [0, 0], sizes = [2, 16], strides = [1, 1]} : vector<2x64xf32> to vector<2x16xf32>
    %339 = arith.negf %338 : vector<2x16xf32>
    %340 = math.exp %339 : vector<2x16xf32>
    %cst_80 = arith.constant 1.000000e+00 : f32
    %341 = vector.broadcast %cst_80 : f32 to vector<2x16xf32>
    %342 = arith.addf %341, %340 : vector<2x16xf32>
    %343 = arith.divf %341, %342 : vector<2x16xf32>
    %344 = vector.extract_strided_slice %312 {offsets = [0, 16], sizes = [2, 16], strides = [1, 1]} : vector<2x64xf32> to vector<2x16xf32>
    %345 = arith.negf %344 : vector<2x16xf32>
    %346 = math.exp %345 : vector<2x16xf32>
    %cst_81 = arith.constant 1.000000e+00 : f32
    %347 = vector.broadcast %cst_81 : f32 to vector<2x16xf32>
    %348 = arith.addf %347, %346 : vector<2x16xf32>
    %349 = arith.divf %347, %348 : vector<2x16xf32>
    %350 = vector.extract_strided_slice %312 {offsets = [0, 32], sizes = [2, 16], strides = [1, 1]} : vector<2x64xf32> to vector<2x16xf32>
    %351 = math.tanh %350 : vector<2x16xf32>
    %352 = vector.extract_strided_slice %312 {offsets = [0, 48], sizes = [2, 16], strides = [1, 1]} : vector<2x64xf32> to vector<2x16xf32>
    %353 = arith.negf %352 : vector<2x16xf32>
    %354 = math.exp %353 : vector<2x16xf32>
    %cst_82 = arith.constant 1.000000e+00 : f32
    %355 = vector.broadcast %cst_82 : f32 to vector<2x16xf32>
    %356 = arith.addf %355, %354 : vector<2x16xf32>
    %357 = arith.divf %355, %356 : vector<2x16xf32>
    %358 = arith.mulf %349, %302 : vector<2x16xf32>
    %359 = arith.mulf %343, %351 : vector<2x16xf32>
    %360 = arith.addf %358, %359 : vector<2x16xf32>
    %361 = math.tanh %360 : vector<2x16xf32>
    %362 = arith.mulf %357, %361 : vector<2x16xf32>
    %c10_83 = arith.constant 10 : index
    %c0_84 = arith.constant 0 : index
    %363 = vector.load %arg16[%c10_83, %c0_84] : memref<16x16xf32, #tpu.memory_space<vmem>>, vector<2x16xf32>
    tpu.vector_store %arg16[%c10_83, %c0_84], %337 {strides = array<i32>} : memref<16x16xf32, #tpu.memory_space<vmem>>, vector<2x16xf32>,
    %c4_85 = arith.constant 4 : index
    %c0_86 = arith.constant 0 : index
    %364 = vector.load %arg17[%c4_85, %c0_86] : memref<16x16xf32, #tpu.memory_space<vmem>>, vector<2x16xf32>
    tpu.vector_store %arg17[%c4_85, %c0_86], %362 {strides = array<i32>} : memref<16x16xf32, #tpu.memory_space<vmem>>, vector<2x16xf32>,
    %365 = vector.extract_strided_slice %5 {offsets = [12, 0], sizes = [2, 64], strides = [1, 1]} : vector<16x64xf32> to vector<2x64xf32>
    %cst_87 = arith.constant dense<0.000000e+00> : vector<2x64xf32>
    %366 = tpu.matmul %337, %11, %cst_87 {dimension_numbers = #tpu.dot_dimension_numbers<[1], [0], [0], [1], [0, 0, 1, 1], [], []>} : vector<2x16xf32>, vector<16x64xf32>, vector<2x64xf32> -> vector<2x64xf32>
    %367 = arith.addf %365, %366 : vector<2x64xf32>
    %368 = vector.extract_strided_slice %10 {offsets = [2, 0], sizes = [2, 64], strides = [1, 1]} : vector<16x64xf32> to vector<2x64xf32>
    %cst_88 = arith.constant dense<0.000000e+00> : vector<2x64xf32>
    %369 = tpu.matmul %362, %12, %cst_88 {dimension_numbers = #tpu.dot_dimension_numbers<[1], [0], [0], [1], [0, 0, 1, 1], [], []>} : vector<2x16xf32>, vector<16x64xf32>, vector<2x64xf32> -> vector<2x64xf32>
    %370 = arith.addf %368, %369 : vector<2x64xf32>
    %371 = vector.extract_strided_slice %367 {offsets = [0, 0], sizes = [2, 16], strides = [1, 1]} : vector<2x64xf32> to vector<2x16xf32>
    %372 = arith.negf %371 : vector<2x16xf32>
    %373 = math.exp %372 : vector<2x16xf32>
    %cst_89 = arith.constant 1.000000e+00 : f32
    %374 = vector.broadcast %cst_89 : f32 to vector<2x16xf32>
    %375 = arith.addf %374, %373 : vector<2x16xf32>
    %376 = arith.divf %374, %375 : vector<2x16xf32>
    %377 = vector.extract_strided_slice %367 {offsets = [0, 16], sizes = [2, 16], strides = [1, 1]} : vector<2x64xf32> to vector<2x16xf32>
    %378 = arith.negf %377 : vector<2x16xf32>
    %379 = math.exp %378 : vector<2x16xf32>
    %cst_90 = arith.constant 1.000000e+00 : f32
    %380 = vector.broadcast %cst_90 : f32 to vector<2x16xf32>
    %381 = arith.addf %380, %379 : vector<2x16xf32>
    %382 = arith.divf %380, %381 : vector<2x16xf32>
    %383 = vector.extract_strided_slice %367 {offsets = [0, 32], sizes = [2, 16], strides = [1, 1]} : vector<2x64xf32> to vector<2x16xf32>
    %384 = math.tanh %383 : vector<2x16xf32>
    %385 = vector.extract_strided_slice %367 {offsets = [0, 48], sizes = [2, 16], strides = [1, 1]} : vector<2x64xf32> to vector<2x16xf32>
    %386 = arith.negf %385 : vector<2x16xf32>
    %387 = math.exp %386 : vector<2x16xf32>
    %cst_91 = arith.constant 1.000000e+00 : f32
    %388 = vector.broadcast %cst_91 : f32 to vector<2x16xf32>
    %389 = arith.addf %388, %387 : vector<2x16xf32>
    %390 = arith.divf %388, %389 : vector<2x16xf32>
    %391 = arith.mulf %382, %335 : vector<2x16xf32>
    %392 = arith.mulf %376, %384 : vector<2x16xf32>
    %393 = arith.addf %391, %392 : vector<2x16xf32>
    %394 = math.tanh %393 : vector<2x16xf32>
    %395 = arith.mulf %390, %394 : vector<2x16xf32>
    %396 = vector.extract_strided_slice %370 {offsets = [0, 0], sizes = [2, 16], strides = [1, 1]} : vector<2x64xf32> to vector<2x16xf32>
    %397 = arith.negf %396 : vector<2x16xf32>
    %398 = math.exp %397 : vector<2x16xf32>
    %cst_92 = arith.constant 1.000000e+00 : f32
    %399 = vector.broadcast %cst_92 : f32 to vector<2x16xf32>
    %400 = arith.addf %399, %398 : vector<2x16xf32>
    %401 = arith.divf %399, %400 : vector<2x16xf32>
    %402 = vector.extract_strided_slice %370 {offsets = [0, 16], sizes = [2, 16], strides = [1, 1]} : vector<2x64xf32> to vector<2x16xf32>
    %403 = arith.negf %402 : vector<2x16xf32>
    %404 = math.exp %403 : vector<2x16xf32>
    %cst_93 = arith.constant 1.000000e+00 : f32
    %405 = vector.broadcast %cst_93 : f32 to vector<2x16xf32>
    %406 = arith.addf %405, %404 : vector<2x16xf32>
    %407 = arith.divf %405, %406 : vector<2x16xf32>
    %408 = vector.extract_strided_slice %370 {offsets = [0, 32], sizes = [2, 16], strides = [1, 1]} : vector<2x64xf32> to vector<2x16xf32>
    %409 = math.tanh %408 : vector<2x16xf32>
    %410 = vector.extract_strided_slice %370 {offsets = [0, 48], sizes = [2, 16], strides = [1, 1]} : vector<2x64xf32> to vector<2x16xf32>
    %411 = arith.negf %410 : vector<2x16xf32>
    %412 = math.exp %411 : vector<2x16xf32>
    %cst_94 = arith.constant 1.000000e+00 : f32
    %413 = vector.broadcast %cst_94 : f32 to vector<2x16xf32>
    %414 = arith.addf %413, %412 : vector<2x16xf32>
    %415 = arith.divf %413, %414 : vector<2x16xf32>
    %416 = arith.mulf %407, %360 : vector<2x16xf32>
    %417 = arith.mulf %401, %409 : vector<2x16xf32>
    %418 = arith.addf %416, %417 : vector<2x16xf32>
    %419 = math.tanh %418 : vector<2x16xf32>
    %420 = arith.mulf %415, %419 : vector<2x16xf32>
    %c12_95 = arith.constant 12 : index
    %c0_96 = arith.constant 0 : index
    %421 = vector.load %arg16[%c12_95, %c0_96] : memref<16x16xf32, #tpu.memory_space<vmem>>, vector<2x16xf32>
    tpu.vector_store %arg16[%c12_95, %c0_96], %395 {strides = array<i32>} : memref<16x16xf32, #tpu.memory_space<vmem>>, vector<2x16xf32>,
    %c2_97 = arith.constant 2 : index
    %c0_98 = arith.constant 0 : index
    %422 = vector.load %arg17[%c2_97, %c0_98] : memref<16x16xf32, #tpu.memory_space<vmem>>, vector<2x16xf32>
    tpu.vector_store %arg17[%c2_97, %c0_98], %420 {strides = array<i32>} : memref<16x16xf32, #tpu.memory_space<vmem>>, vector<2x16xf32>,
    %423 = vector.extract_strided_slice %5 {offsets = [14, 0], sizes = [2, 64], strides = [1, 1]} : vector<16x64xf32> to vector<2x64xf32>
    %cst_99 = arith.constant dense<0.000000e+00> : vector<2x64xf32>
    %424 = tpu.matmul %395, %11, %cst_99 {dimension_numbers = #tpu.dot_dimension_numbers<[1], [0], [0], [1], [0, 0, 1, 1], [], []>} : vector<2x16xf32>, vector<16x64xf32>, vector<2x64xf32> -> vector<2x64xf32>
    %425 = arith.addf %423, %424 : vector<2x64xf32>
    %426 = vector.extract_strided_slice %10 {offsets = [0, 0], sizes = [2, 64], strides = [1, 1]} : vector<16x64xf32> to vector<2x64xf32>
    %cst_100 = arith.constant dense<0.000000e+00> : vector<2x64xf32>
    %427 = tpu.matmul %420, %12, %cst_100 {dimension_numbers = #tpu.dot_dimension_numbers<[1], [0], [0], [1], [0, 0, 1, 1], [], []>} : vector<2x16xf32>, vector<16x64xf32>, vector<2x64xf32> -> vector<2x64xf32>
    %428 = arith.addf %426, %427 : vector<2x64xf32>
    %429 = vector.extract_strided_slice %425 {offsets = [0, 0], sizes = [2, 16], strides = [1, 1]} : vector<2x64xf32> to vector<2x16xf32>
    %430 = arith.negf %429 : vector<2x16xf32>
    %431 = math.exp %430 : vector<2x16xf32>
    %cst_101 = arith.constant 1.000000e+00 : f32
    %432 = vector.broadcast %cst_101 : f32 to vector<2x16xf32>
    %433 = arith.addf %432, %431 : vector<2x16xf32>
    %434 = arith.divf %432, %433 : vector<2x16xf32>
    %435 = vector.extract_strided_slice %425 {offsets = [0, 16], sizes = [2, 16], strides = [1, 1]} : vector<2x64xf32> to vector<2x16xf32>
    %436 = arith.negf %435 : vector<2x16xf32>
    %437 = math.exp %436 : vector<2x16xf32>
    %cst_102 = arith.constant 1.000000e+00 : f32
    %438 = vector.broadcast %cst_102 : f32 to vector<2x16xf32>
    %439 = arith.addf %438, %437 : vector<2x16xf32>
    %440 = arith.divf %438, %439 : vector<2x16xf32>
    %441 = vector.extract_strided_slice %425 {offsets = [0, 32], sizes = [2, 16], strides = [1, 1]} : vector<2x64xf32> to vector<2x16xf32>
    %442 = math.tanh %441 : vector<2x16xf32>
    %443 = vector.extract_strided_slice %425 {offsets = [0, 48], sizes = [2, 16], strides = [1, 1]} : vector<2x64xf32> to vector<2x16xf32>
    %444 = arith.negf %443 : vector<2x16xf32>
    %445 = math.exp %444 : vector<2x16xf32>
    %cst_103 = arith.constant 1.000000e+00 : f32
    %446 = vector.broadcast %cst_103 : f32 to vector<2x16xf32>
    %447 = arith.addf %446, %445 : vector<2x16xf32>
    %448 = arith.divf %446, %447 : vector<2x16xf32>
    %449 = arith.mulf %440, %393 : vector<2x16xf32>
    %450 = arith.mulf %434, %442 : vector<2x16xf32>
    %451 = arith.addf %449, %450 : vector<2x16xf32>
    %452 = math.tanh %451 : vector<2x16xf32>
    %453 = arith.mulf %448, %452 : vector<2x16xf32>
    %454 = vector.extract_strided_slice %428 {offsets = [0, 0], sizes = [2, 16], strides = [1, 1]} : vector<2x64xf32> to vector<2x16xf32>
    %455 = arith.negf %454 : vector<2x16xf32>
    %456 = math.exp %455 : vector<2x16xf32>
    %cst_104 = arith.constant 1.000000e+00 : f32
    %457 = vector.broadcast %cst_104 : f32 to vector<2x16xf32>
    %458 = arith.addf %457, %456 : vector<2x16xf32>
    %459 = arith.divf %457, %458 : vector<2x16xf32>
    %460 = vector.extract_strided_slice %428 {offsets = [0, 16], sizes = [2, 16], strides = [1, 1]} : vector<2x64xf32> to vector<2x16xf32>
    %461 = arith.negf %460 : vector<2x16xf32>
    %462 = math.exp %461 : vector<2x16xf32>
    %cst_105 = arith.constant 1.000000e+00 : f32
    %463 = vector.broadcast %cst_105 : f32 to vector<2x16xf32>
    %464 = arith.addf %463, %462 : vector<2x16xf32>
    %465 = arith.divf %463, %464 : vector<2x16xf32>
    %466 = vector.extract_strided_slice %428 {offsets = [0, 32], sizes = [2, 16], strides = [1, 1]} : vector<2x64xf32> to vector<2x16xf32>
    %467 = math.tanh %466 : vector<2x16xf32>
    %468 = vector.extract_strided_slice %428 {offsets = [0, 48], sizes = [2, 16], strides = [1, 1]} : vector<2x64xf32> to vector<2x16xf32>
    %469 = arith.negf %468 : vector<2x16xf32>
    %470 = math.exp %469 : vector<2x16xf32>
    %cst_106 = arith.constant 1.000000e+00 : f32
    %471 = vector.broadcast %cst_106 : f32 to vector<2x16xf32>
    %472 = arith.addf %471, %470 : vector<2x16xf32>
    %473 = arith.divf %471, %472 : vector<2x16xf32>
    %474 = arith.mulf %465, %418 : vector<2x16xf32>
    %475 = arith.mulf %459, %467 : vector<2x16xf32>
    %476 = arith.addf %474, %475 : vector<2x16xf32>
    %477 = math.tanh %476 : vector<2x16xf32>
    %478 = arith.mulf %473, %477 : vector<2x16xf32>
    %c14_107 = arith.constant 14 : index
    %c0_108 = arith.constant 0 : index
    %479 = vector.load %arg16[%c14_107, %c0_108] : memref<16x16xf32, #tpu.memory_space<vmem>>, vector<2x16xf32>
    tpu.vector_store %arg16[%c14_107, %c0_108], %453 {strides = array<i32>} : memref<16x16xf32, #tpu.memory_space<vmem>>, vector<2x16xf32>,
    %c0_109 = arith.constant 0 : index
    %c0_110 = arith.constant 0 : index
    %480 = vector.load %arg17[%c0_109, %c0_110] : memref<16x16xf32, #tpu.memory_space<vmem>>, vector<2x16xf32>
    tpu.vector_store %arg17[%c0_109, %c0_110], %478 {strides = array<i32>} : memref<16x16xf32, #tpu.memory_space<vmem>>, vector<2x16xf32>,
    %c0_111 = arith.constant 0 : index
    %c0_112 = arith.constant 0 : index
    %481 = vector.load %arg11[%c0_111, %c0_112] : memref<32x5xf32, #tpu.memory_space<vmem>>, vector<16x5xf32>
    %c16 = arith.constant 16 : index
    %c0_113 = arith.constant 0 : index
    %482 = vector.load %arg11[%c16, %c0_113] : memref<32x5xf32, #tpu.memory_space<vmem>>, vector<16x5xf32>
    %c0_114 = arith.constant 0 : index
    %c0_115 = arith.constant 0 : index
    %483 = vector.load %arg16[%c0_114, %c0_115] : memref<16x16xf32, #tpu.memory_space<vmem>>, vector<16x16xf32>
    %cst_116 = arith.constant dense<0.000000e+00> : vector<16x5xf32>
    %484 = tpu.matmul %483, %481, %cst_116 {dimension_numbers = #tpu.dot_dimension_numbers<[1], [0], [0], [1], [0, 0, 1, 1], [], []>} : vector<16x16xf32>, vector<16x5xf32>, vector<16x5xf32> -> vector<16x5xf32>
    %c0_117 = arith.constant 0 : index
    %c0_118 = arith.constant 0 : index
    %485 = vector.load %arg17[%c0_117, %c0_118] : memref<16x16xf32, #tpu.memory_space<vmem>>, vector<16x16xf32>
    %cst_119 = arith.constant dense<0.000000e+00> : vector<16x5xf32>
    %486 = tpu.matmul %485, %482, %cst_119 {dimension_numbers = #tpu.dot_dimension_numbers<[1], [0], [0], [1], [0, 0, 1, 1], [], []>} : vector<16x16xf32>, vector<16x5xf32>, vector<16x5xf32> -> vector<16x5xf32>
    %487 = arith.addf %484, %486 : vector<16x5xf32>
    %c0_120 = arith.constant 0 : index
    %c0_121 = arith.constant 0 : index
    %488 = vector.load %arg12[%c0_120, %c0_121] : memref<1x5xf32, #tpu.memory_space<vmem>>, vector<1x5xf32>
    %489 = vector.broadcast %488 : vector<1x5xf32> to vector<16x5xf32>
    %490 = arith.addf %487, %489 : vector<16x5xf32>
    %c0_122 = arith.constant 0 : index
    %c0_123 = arith.constant 0 : index
    %491 = vector.load %arg13[%c0_122, %c0_123] : memref<5x5xf32, #tpu.memory_space<vmem>>, vector<5x5xf32>
    %492 = vector.shape_cast %491 : vector<5x5xf32> to vector<1x5x5xf32>
    %493 = tpu.iota {dimensions = array<i32: 2>} : vector<2x5x5xi32>
    %494 = tpu.iota {dimensions = array<i32: 1>} : vector<2x5xi32>
    %c3_i32 = arith.constant 3 : i32
    %495 = vector.broadcast %c3_i32 : i32 to vector<2x5xi32>
    %496 = arith.cmpi eq, %494, %495 : vector<2x5xi32>
    %cst_124 = arith.constant -1.000000e+04 : f32
    %497 = vector.broadcast %cst_124 : f32 to vector<2x5xf32>
    %cst_125 = arith.constant 0.000000e+00 : f32
    %498 = vector.broadcast %cst_125 : f32 to vector<2x5xf32>
    %499 = arith.select %496, %498, %497 : vector<2x5xi1>, vector<2x5xf32>
    %500 = vector.extract_strided_slice %490 {offsets = [0, 0], sizes = [2, 5], strides = [1, 1]} : vector<16x5xf32> to vector<2x5xf32>
    %501 = vector.shape_cast %499 : vector<2x5xf32> to vector<2x1x5xf32>
    %502 = vector.broadcast %501 : vector<2x1x5xf32> to vector<2x5x5xf32>
    %503 = vector.broadcast %492 : vector<1x5x5xf32> to vector<2x5x5xf32>
    %504 = arith.addf %502, %503 : vector<2x5x5xf32>
    %cst_126 = arith.constant dense<0xFF800000> : vector<2x5xf32>
    %505 = vector.multi_reduction <maximumf>, %504, %cst_126 [2] : vector<2x5x5xf32> to vector<2x5xf32>
    %506 = vector.shape_cast %505 : vector<2x5xf32> to vector<2x5x1xf32>
    %507 = vector.broadcast %506 : vector<2x5x1xf32> to vector<2x5x5xf32>
    %508 = arith.cmpf oeq, %504, %507 : vector<2x5x5xf32>
    %c5_i32 = arith.constant 5 : i32
    %509 = vector.broadcast %c5_i32 : i32 to vector<2x5x5xi32>
    %510 = arith.select %508, %493, %509 : vector<2x5x5xi1>, vector<2x5x5xi32>
    %cst_127 = arith.constant dense<2147483647> : vector<2x5xi32>
    %511 = vector.multi_reduction <minsi>, %510, %cst_127 [2] : vector<2x5x5xi32> to vector<2x5xi32>
    %c0_128 = arith.constant 0 : index
    %c0_129 = arith.constant 0 : index
    %c0_130 = arith.constant 0 : index
    %512 = vector.load %arg14[%c0_128, %c0_129, %c0_130] : memref<8x2x5xi32, #tpu.memory_space<vmem>>, vector<1x2x5xi32>
    %513 = vector.shape_cast %512 : vector<1x2x5xi32> to vector<2x5xi32>
    %514 = vector.shape_cast %511 : vector<2x5xi32> to vector<1x2x5xi32>
    tpu.vector_store %arg14[%c0_128, %c0_129, %c0_130], %514 {strides = array<i32>} : memref<8x2x5xi32, #tpu.memory_space<vmem>>, vector<1x2x5xi32>,
    %515 = arith.addf %505, %500 : vector<2x5xf32>
    %516 = vector.extract_strided_slice %490 {offsets = [2, 0], sizes = [2, 5], strides = [1, 1]} : vector<16x5xf32> to vector<2x5xf32>
    %517 = vector.shape_cast %515 : vector<2x5xf32> to vector<2x1x5xf32>
    %518 = vector.broadcast %517 : vector<2x1x5xf32> to vector<2x5x5xf32>
    %519 = vector.broadcast %492 : vector<1x5x5xf32> to vector<2x5x5xf32>
    %520 = arith.addf %518, %519 : vector<2x5x5xf32>
    %cst_131 = arith.constant dense<0xFF800000> : vector<2x5xf32>
    %521 = vector.multi_reduction <maximumf>, %520, %cst_131 [2] : vector<2x5x5xf32> to vector<2x5xf32>
    %522 = vector.shape_cast %521 : vector<2x5xf32> to vector<2x5x1xf32>
    %523 = vector.broadcast %522 : vector<2x5x1xf32> to vector<2x5x5xf32>
    %524 = arith.cmpf oeq, %520, %523 : vector<2x5x5xf32>
    %c5_i32_132 = arith.constant 5 : i32
    %525 = vector.broadcast %c5_i32_132 : i32 to vector<2x5x5xi32>
    %526 = arith.select %524, %493, %525 : vector<2x5x5xi1>, vector<2x5x5xi32>
    %cst_133 = arith.constant dense<2147483647> : vector<2x5xi32>
    %527 = vector.multi_reduction <minsi>, %526, %cst_133 [2] : vector<2x5x5xi32> to vector<2x5xi32>
    %c1 = arith.constant 1 : index
    %c0_134 = arith.constant 0 : index
    %c0_135 = arith.constant 0 : index
    %528 = vector.load %arg14[%c1, %c0_134, %c0_135] : memref<8x2x5xi32, #tpu.memory_space<vmem>>, vector<1x2x5xi32>
    %529 = vector.shape_cast %528 : vector<1x2x5xi32> to vector<2x5xi32>
    %530 = vector.shape_cast %527 : vector<2x5xi32> to vector<1x2x5xi32>
    tpu.vector_store %arg14[%c1, %c0_134, %c0_135], %530 {strides = array<i32>} : memref<8x2x5xi32, #tpu.memory_space<vmem>>, vector<1x2x5xi32>,
    %531 = arith.addf %521, %516 : vector<2x5xf32>
    %532 = vector.extract_strided_slice %490 {offsets = [4, 0], sizes = [2, 5], strides = [1, 1]} : vector<16x5xf32> to vector<2x5xf32>
    %533 = vector.shape_cast %531 : vector<2x5xf32> to vector<2x1x5xf32>
    %534 = vector.broadcast %533 : vector<2x1x5xf32> to vector<2x5x5xf32>
    %535 = vector.broadcast %492 : vector<1x5x5xf32> to vector<2x5x5xf32>
    %536 = arith.addf %534, %535 : vector<2x5x5xf32>
    %cst_136 = arith.constant dense<0xFF800000> : vector<2x5xf32>
    %537 = vector.multi_reduction <maximumf>, %536, %cst_136 [2] : vector<2x5x5xf32> to vector<2x5xf32>
    %538 = vector.shape_cast %537 : vector<2x5xf32> to vector<2x5x1xf32>
    %539 = vector.broadcast %538 : vector<2x5x1xf32> to vector<2x5x5xf32>
    %540 = arith.cmpf oeq, %536, %539 : vector<2x5x5xf32>
    %c5_i32_137 = arith.constant 5 : i32
    %541 = vector.broadcast %c5_i32_137 : i32 to vector<2x5x5xi32>
    %542 = arith.select %540, %493, %541 : vector<2x5x5xi1>, vector<2x5x5xi32>
    %cst_138 = arith.constant dense<2147483647> : vector<2x5xi32>
    %543 = vector.multi_reduction <minsi>, %542, %cst_138 [2] : vector<2x5x5xi32> to vector<2x5xi32>
    %c2_139 = arith.constant 2 : index
    %c0_140 = arith.constant 0 : index
    %c0_141 = arith.constant 0 : index
    %544 = vector.load %arg14[%c2_139, %c0_140, %c0_141] : memref<8x2x5xi32, #tpu.memory_space<vmem>>, vector<1x2x5xi32>
    %545 = vector.shape_cast %544 : vector<1x2x5xi32> to vector<2x5xi32>
    %546 = vector.shape_cast %543 : vector<2x5xi32> to vector<1x2x5xi32>
    tpu.vector_store %arg14[%c2_139, %c0_140, %c0_141], %546 {strides = array<i32>} : memref<8x2x5xi32, #tpu.memory_space<vmem>>, vector<1x2x5xi32>,
    %547 = arith.addf %537, %532 : vector<2x5xf32>
    %548 = vector.extract_strided_slice %490 {offsets = [6, 0], sizes = [2, 5], strides = [1, 1]} : vector<16x5xf32> to vector<2x5xf32>
    %549 = vector.shape_cast %547 : vector<2x5xf32> to vector<2x1x5xf32>
    %550 = vector.broadcast %549 : vector<2x1x5xf32> to vector<2x5x5xf32>
    %551 = vector.broadcast %492 : vector<1x5x5xf32> to vector<2x5x5xf32>
    %552 = arith.addf %550, %551 : vector<2x5x5xf32>
    %cst_142 = arith.constant dense<0xFF800000> : vector<2x5xf32>
    %553 = vector.multi_reduction <maximumf>, %552, %cst_142 [2] : vector<2x5x5xf32> to vector<2x5xf32>
    %554 = vector.shape_cast %553 : vector<2x5xf32> to vector<2x5x1xf32>
    %555 = vector.broadcast %554 : vector<2x5x1xf32> to vector<2x5x5xf32>
    %556 = arith.cmpf oeq, %552, %555 : vector<2x5x5xf32>
    %c5_i32_143 = arith.constant 5 : i32
    %557 = vector.broadcast %c5_i32_143 : i32 to vector<2x5x5xi32>
    %558 = arith.select %556, %493, %557 : vector<2x5x5xi1>, vector<2x5x5xi32>
    %cst_144 = arith.constant dense<2147483647> : vector<2x5xi32>
    %559 = vector.multi_reduction <minsi>, %558, %cst_144 [2] : vector<2x5x5xi32> to vector<2x5xi32>
    %c3 = arith.constant 3 : index
    %c0_145 = arith.constant 0 : index
    %c0_146 = arith.constant 0 : index
    %560 = vector.load %arg14[%c3, %c0_145, %c0_146] : memref<8x2x5xi32, #tpu.memory_space<vmem>>, vector<1x2x5xi32>
    %561 = vector.shape_cast %560 : vector<1x2x5xi32> to vector<2x5xi32>
    %562 = vector.shape_cast %559 : vector<2x5xi32> to vector<1x2x5xi32>
    tpu.vector_store %arg14[%c3, %c0_145, %c0_146], %562 {strides = array<i32>} : memref<8x2x5xi32, #tpu.memory_space<vmem>>, vector<1x2x5xi32>,
    %563 = arith.addf %553, %548 : vector<2x5xf32>
    %564 = vector.extract_strided_slice %490 {offsets = [8, 0], sizes = [2, 5], strides = [1, 1]} : vector<16x5xf32> to vector<2x5xf32>
    %565 = vector.shape_cast %563 : vector<2x5xf32> to vector<2x1x5xf32>
    %566 = vector.broadcast %565 : vector<2x1x5xf32> to vector<2x5x5xf32>
    %567 = vector.broadcast %492 : vector<1x5x5xf32> to vector<2x5x5xf32>
    %568 = arith.addf %566, %567 : vector<2x5x5xf32>
    %cst_147 = arith.constant dense<0xFF800000> : vector<2x5xf32>
    %569 = vector.multi_reduction <maximumf>, %568, %cst_147 [2] : vector<2x5x5xf32> to vector<2x5xf32>
    %570 = vector.shape_cast %569 : vector<2x5xf32> to vector<2x5x1xf32>
    %571 = vector.broadcast %570 : vector<2x5x1xf32> to vector<2x5x5xf32>
    %572 = arith.cmpf oeq, %568, %571 : vector<2x5x5xf32>
    %c5_i32_148 = arith.constant 5 : i32
    %573 = vector.broadcast %c5_i32_148 : i32 to vector<2x5x5xi32>
    %574 = arith.select %572, %493, %573 : vector<2x5x5xi1>, vector<2x5x5xi32>
    %cst_149 = arith.constant dense<2147483647> : vector<2x5xi32>
    %575 = vector.multi_reduction <minsi>, %574, %cst_149 [2] : vector<2x5x5xi32> to vector<2x5xi32>
    %c4_150 = arith.constant 4 : index
    %c0_151 = arith.constant 0 : index
    %c0_152 = arith.constant 0 : index
    %576 = vector.load %arg14[%c4_150, %c0_151, %c0_152] : memref<8x2x5xi32, #tpu.memory_space<vmem>>, vector<1x2x5xi32>
    %577 = vector.shape_cast %576 : vector<1x2x5xi32> to vector<2x5xi32>
    %578 = vector.shape_cast %575 : vector<2x5xi32> to vector<1x2x5xi32>
    tpu.vector_store %arg14[%c4_150, %c0_151, %c0_152], %578 {strides = array<i32>} : memref<8x2x5xi32, #tpu.memory_space<vmem>>, vector<1x2x5xi32>,
    %579 = arith.addf %569, %564 : vector<2x5xf32>
    %580 = vector.extract_strided_slice %490 {offsets = [10, 0], sizes = [2, 5], strides = [1, 1]} : vector<16x5xf32> to vector<2x5xf32>
    %581 = vector.shape_cast %579 : vector<2x5xf32> to vector<2x1x5xf32>
    %582 = vector.broadcast %581 : vector<2x1x5xf32> to vector<2x5x5xf32>
    %583 = vector.broadcast %492 : vector<1x5x5xf32> to vector<2x5x5xf32>
    %584 = arith.addf %582, %583 : vector<2x5x5xf32>
    %cst_153 = arith.constant dense<0xFF800000> : vector<2x5xf32>
    %585 = vector.multi_reduction <maximumf>, %584, %cst_153 [2] : vector<2x5x5xf32> to vector<2x5xf32>
    %586 = vector.shape_cast %585 : vector<2x5xf32> to vector<2x5x1xf32>
    %587 = vector.broadcast %586 : vector<2x5x1xf32> to vector<2x5x5xf32>
    %588 = arith.cmpf oeq, %584, %587 : vector<2x5x5xf32>
    %c5_i32_154 = arith.constant 5 : i32
    %589 = vector.broadcast %c5_i32_154 : i32 to vector<2x5x5xi32>
    %590 = arith.select %588, %493, %589 : vector<2x5x5xi1>, vector<2x5x5xi32>
    %cst_155 = arith.constant dense<2147483647> : vector<2x5xi32>
    %591 = vector.multi_reduction <minsi>, %590, %cst_155 [2] : vector<2x5x5xi32> to vector<2x5xi32>
    %c5 = arith.constant 5 : index
    %c0_156 = arith.constant 0 : index
    %c0_157 = arith.constant 0 : index
    %592 = vector.load %arg14[%c5, %c0_156, %c0_157] : memref<8x2x5xi32, #tpu.memory_space<vmem>>, vector<1x2x5xi32>
    %593 = vector.shape_cast %592 : vector<1x2x5xi32> to vector<2x5xi32>
    %594 = vector.shape_cast %591 : vector<2x5xi32> to vector<1x2x5xi32>
    tpu.vector_store %arg14[%c5, %c0_156, %c0_157], %594 {strides = array<i32>} : memref<8x2x5xi32, #tpu.memory_space<vmem>>, vector<1x2x5xi32>,
    %595 = arith.addf %585, %580 : vector<2x5xf32>
    %596 = vector.extract_strided_slice %490 {offsets = [12, 0], sizes = [2, 5], strides = [1, 1]} : vector<16x5xf32> to vector<2x5xf32>
    %597 = vector.shape_cast %595 : vector<2x5xf32> to vector<2x1x5xf32>
    %598 = vector.broadcast %597 : vector<2x1x5xf32> to vector<2x5x5xf32>
    %599 = vector.broadcast %492 : vector<1x5x5xf32> to vector<2x5x5xf32>
    %600 = arith.addf %598, %599 : vector<2x5x5xf32>
    %cst_158 = arith.constant dense<0xFF800000> : vector<2x5xf32>
    %601 = vector.multi_reduction <maximumf>, %600, %cst_158 [2] : vector<2x5x5xf32> to vector<2x5xf32>
    %602 = vector.shape_cast %601 : vector<2x5xf32> to vector<2x5x1xf32>
    %603 = vector.broadcast %602 : vector<2x5x1xf32> to vector<2x5x5xf32>
    %604 = arith.cmpf oeq, %600, %603 : vector<2x5x5xf32>
    %c5_i32_159 = arith.constant 5 : i32
    %605 = vector.broadcast %c5_i32_159 : i32 to vector<2x5x5xi32>
    %606 = arith.select %604, %493, %605 : vector<2x5x5xi1>, vector<2x5x5xi32>
    %cst_160 = arith.constant dense<2147483647> : vector<2x5xi32>
    %607 = vector.multi_reduction <minsi>, %606, %cst_160 [2] : vector<2x5x5xi32> to vector<2x5xi32>
    %c6_161 = arith.constant 6 : index
    %c0_162 = arith.constant 0 : index
    %c0_163 = arith.constant 0 : index
    %608 = vector.load %arg14[%c6_161, %c0_162, %c0_163] : memref<8x2x5xi32, #tpu.memory_space<vmem>>, vector<1x2x5xi32>
    %609 = vector.shape_cast %608 : vector<1x2x5xi32> to vector<2x5xi32>
    %610 = vector.shape_cast %607 : vector<2x5xi32> to vector<1x2x5xi32>
    tpu.vector_store %arg14[%c6_161, %c0_162, %c0_163], %610 {strides = array<i32>} : memref<8x2x5xi32, #tpu.memory_space<vmem>>, vector<1x2x5xi32>,
    %611 = arith.addf %601, %596 : vector<2x5xf32>
    %612 = vector.extract_strided_slice %490 {offsets = [14, 0], sizes = [2, 5], strides = [1, 1]} : vector<16x5xf32> to vector<2x5xf32>
    %613 = vector.shape_cast %611 : vector<2x5xf32> to vector<2x1x5xf32>
    %614 = vector.broadcast %613 : vector<2x1x5xf32> to vector<2x5x5xf32>
    %615 = vector.broadcast %492 : vector<1x5x5xf32> to vector<2x5x5xf32>
    %616 = arith.addf %614, %615 : vector<2x5x5xf32>
    %cst_164 = arith.constant dense<0xFF800000> : vector<2x5xf32>
    %617 = vector.multi_reduction <maximumf>, %616, %cst_164 [2] : vector<2x5x5xf32> to vector<2x5xf32>
    %618 = vector.shape_cast %617 : vector<2x5xf32> to vector<2x5x1xf32>
    %619 = vector.broadcast %618 : vector<2x5x1xf32> to vector<2x5x5xf32>
    %620 = arith.cmpf oeq, %616, %619 : vector<2x5x5xf32>
    %c5_i32_165 = arith.constant 5 : i32
    %621 = vector.broadcast %c5_i32_165 : i32 to vector<2x5x5xi32>
    %622 = arith.select %620, %493, %621 : vector<2x5x5xi1>, vector<2x5x5xi32>
    %cst_166 = arith.constant dense<2147483647> : vector<2x5xi32>
    %623 = vector.multi_reduction <minsi>, %622, %cst_166 [2] : vector<2x5x5xi32> to vector<2x5xi32>
    %c7 = arith.constant 7 : index
    %c0_167 = arith.constant 0 : index
    %c0_168 = arith.constant 0 : index
    %624 = vector.load %arg14[%c7, %c0_167, %c0_168] : memref<8x2x5xi32, #tpu.memory_space<vmem>>, vector<1x2x5xi32>
    %625 = vector.shape_cast %624 : vector<1x2x5xi32> to vector<2x5xi32>
    %626 = vector.shape_cast %623 : vector<2x5xi32> to vector<1x2x5xi32>
    tpu.vector_store %arg14[%c7, %c0_167, %c0_168], %626 {strides = array<i32>} : memref<8x2x5xi32, #tpu.memory_space<vmem>>, vector<1x2x5xi32>,
    %627 = arith.addf %617, %612 : vector<2x5xf32>
    %628 = vector.extract_strided_slice %491 {offsets = [4, 0], sizes = [1, 5], strides = [1, 1]} : vector<5x5xf32> to vector<1x5xf32>
    %629 = vector.broadcast %628 : vector<1x5xf32> to vector<2x5xf32>
    %630 = arith.addf %627, %629 : vector<2x5xf32>
    %c0_169 = arith.constant 0 : index
    %c0_170 = arith.constant 0 : index
    %631 = vector.load %arg15[%c0_169, %c0_170] : memref<2x5xf32, #tpu.memory_space<vmem>>, vector<2x5xf32>
    tpu.vector_store %arg15[%c0_169, %c0_170], %630 {strides = array<i32>} : memref<2x5xf32, #tpu.memory_space<vmem>>, vector<2x5xf32>,
    return
  }
}

</mosaic_0001>

<bundles_post_ra>
// kernel: bilstm_crf_forward.1
= control target key start
LH: loop header
LB: loop body
LE: loop exit
PB: predicated region body
PF: predicated region fallthrough
CT: control target
= control target key end

     0   :  { %vm60_vm0 = vcmask 130048   ;;  %v4967_v8 = vmov 0.0   ;;  %vm4968_vm1 = vmmov 0   ;;  %s4969_s23 = smov 16   ;;  %s4972_s27 = smov 80   ;;  %vm446_vm2 = vcmask 123904   ;;  %s6721_s8 = inlined_call_operand.vmem [shape: f32[16,64], index: 8, kind: input, shape index: {}]   ;;  %s6722_s0 = inlined_call_operand.vmem [shape: f32[16,16], index: 0, kind: input, shape index: {}]   ;;  %s6723_s5 = inlined_call_operand.vmem [shape: f32[16,64], index: 5, kind: input, shape index: {}]   ;;  %s6724_s9 = inlined_call_operand.vmem [shape: f32[16,64], index: 9, kind: input, shape index: {}]   ;;  %s6725_s4 = inlined_call_operand.vmem [shape: f32[2,16], index: 4, kind: input, shape index: {}]   ;;  %s6726_s3 = inlined_call_operand.vmem [shape: f32[2,16], index: 3, kind: input, shape index: {}]   ;;  %s6727_s6 = inlined_call_operand.vmem [shape: f32[16,64], index: 6, kind: input, shape index: {}]   ;;  %s6728_s1 = inlined_call_operand.vmem [shape: f32[2,16], index: 1, kind: input, shape index: {}]   ;;  %s6729_s2 = inlined_call_operand.vmem [shape: f32[2,16], index: 2, kind: input, shape index: {}]   ;;  %s6730_s10 = inlined_call_operand.vmem [shape: f32[1,64], index: 10, kind: input, shape index: {}]   ;;  %s6731_s7 = inlined_call_operand.vmem [shape: f32[1,64], index: 7, kind: input, shape index: {}]   ;;  %s6732_s11 = inlined_call_operand.vmem [shape: f32[32,5], index: 11, kind: input, shape index: {}]   ;;  %s6733_s13 = inlined_call_operand.vmem [shape: f32[5,5], index: 13, kind: input, shape index: {}]   ;;  %s6734_s12 = inlined_call_operand.vmem [shape: f32[1,5], index: 12, kind: input, shape index: {}]   ;;  %s6735_s14 = inlined_call_operand.vmem [shape: s32[8,2,5], index: 14, kind: output, shape index: {0}]   ;;  %s6736_s15 = inlined_call_operand.vmem [shape: f32[2,5], index: 15, kind: output, shape index: {1}]  }
   0x1   :  { %v143_v0 = vld [vmem:[%s6721_s8 + $0x8] sm:$0xff]  ;;  %v142_v1 = vld [vmem:[%s6721_s8] sm:$0xff]  ;;  %vm667_vm3 = vcmask 125954   ;;  %vm452_vm4 = vcmask 130054   ;;  %vm673_vm5 = vcmask 128004   ;;  %vm2211_vm7 = vcmask 36864  }
   0x2   :  { %v49_v2 = vld [vmem:[%s6722_s0] sm:$0xff]  ;;  %4695 = vmatprep.subr.mxu1 %v143_v0  ;;  %v52_v3 = vld [vmem:[%s6723_s5 + $0x8] sm:$0xff]  ;;  %vm2260_vm8 = vcmask 1041409   ;;  %vm2415_vm9 = vcmask 1042434   ;;  %vm2417_vm10 = vcmask 1043459   ;;  %vm2419_vm11 = vcmask 1044484  }
   0x3   :  { %4699 = vmatprep.mubr.msk.f32.mxu1 %vm60_vm0, %v49_v2  ;;  %4696 = vmatpush3.msra.mxu1 %v143_v0  ;;  %v50_v4 = vld [vmem:[%s6722_s0 + $0x8] sm:$0xff]  ;;  %v51_v5 = vld [vmem:[%s6723_s5] sm:$0xff] }
   0x4   :  { %4688 = vmatprep.subr.mxu0 %v52_v3  ;;  %4697 = vmatprep.subr.mxu1 %v142_v1  ;;  %v5078_v6 = vld [vmem:[%s6724_s9 + $0x8] sm:$0xff]  ;;  %v233_v7 = vld [vmem:[%s6725_s4] sm:$0x3] }
   0x5   :  { %4689 = vmatpush3.msra.mxu0 %v52_v3  ;;  %4698 = vmatpush3.msra.mxu1 %v142_v1  ;;  %v5088_v9 = vld [vmem:[%s6724_s9] sm:$0xff]  ;;  %v421_v11 = vrot.slane %v233_v7, 2  ;;  %v5102_v12 = vld [vmem:[%s6727_s6 + $0x8] sm:$0xff] }
   0x6   :  { %4690 = vmatprep.subr.mxu0 %v51_v5  ;;  %4700 = vmatmul.mubr.msk.f32.vlgmr.msra.gmra.mxu1 %vm60_vm0, %v50_v4  ;;  %v232_v10 = vld [vmem:[%s6726_s3] sm:$0x3] }
   0x7   :  { %4709 = vmatprep.subr.mxu1 %v4967_v8  ;;  %4713 = vmatprep.mubr.msk.f32.mxu1 %vm4968_vm1, %v4967_v8  ;;  %v5110_v13 = vld [vmem:[%s6727_s6] sm:$0xff] }
   0x8   :  { %4710 = vmatpush3.msra.mxu1 %v5078_v6  ;;  %4691 = vmatpush3.msra.mxu0 %v51_v5  ;;  %v230_v14 = vld [vmem:[%s6728_s1] sm:$0x3] }
   0x9   :  { %4711 = vmatprep.subr.mxu1 %v4967_v8  ;;  %4692 = vmatprep.mubr.msk.f32.mxu0 %vm60_vm0, %v49_v2  ;;  %v231_v15 = vld [vmem:[%s6729_s2] sm:$0x3] }
   0xa   :  { %4712 = vmatpush3.msra.mxu1 %v5088_v9  ;;  %4693 = vmatmul.mubr.msk.f32.vlgmr.msra.gmra.mxu0 %vm60_vm0, %v50_v4  ;;  %v4577_v17 = vld [vmem:[%s6730_s10] ss:$0 sm:$0xff]  ;;  %s4971_s10 = smov 32  }
   0xb   :  { %4714 = vmatmul.mubr.msk.f32.vlgmr.msra.gmra.mxu1 %vm60_vm0, %v232_v10  ;;  %4702 = vmatprep.subr.mxu0 %v4967_v8  ;;  %v4574_v19 = vld [vmem:[%s6731_s7] ss:$0 sm:$0xff]  ;;  %s4970_s7 = smov 96  }
   0xc   :  { %4706 = vmatprep.mubr.msk.f32.mxu0 %vm4968_vm1, %v4967_v8  ;;  %4703 = vmatpush3.msra.mxu0 %v5102_v12 }
   0xd   :  { %422 = vrot.lane.b32.xlu1 %v421_v11, %s4969_s23  ;;  %4704 = vmatprep.subr.mxu0 %v4967_v8 }
   0xe   :  { %4723 = vmatprep.subr.mxu1 %v4967_v8  ;;  %4705 = vmatpush3.msra.mxu0 %v5110_v13 }
   0xf   :  { %4724 = vmatpush3.msra.mxu1 %v5078_v6  ;;  %4707 = vmatmul.mubr.msk.f32.vlgmr.msra.gmra.mxu0 %vm60_vm0, %v230_v14 }
  0x10   :  { %4716 = vmatprep.subr.mxu0 %v4967_v8  ;;  %4725 = vmatprep.subr.mxu1 %v4967_v8 }
  0x11   :  { %393 = vrot.lane.b32.xlu1 %v231_v15, %s4969_s23  ;;  %4717 = vmatpush3.msra.mxu0 %v5102_v12 }
  0x12   :  { %4726 = vmatpush3.msra.mxu1 %v5088_v9  ;;  %4727 = vmatprep.mubr.msk.f32.mxu1 %vm4968_vm1, %v4967_v8 }
  0x13   :  { %4718 = vmatprep.subr.mxu0 %v4967_v8  ;;  %4720 = vmatprep.mubr.msk.f32.mxu0 %vm4968_vm1, %v4967_v8 }
  0x14   :  { %4719 = vmatpush3.msra.mxu0 %v5110_v13  ;;  %4737 = vmatprep.subr.mxu1 %v4967_v8 }
  0x15   :  { %4730 = vmatprep.subr.mxu0 %v4967_v8 }
  0x7f   :  { %v423_v47 = vpop.permute.xlu1 %422 }
  0x83   :  { %v394_v49 = vpop.permute.xlu1 %393 }
  0xc6   :  { %v4701_v16 = vpop.f32.mrf.mxu1 }
  0xc7   :  { %v5148_v23 = vadd.f32 %v4701_v16, %v4577_v17 }
  0xc8   :  { %v217_v18 = vpop.f32.mrf.mxu1 }
  0xc9   :  { %v5146_v20 = vadd.f32 %v4577_v17, %v217_v18 }
  0xca   :  { %v4694_v22 = vpop.f32.mrf.mxu0 }
  0xcb   :  { %v377_v21 = vpop.f32.mrf.mxu1  ;;  %v5150_v25 = vadd.f32 %v4694_v22, %v4574_v19 }
  0xcc   :  { %v382_v24 = vrot.slane %v377_v21, 2  ;;  %v133_v27 = vpop.f32.mrf.mxu0 }
  0xcd   :  { %v4715_v26 = vpop.f32.mrf.mxu1  ;;  %v5153_v29 = vadd.f32 %v4574_v19, %v133_v27 }
  0xce   :  { %v384_v28 = vadd.f32 %v382_v24, %v5148_v23 }
  0xcf   :  { %v303_v30 = vpop.f32.mrf.mxu0 }
  0xd0   :  { %4839 = vtanh.f32 %v384_v28  ;;  %v307_v31 = vadd.f32 %v303_v30, %v5153_v29  ;;  %v4583_v35 = vmul.f32 -1.442695, %v384_v28 }
  0xd1   :  { %v4708_v32 = vpop.f32.mrf.mxu0 }
  0xd2   :  { %4841 = vtanh.f32 %v307_v31  ;;  %v4582_v36 = vmul.f32 -1.442695, %v307_v31 }
  0xd3   :  { %4843 = vpow2.f32 %v4583_v35 }
  0xd4   :  { %4845 = vpow2.f32 %v4582_v36 }
  0xdd   :  { %v4840_v33 = vpop.eup %4839 }
  0xde   :  { %427 = vrot.lane.b32.xlu0 %v4840_v33, %s4970_s7 }
  0xdf   :  { %v4842_v34 = vpop.eup %4841 }
  0xe0   :  { %v4844_v37 = vpop.eup %4843 }
  0xe1   :  { %v416_v38 = vadd.f32 1.0, %v4844_v37  ;;  %v4846_v39 = vpop.eup %4845 }
  0xe2   :  { %398 = vrot.lane.b32.xlu0 %v4842_v34, %s4970_s7  ;;  %v388_v40 = vadd.f32 1.0, %v4846_v39 }
  0xe3   :  { %4847 = vrcp.f32 %v416_v38 }
  0xe4   :  { %4849 = vrcp.f32 %v388_v40 }
  0xf0   :  { %v4848_v41 = vpop.eup %4847 }
  0xf1   :  { %v4850_v44 = vpop.eup %4849  ;;  %v425_v48 = vmul.f32 %v4848_v41, %v423_v47 }
  0xf2   :  { %v396_v52 = vmul.f32 %v4850_v44, %v394_v49 }
 0x150   :  { %v428_v42 = vpop.permute.xlu0 %427 }
 0x151   :  { %v430_v43 = vmul.f32 %v4848_v41, %v428_v42 }
 0x153   :  { %432 = vrot.lane.b32.xlu0 %v430_v43, %s4969_s23 }
 0x154   :  { %v399_v45 = vpop.permute.xlu0 %398 }
 0x155   :  { %v401_v46 = vmul.f32 %v4850_v44, %v399_v45 }
 0x157   :  { %403 = vrot.lane.b32.xlu1 %v401_v46, %s4969_s23 }
 0x1c5   :  { %v433_v50 = vpop.permute.xlu0 %432 }
 0x1c6   :  { %v5160_v51 = vadd.f32 %v433_v50, %v425_v48 }
 0x1c8   :  { %4851 = vtanh.f32 %v5160_v51  ;;  %v644_v31 = vrot.slane %v5160_v51, 2 }
 0x1c9   :  { %v404_v53 = vpop.permute.xlu1 %403 }
 0x1ca   :  { %v5163_v54 = vadd.f32 %v404_v53, %v396_v52 }
 0x1cc   :  { %4853 = vtanh.f32 %v5163_v54  ;;  %v617_v33 = vrot.slane %v5163_v54, 6 }
 0x1d5   :  { %v4852_v55 = vpop.eup %4851 }
 0x1d6   :  { %438 = vrot.lane.b32.xlu0 %v4852_v55, %s4971_s10 }
 0x1d9   :  { %v4854_v56 = vpop.eup %4853 }
 0x1da   :  { %409 = vrot.lane.b32.xlu1 %v4854_v56, %s4971_s10 }
 0x248   :  { %v439_v57 = vpop.permute.xlu0 %438 }
 0x249   :  { %v5168_v58 = vmul.f32 %v4848_v41, %v439_v57 }
 0x24b   :  { %v530_v59 = vrot.slane %v5168_v58, 6 }
 0x24c   :  { %v410_v60 = vpop.permute.xlu1 %409 }
 0x24d   :  { %v412_v61 = vmul.f32 %v4850_v44, %v410_v60  ;;  %531 = vrot.lane.b32.xlu1 %v530_v59, %s4972_s27 }
 0x24f   :  { %443 = vrot.lane.b32.xlu0 %v412_v61, %s4972_s27 }
 0x2bf   :  { %v532_v62 = vpop.permute.xlu1 %531 }
 0x2c0   :  { %4728 = vmatmul.mubr.msk.f32.vlgmr.msra.gmra.mxu1 %vm60_vm0, %v532_v62 }
 0x2c1   :  { %v444_v63 = vpop.permute.xlu0 %443  ;;  %4738 = vmatpush3.msra.mxu1 %v5078_v6  ;;  %4741 = vmatprep.mubr.msk.f32.mxu1 %vm4968_vm1, %v4967_v8 }
 0x2c2   :  { %447 = vst.msk [vmem:[#allocation2] sm:$0x3] %vm446_vm2, %v444_v63  ;;  %4721 = vmatmul.mubr.msk.f32.vlgmr.msra.gmra.mxu0 %vm60_vm0, %v444_v63  ;;  %4739 = vmatprep.subr.mxu1 %v4967_v8 }
 0x2c3   :  { %4731 = vmatpush3.msra.mxu0 %v5102_v12  ;;  %4740 = vmatpush3.msra.mxu1 %v5088_v9 }
 0x2c4   :  { %4732 = vmatprep.subr.mxu0 %v4967_v8  ;;  %4734 = vmatprep.mubr.msk.f32.mxu0 %vm4968_vm1, %v4967_v8 }
 0x2c5   :  { %4733 = vmatpush3.msra.mxu0 %v5110_v13  ;;  %4751 = vmatprep.subr.mxu1 %v4967_v8 }
 0x2c6   :  { %4744 = vmatprep.subr.mxu0 %v4967_v8 }
 0x380   :  { %v601_v0 = vpop.f32.mrf.mxu1 }
 0x381   :  { %v606_v1 = vrot.slane %v601_v0, 4 }
 0x382   :  { %v522_v2 = vpop.f32.mrf.mxu0  ;;  %v4729_v3 = vpop.f32.mrf.mxu1 }
 0x383   :  { %v608_v4 = vadd.f32 %v606_v1, %v5148_v23  ;;  %v527_v5 = vrot.slane %v522_v2, 6 }
 0x384   :  { %v4722_v7 = vpop.f32.mrf.mxu0 }
 0x385   :  { %4855 = vtanh.f32 %v608_v4  ;;  %v529_v10 = vadd.f32 %v527_v5, %v5153_v29  ;;  %v4587_v15 = vmul.f32 -1.442695, %v608_v4 }
 0x387   :  { %4857 = vtanh.f32 %v529_v10  ;;  %v4586_v16 = vmul.f32 -1.442695, %v529_v10 }
 0x388   :  { %4859 = vpow2.f32 %v4587_v15 }
 0x389   :  { %4861 = vpow2.f32 %v4586_v16 }
 0x392   :  { %v4856_v11 = vpop.eup %4855 }
 0x393   :  { %648 = vrot.lane.b32.xlu1 %v4856_v11, %s4970_s7 }
 0x394   :  { %v4858_v14 = vpop.eup %4857 }
 0x395   :  { %621 = vrot.lane.b32.xlu0 %v4858_v14, %s4970_s7  ;;  %v4860_v17 = vpop.eup %4859 }
 0x396   :  { %v4862_v18 = vpop.eup %4861  ;;  %v639_v19 = vadd.f32 1.0, %v4860_v17 }
 0x397   :  { %v612_v21 = vadd.f32 1.0, %v4862_v18 }
 0x398   :  { %4863 = vrcp.f32 %v639_v19 }
 0x399   :  { %4865 = vrcp.f32 %v612_v21 }
 0x3a5   :  { %v4864_v22 = vpop.eup %4863 }
 0x3a6   :  { %v4866_v27 = vpop.eup %4865  ;;  %v646_v32 = vmul.f32 %v4864_v22, %v644_v31 }
 0x3a7   :  { %v619_v36 = vmul.f32 %v4866_v27, %v617_v33 }
 0x405   :  { %v649_v24 = vpop.permute.xlu1 %648 }
 0x406   :  { %v651_v26 = vmul.f32 %v4864_v22, %v649_v24 }
 0x407   :  { %v622_v28 = vpop.permute.xlu0 %621 }
 0x408   :  { %653 = vrot.lane.b32.xlu1 %v651_v26, %s4969_s23  ;;  %v624_v30 = vmul.f32 %v4866_v27, %v622_v28 }
 0x40a   :  { %626 = vrot.lane.b32.xlu0 %v624_v30, %s4969_s23 }
 0x47a   :  { %v654_v34 = vpop.permute.xlu1 %653 }
 0x47b   :  { %v5196_v35 = vadd.f32 %v654_v34, %v646_v32 }
 0x47c   :  { %v627_v37 = vpop.permute.xlu0 %626 }
 0x47d   :  { %4867 = vtanh.f32 %v5196_v35  ;;  %v5199_v38 = vadd.f32 %v627_v37, %v619_v36  ;;  %v868_v11 = vrot.slane %v5196_v35, 2 }
 0x47f   :  { %4869 = vtanh.f32 %v5199_v38  ;;  %v841_v15 = vrot.slane %v5199_v38, 6 }
 0x48a   :  { %v4868_v39 = vpop.eup %4867 }
 0x48b   :  { %659 = vrot.lane.b32.xlu1 %v4868_v39, %s4971_s10 }
 0x48c   :  { %v4870_v40 = vpop.eup %4869 }
 0x48d   :  { %632 = vrot.lane.b32.xlu0 %v4870_v40, %s4971_s10 }
 0x4fd   :  { %v660_v41 = vpop.permute.xlu1 %659 }
 0x4fe   :  { %v5204_v42 = vmul.f32 %v4864_v22, %v660_v41 }
 0x4ff   :  { %v633_v44 = vpop.permute.xlu0 %632 }
 0x500   :  { %v754_v43 = vrot.slane %v5204_v42, 4  ;;  %v5207_v45 = vmul.f32 %v4866_v27, %v633_v44 }
 0x502   :  { %755 = vrot.lane.b32.xlu1 %v754_v43, %s4972_s27  ;;  %v675_v46 = vrot.slane %v5207_v45, 2 }
 0x504   :  { %676 = vrot.lane.b32.xlu0 %v675_v46, %s4972_s27 }
 0x574   :  { %v756_v47 = vpop.permute.xlu1 %755 }
 0x575   :  { %4742 = vmatmul.mubr.msk.f32.vlgmr.msra.gmra.mxu1 %vm60_vm0, %v756_v47 }
 0x576   :  { %4752 = vmatpush3.msra.mxu1 %v5078_v6  ;;  %4755 = vmatprep.mubr.msk.f32.mxu1 %vm4968_vm1, %v4967_v8  ;;  %v677_v48 = vpop.permute.xlu0 %676 }
 0x577   :  { %4753 = vmatprep.subr.mxu1 %v4967_v8  ;;  %4735 = vmatmul.mubr.msk.f32.vlgmr.msra.gmra.mxu0 %vm60_vm0, %v677_v48 }
 0x578   :  { %4754 = vmatpush3.msra.mxu1 %v5088_v9  ;;  %4745 = vmatpush3.msra.mxu0 %v5102_v12 }
 0x579   :  { %4748 = vmatprep.mubr.msk.f32.mxu0 %vm4968_vm1, %v4967_v8  ;;  %4746 = vmatprep.subr.mxu0 %v4967_v8 }
 0x57a   :  { %4765 = vmatprep.subr.mxu1 %v4967_v8  ;;  %4747 = vmatpush3.msra.mxu0 %v5110_v13 }
 0x57b   :  { %4758 = vmatprep.subr.mxu0 %v4967_v8 }
 0x635   :  { %v825_v49 = vpop.f32.mrf.mxu1 }
 0x636   :  { %v830_v50 = vrot.slane %v825_v49, 6 }
 0x637   :  { %v4743_v51 = vpop.f32.mrf.mxu1  ;;  %v746_v53 = vpop.f32.mrf.mxu0 }
 0x638   :  { %v832_v52 = vadd.f32 %v830_v50, %v5148_v23  ;;  %v751_v54 = vrot.slane %v746_v53, 4 }
 0x639   :  { %v4736_v55 = vpop.f32.mrf.mxu0 }
 0x63a   :  { %4871 = vtanh.f32 %v832_v52  ;;  %v753_v56 = vadd.f32 %v751_v54, %v5153_v29  ;;  %v4591_v60 = vmul.f32 -1.442695, %v832_v52 }
 0x63c   :  { %4873 = vtanh.f32 %v753_v56  ;;  %v4590_v61 = vmul.f32 -1.442695, %v753_v56 }
 0x63d   :  { %4875 = vpow2.f32 %v4591_v60 }
 0x63e   :  { %4877 = vpow2.f32 %v4590_v61 }
 0x647   :  { %v4872_v57 = vpop.eup %4871 }
 0x648   :  { %872 = vrot.lane.b32.xlu1 %v4872_v57, %s4970_s7 }
 0x649   :  { %v4874_v59 = vpop.eup %4873 }
 0x64a   :  { %845 = vrot.lane.b32.xlu0 %v4874_v59, %s4970_s7  ;;  %v4876_v62 = vpop.eup %4875 }
 0x64b   :  { %v4878_v63 = vpop.eup %4877  ;;  %v863_v0 = vadd.f32 1.0, %v4876_v62 }
 0x64c   :  { %v836_v1 = vadd.f32 1.0, %v4878_v63 }
 0x64d   :  { %4879 = vrcp.f32 %v863_v0 }
 0x64e   :  { %4881 = vrcp.f32 %v836_v1 }
 0x65a   :  { %v4880_v2 = vpop.eup %4879 }
 0x65b   :  { %v4882_v5 = vpop.eup %4881  ;;  %v870_v14 = vmul.f32 %v4880_v2, %v868_v11 }
 0x65c   :  { %v843_v18 = vmul.f32 %v4882_v5, %v841_v15 }
 0x6ba   :  { %v873_v3 = vpop.permute.xlu1 %872 }
 0x6bb   :  { %v875_v4 = vmul.f32 %v4880_v2, %v873_v3 }
 0x6bc   :  { %v846_v7 = vpop.permute.xlu0 %845 }
 0x6bd   :  { %877 = vrot.lane.b32.xlu1 %v875_v4, %s4969_s23  ;;  %v848_v10 = vmul.f32 %v4882_v5, %v846_v7 }
 0x6bf   :  { %850 = vrot.lane.b32.xlu0 %v848_v10, %s4969_s23 }
 0x72f   :  { %v878_v16 = vpop.permute.xlu1 %877 }
 0x730   :  { %v5234_v17 = vadd.f32 %v878_v16, %v870_v14 }
 0x731   :  { %v851_v19 = vpop.permute.xlu0 %850 }
 0x732   :  { %4883 = vtanh.f32 %v5234_v17  ;;  %v5237_v21 = vadd.f32 %v851_v19, %v843_v18  ;;  %v1087_v56 = vrot.slane %v5234_v17, 2 }
 0x734   :  { %4885 = vtanh.f32 %v5237_v21  ;;  %v1060_v61 = vrot.slane %v5237_v21, 6 }
 0x73f   :  { %v4884_v22 = vpop.eup %4883 }
 0x740   :  { %883 = vrot.lane.b32.xlu1 %v4884_v22, %s4971_s10 }
 0x741   :  { %v4886_v24 = vpop.eup %4885 }
 0x742   :  { %856 = vrot.lane.b32.xlu0 %v4886_v24, %s4971_s10 }
 0x7b2   :  { %v884_v26 = vpop.permute.xlu1 %883 }
 0x7b3   :  { %v5242_v27 = vmul.f32 %v4880_v2, %v884_v26 }
 0x7b4   :  { %v857_v30 = vpop.permute.xlu0 %856 }
 0x7b5   :  { %v976_v28 = vrot.slane %v5242_v27, 2  ;;  %v5245_v31 = vmul.f32 %v4882_v5, %v857_v30 }
 0x7b7   :  { %977 = vrot.lane.b32.xlu1 %v976_v28, %s4972_s27  ;;  %v897_v32 = vrot.slane %v5245_v31, 4 }
 0x7b9   :  { %898 = vrot.lane.b32.xlu0 %v897_v32, %s4972_s27 }
 0x829   :  { %v978_v33 = vpop.permute.xlu1 %977 }
 0x82a   :  { %4756 = vmatmul.mubr.msk.f32.vlgmr.msra.gmra.mxu1 %vm60_vm0, %v978_v33 }
 0x82b   :  { %4766 = vmatpush3.msra.mxu1 %v5078_v6  ;;  %4769 = vmatprep.mubr.msk.f32.mxu1 %vm4968_vm1, %v4967_v8  ;;  %v899_v34 = vpop.permute.xlu0 %898 }
 0x82c   :  { %4767 = vmatprep.subr.mxu1 %v4967_v8  ;;  %4749 = vmatmul.mubr.msk.f32.vlgmr.msra.gmra.mxu0 %vm60_vm0, %v899_v34 }
 0x82d   :  { %4768 = vmatpush3.msra.mxu1 %v5088_v9  ;;  %4759 = vmatpush3.msra.mxu0 %v5102_v12 }
 0x82e   :  { %4762 = vmatprep.mubr.msk.f32.mxu0 %vm4968_vm1, %v4967_v8  ;;  %4760 = vmatprep.subr.mxu0 %v4967_v8 }
 0x82f   :  { %4779 = vmatprep.subr.mxu1 %v4967_v8  ;;  %4761 = vmatpush3.msra.mxu0 %v5110_v13 }
 0x830   :  { %4772 = vmatprep.subr.mxu0 %v4967_v8 }
 0x8ea   :  { %v1047_v35 = vpop.f32.mrf.mxu1 }
 0x8eb   :  { %v1051_v36 = vadd.f32 %v1047_v35, %v5148_v23 }
 0x8ec   :  { %v4757_v37 = vpop.f32.mrf.mxu1  ;;  %v968_v38 = vpop.f32.mrf.mxu0 }
 0x8ed   :  { %4887 = vtanh.f32 %v1051_v36  ;;  %v973_v39 = vrot.slane %v968_v38, 2  ;;  %v4595_v46 = vmul.f32 -1.442695, %v1051_v36 }
 0x8ee   :  { %v4750_v40 = vpop.f32.mrf.mxu0 }
 0x8ef   :  { %v975_v41 = vadd.f32 %v973_v39, %v5153_v29 }
 0x8f1   :  { %4889 = vtanh.f32 %v975_v41  ;;  %v4594_v47 = vmul.f32 -1.442695, %v975_v41 }
 0x8f2   :  { %4891 = vpow2.f32 %v4595_v46 }
 0x8f3   :  { %4893 = vpow2.f32 %v4594_v47 }
 0x8fa   :  { %v4888_v43 = vpop.eup %4887 }
 0x8fb   :  { %1091 = vrot.lane.b32.xlu0 %v4888_v43, %s4970_s7 }
 0x8fe   :  { %v4890_v44 = vpop.eup %4889 }
 0x8ff   :  { %1064 = vrot.lane.b32.xlu1 %v4890_v44, %s4970_s7  ;;  %v4892_v48 = vpop.eup %4891 }
 0x900   :  { %v1082_v23 = vadd.f32 1.0, %v4892_v48  ;;  %v4894_v49 = vpop.eup %4893 }
 0x901   :  { %v1055_v50 = vadd.f32 1.0, %v4894_v49 }
 0x902   :  { %4895 = vrcp.f32 %v1082_v23 }
 0x903   :  { %4897 = vrcp.f32 %v1055_v50 }
 0x90f   :  { %v4896_v51 = vpop.eup %4895 }
 0x910   :  { %v4898_v53 = vpop.eup %4897  ;;  %v1089_v57 = vmul.f32 %v4896_v51, %v1087_v56 }
 0x911   :  { %v1062_v62 = vmul.f32 %v4898_v53, %v1060_v61 }
 0x96d   :  { %v1092_v52 = vpop.permute.xlu0 %1091 }
 0x96e   :  { %v1094_v29 = vmul.f32 %v4896_v51, %v1092_v52 }
 0x970   :  { %1096 = vrot.lane.b32.xlu0 %v1094_v29, %s4969_s23 }
 0x971   :  { %v1065_v54 = vpop.permute.xlu1 %1064 }
 0x972   :  { %v1067_v55 = vmul.f32 %v4898_v53, %v1065_v54 }
 0x974   :  { %1069 = vrot.lane.b32.xlu1 %v1067_v55, %s4969_s23 }
 0x9e2   :  { %v1097_v59 = vpop.permute.xlu0 %1096 }
 0x9e3   :  { %v5271_v60 = vadd.f32 %v1097_v59, %v1089_v57 }
 0x9e5   :  { %4899 = vtanh.f32 %v5271_v60  ;;  %v1303_v43 = vrot.slane %v5271_v60, 2 }
 0x9e6   :  { %v1070_v63 = vpop.permute.xlu1 %1069 }
 0x9e7   :  { %v5275_v0 = vadd.f32 %v1070_v63, %v1062_v62 }
 0x9e9   :  { %4901 = vtanh.f32 %v5275_v0  ;;  %v1276_v48 = vrot.slane %v5275_v0, 6 }
 0x9f2   :  { %v4900_v1 = vpop.eup %4899 }
 0x9f3   :  { %1102 = vrot.lane.b32.xlu0 %v4900_v1, %s4971_s10 }
 0x9f6   :  { %v4902_v2 = vpop.eup %4901 }
 0x9f7   :  { %1075 = vrot.lane.b32.xlu1 %v4902_v2, %s4971_s10 }
 0xa65   :  { %v1103_v3 = vpop.permute.xlu0 %1102 }
 0xa66   :  { %v1105_v4 = vmul.f32 %v4896_v51, %v1103_v3 }
 0xa68   :  { %1112 = vrot.lane.b32.xlu0 %v1105_v4, %s4972_s27 }
 0xa69   :  { %v1076_v5 = vpop.permute.xlu1 %1075 }
 0xa6a   :  { %v5281_v7 = vmul.f32 %v4898_v53, %v1076_v5 }
 0xa6c   :  { %v1116_v10 = vrot.slane %v5281_v7, 6 }
 0xa6e   :  { %1117 = vrot.lane.b32.xlu1 %v1116_v10, %s4972_s27 }
 0xada   :  { %v1113_v11 = vpop.permute.xlu0 %1112 }
 0xadb   :  { %1115 = vst.msk [vmem:[#allocation3 + $0x8] sm:$0x3] %vm446_vm2, %v1113_v11  ;;  %4770 = vmatmul.mubr.msk.f32.vlgmr.msra.gmra.mxu1 %vm60_vm0, %v1113_v11 }
 0xadc   :  { %4780 = vmatpush3.msra.mxu1 %v5078_v6  ;;  %4783 = vmatprep.mubr.msk.f32.mxu1 %vm4968_vm1, %v4967_v8 }
 0xadd   :  { %4781 = vmatprep.subr.mxu1 %v4967_v8 }
 0xade   :  { %4782 = vmatpush3.msra.mxu1 %v5088_v9 }
 0xadf   :  { %4793 = vmatprep.subr.mxu1 %v4967_v8 }
 0xae0   :  { %v1118_v14 = vpop.permute.xlu1 %1117 }
 0xae1   :  { %4763 = vmatmul.mubr.msk.f32.vlgmr.msra.gmra.mxu0 %vm60_vm0, %v1118_v14 }
 0xae2   :  { %4773 = vmatpush3.msra.mxu0 %v5102_v12  ;;  %4776 = vmatprep.mubr.msk.f32.mxu0 %vm4968_vm1, %v4967_v8 }
 0xae3   :  { %4774 = vmatprep.subr.mxu0 %v4967_v8 }
 0xae4   :  { %4775 = vmatpush3.msra.mxu0 %v5110_v13 }
 0xae5   :  { %4786 = vmatprep.subr.mxu0 %v4967_v8 }
 0xb9b   :  { %v1260_v15 = vpop.f32.mrf.mxu1 }
 0xb9c   :  { %v1265_v16 = vrot.slane %v1260_v15, 2 }
 0xb9d   :  { %v4771_v17 = vpop.f32.mrf.mxu1 }
 0xb9e   :  { %v1267_v18 = vadd.f32 %v1265_v16, %v5146_v20 }
 0xba0   :  { %4903 = vtanh.f32 %v1267_v18  ;;  %v4599_v28 = vmul.f32 -1.442695, %v1267_v18 }
 0xba1   :  { %v1187_v19 = vpop.f32.mrf.mxu0 }
 0xba2   :  { %v1191_v21 = vadd.f32 %v1187_v19, %v5150_v25 }
 0xba3   :  { %v4764_v22 = vpop.f32.mrf.mxu0 }
 0xba4   :  { %4905 = vtanh.f32 %v1191_v21  ;;  %v4598_v30 = vmul.f32 -1.442695, %v1191_v21 }
 0xba5   :  { %4907 = vpow2.f32 %v4599_v28 }
 0xba6   :  { %4909 = vpow2.f32 %v4598_v30 }
 0xbad   :  { %v4904_v24 = vpop.eup %4903 }
 0xbae   :  { %1307 = vrot.lane.b32.xlu0 %v4904_v24, %s4970_s7 }
 0xbb1   :  { %v4906_v26 = vpop.eup %4905 }
 0xbb2   :  { %1280 = vrot.lane.b32.xlu1 %v4906_v26, %s4970_s7  ;;  %v4908_v32 = vpop.eup %4907 }
 0xbb3   :  { %v1298_v33 = vadd.f32 1.0, %v4908_v32  ;;  %v4910_v34 = vpop.eup %4909 }
 0xbb4   :  { %v1271_v35 = vadd.f32 1.0, %v4910_v34 }
 0xbb5   :  { %4911 = vrcp.f32 %v1298_v33 }
 0xbb6   :  { %4913 = vrcp.f32 %v1271_v35 }
 0xbc2   :  { %v4912_v36 = vpop.eup %4911 }
 0xbc3   :  { %v4914_v39 = vpop.eup %4913  ;;  %v1305_v44 = vmul.f32 %v4912_v36, %v1303_v43 }
 0xbc4   :  { %v1278_v23 = vmul.f32 %v4914_v39, %v1276_v48 }
 0xc20   :  { %v1308_v37 = vpop.permute.xlu0 %1307 }
 0xc21   :  { %v1310_v38 = vmul.f32 %v4912_v36, %v1308_v37 }
 0xc23   :  { %1312 = vrot.lane.b32.xlu0 %v1310_v38, %s4969_s23 }
 0xc24   :  { %v1281_v40 = vpop.permute.xlu1 %1280 }
 0xc25   :  { %v1283_v41 = vmul.f32 %v4914_v39, %v1281_v40 }
 0xc27   :  { %1285 = vrot.lane.b32.xlu1 %v1283_v41, %s4969_s23 }
 0xc95   :  { %v1313_v46 = vpop.permute.xlu0 %1312 }
 0xc96   :  { %v5307_v47 = vadd.f32 %v1313_v46, %v1305_v44 }
 0xc98   :  { %4915 = vtanh.f32 %v5307_v47  ;;  %v1522_v28 = vrot.slane %v5307_v47, 2 }
 0xc99   :  { %v1286_v49 = vpop.permute.xlu1 %1285 }
 0xc9a   :  { %v5311_v50 = vadd.f32 %v1286_v49, %v1278_v23 }
 0xc9c   :  { %4917 = vtanh.f32 %v5311_v50  ;;  %v1495_v32 = vrot.slane %v5311_v50, 6 }
 0xca5   :  { %v4916_v51 = vpop.eup %4915 }
 0xca6   :  { %1318 = vrot.lane.b32.xlu0 %v4916_v51, %s4971_s10 }
 0xca9   :  { %v4918_v52 = vpop.eup %4917 }
 0xcaa   :  { %1291 = vrot.lane.b32.xlu1 %v4918_v52, %s4971_s10 }
 0xd18   :  { %v1319_v29 = vpop.permute.xlu0 %1318 }
 0xd19   :  { %v5316_v53 = vmul.f32 %v4912_v36, %v1319_v29 }
 0xd1b   :  { %v1408_v54 = vrot.slane %v5316_v53, 6 }
 0xd1c   :  { %v1292_v55 = vpop.permute.xlu1 %1291 }
 0xd1d   :  { %1409 = vrot.lane.b32.xlu1 %v1408_v54, %s4972_s27  ;;  %v1294_v56 = vmul.f32 %v4914_v39, %v1292_v55 }
 0xd1f   :  { %1323 = vrot.lane.b32.xlu0 %v1294_v56, %s4972_s27 }
 0xd8f   :  { %v1410_v57 = vpop.permute.xlu1 %1409 }
 0xd90   :  { %4784 = vmatmul.mubr.msk.f32.vlgmr.msra.gmra.mxu1 %vm60_vm0, %v1410_v57 }
 0xd91   :  { %4794 = vmatpush3.msra.mxu1 %v5078_v6  ;;  %4797 = vmatprep.mubr.msk.f32.mxu1 %vm4968_vm1, %v4967_v8  ;;  %v1324_v59 = vpop.permute.xlu0 %1323 }
 0xd92   :  { %4795 = vmatprep.subr.mxu1 %v4967_v8  ;;  %1326 = vst.msk [vmem:[#allocation2 + $0x8] sm:$0x3] %vm446_vm2, %v1324_v59  ;;  %4777 = vmatmul.mubr.msk.f32.vlgmr.msra.gmra.mxu0 %vm60_vm0, %v1324_v59 }
 0xd93   :  { %4796 = vmatpush3.msra.mxu1 %v5088_v9  ;;  %4787 = vmatpush3.msra.mxu0 %v5102_v12 }
 0xd94   :  { %4790 = vmatprep.mubr.msk.f32.mxu0 %vm4968_vm1, %v4967_v8  ;;  %4788 = vmatprep.subr.mxu0 %v4967_v8 }
 0xd95   :  { %4807 = vmatprep.subr.mxu1 %v4967_v8  ;;  %4789 = vmatpush3.msra.mxu0 %v5110_v13 }
 0xd96   :  { %4800 = vmatprep.subr.mxu0 %v4967_v8 }
 0xe50   :  { %v1479_v60 = vpop.f32.mrf.mxu1 }
 0xe51   :  { %v1484_v61 = vrot.slane %v1479_v60, 4 }
 0xe52   :  { %v4785_v62 = vpop.f32.mrf.mxu1  ;;  %v1400_v0 = vpop.f32.mrf.mxu0 }
 0xe53   :  { %v1486_v63 = vadd.f32 %v1484_v61, %v5146_v20  ;;  %v1405_v1 = vrot.slane %v1400_v0, 6 }
 0xe54   :  { %v4778_v2 = vpop.f32.mrf.mxu0 }
 0xe55   :  { %4919 = vtanh.f32 %v1486_v63  ;;  %v1407_v3 = vadd.f32 %v1405_v1, %v5150_v25  ;;  %v4603_v10 = vmul.f32 -1.442695, %v1486_v63 }
 0xe57   :  { %4921 = vtanh.f32 %v1407_v3  ;;  %v4602_v11 = vmul.f32 -1.442695, %v1407_v3 }
 0xe58   :  { %4923 = vpow2.f32 %v4603_v10 }
 0xe59   :  { %4925 = vpow2.f32 %v4602_v11 }
 0xe62   :  { %v4920_v4 = vpop.eup %4919 }
 0xe63   :  { %1526 = vrot.lane.b32.xlu1 %v4920_v4, %s4970_s7 }
 0xe64   :  { %v4922_v5 = vpop.eup %4921 }
 0xe65   :  { %1499 = vrot.lane.b32.xlu0 %v4922_v5, %s4970_s7  ;;  %v4924_v14 = vpop.eup %4923 }
 0xe66   :  { %v4926_v15 = vpop.eup %4925  ;;  %v1517_v16 = vadd.f32 1.0, %v4924_v14 }
 0xe67   :  { %v1490_v17 = vadd.f32 1.0, %v4926_v15 }
 0xe68   :  { %4927 = vrcp.f32 %v1517_v16 }
 0xe69   :  { %4929 = vrcp.f32 %v1490_v17 }
 0xe75   :  { %v4928_v18 = vpop.eup %4927 }
 0xe76   :  { %v4930_v22 = vpop.eup %4929  ;;  %v1524_v30 = vmul.f32 %v4928_v18, %v1522_v28 }
 0xe77   :  { %v1497_v35 = vmul.f32 %v4930_v22, %v1495_v32 }
 0xed5   :  { %v1527_v19 = vpop.permute.xlu1 %1526 }
 0xed6   :  { %v1529_v21 = vmul.f32 %v4928_v18, %v1527_v19 }
 0xed7   :  { %v1500_v24 = vpop.permute.xlu0 %1499 }
 0xed8   :  { %1531 = vrot.lane.b32.xlu1 %v1529_v21, %s4969_s23  ;;  %v1502_v26 = vmul.f32 %v4930_v22, %v1500_v24 }
 0xeda   :  { %1504 = vrot.lane.b32.xlu0 %v1502_v26, %s4969_s23 }
 0xf4a   :  { %v1532_v33 = vpop.permute.xlu1 %1531 }
 0xf4b   :  { %v5344_v34 = vadd.f32 %v1532_v33, %v1524_v30 }
 0xf4c   :  { %v1505_v36 = vpop.permute.xlu0 %1504 }
 0xf4d   :  { %4931 = vtanh.f32 %v5344_v34  ;;  %v5347_v37 = vadd.f32 %v1505_v36, %v1497_v35  ;;  %v1744_v3 = vrot.slane %v5344_v34, 2 }
 0xf4f   :  { %4933 = vtanh.f32 %v5347_v37  ;;  %v1717_v5 = vrot.slane %v5347_v37, 6 }
 0xf5a   :  { %v4932_v38 = vpop.eup %4931 }
 0xf5b   :  { %1537 = vrot.lane.b32.xlu1 %v4932_v38, %s4971_s10 }
 0xf5c   :  { %v4934_v39 = vpop.eup %4933 }
 0xf5d   :  { %1510 = vrot.lane.b32.xlu0 %v4934_v39, %s4971_s10 }
 0xfcd   :  { %v1538_v40 = vpop.permute.xlu1 %1537 }
 0xfce   :  { %v5352_v41 = vmul.f32 %v4928_v18, %v1538_v40 }
 0xfcf   :  { %v1511_v44 = vpop.permute.xlu0 %1510 }
 0xfd0   :  { %v1630_v43 = vrot.slane %v5352_v41, 4  ;;  %v5355_v46 = vmul.f32 %v4930_v22, %v1511_v44 }
 0xfd2   :  { %1631 = vrot.lane.b32.xlu1 %v1630_v43, %s4972_s27  ;;  %v1551_v47 = vrot.slane %v5355_v46, 2 }
 0xfd4   :  { %1552 = vrot.lane.b32.xlu0 %v1551_v47, %s4972_s27 }
0x1044   :  { %v1632_v48 = vpop.permute.xlu1 %1631 }
0x1045   :  { %4798 = vmatmul.mubr.msk.f32.vlgmr.msra.gmra.mxu1 %vm60_vm0, %v1632_v48 }
0x1046   :  { %4808 = vmatpush3.msra.mxu1 %v5078_v6  ;;  %4811 = vmatprep.mubr.msk.f32.mxu1 %vm4968_vm1, %v4967_v8  ;;  %v1553_v23 = vpop.permute.xlu0 %1552 }
0x1047   :  { %4809 = vmatprep.subr.mxu1 %v4967_v8  ;;  %4791 = vmatmul.mubr.msk.f32.vlgmr.msra.gmra.mxu0 %vm60_vm0, %v1553_v23 }
0x1048   :  { %4810 = vmatpush3.msra.mxu1 %v5088_v9  ;;  %4801 = vmatpush3.msra.mxu0 %v5102_v12 }
0x1049   :  { %4804 = vmatprep.mubr.msk.f32.mxu0 %vm4968_vm1, %v4967_v8  ;;  %4802 = vmatprep.subr.mxu0 %v4967_v8 }
0x104a   :  { %4803 = vmatpush3.msra.mxu0 %v5110_v13 }
0x1105   :  { %v1701_v6 = vpop.f32.mrf.mxu1 }
0x1106   :  { %v1706_v49 = vrot.slane %v1701_v6, 6 }
0x1107   :  { %v4799_v50 = vpop.f32.mrf.mxu1  ;;  %v1622_v52 = vpop.f32.mrf.mxu0 }
0x1108   :  { %v1708_v51 = vadd.f32 %v1706_v49, %v5146_v20  ;;  %v1627_v29 = vrot.slane %v1622_v52, 4 }
0x1109   :  { %v4792_v54 = vpop.f32.mrf.mxu0 }
0x110a   :  { %4935 = vtanh.f32 %v1708_v51  ;;  %v1629_v9 = vadd.f32 %v1627_v29, %v5150_v25  ;;  %v4607_v8 = vmul.f32 -1.442695, %v1708_v51 }
0x110c   :  { %4937 = vtanh.f32 %v1629_v9  ;;  %v4606_v13 = vmul.f32 -1.442695, %v1629_v9 }
0x110d   :  { %4939 = vpow2.f32 %v4607_v8 }
0x110e   :  { %4941 = vpow2.f32 %v4606_v13 }
0x1117   :  { %v4936_v12 = vpop.eup %4935 }
0x1118   :  { %1748 = vrot.lane.b32.xlu1 %v4936_v12, %s4970_s7 }
0x1119   :  { %v4938_v55 = vpop.eup %4937 }
0x111a   :  { %1721 = vrot.lane.b32.xlu0 %v4938_v55, %s4970_s7  ;;  %v4940_v56 = vpop.eup %4939 }
0x111b   :  { %v4942_v57 = vpop.eup %4941  ;;  %v1739_v59 = vadd.f32 1.0, %v4940_v56 }
0x111c   :  { %v1712_v60 = vadd.f32 1.0, %v4942_v57 }
0x111d   :  { %4943 = vrcp.f32 %v1739_v59 }
0x111e   :  { %4945 = vrcp.f32 %v1712_v60 }
0x112a   :  { %v4944_v61 = vpop.eup %4943 }
0x112b   :  { %v4946_v0 = vpop.eup %4945  ;;  %v1746_v4 = vmul.f32 %v4944_v61, %v1744_v3 }
0x112c   :  { %v1719_v14 = vmul.f32 %v4946_v0, %v1717_v5 }
0x118a   :  { %v1749_v62 = vpop.permute.xlu1 %1748 }
0x118b   :  { %v1751_v63 = vmul.f32 %v4944_v61, %v1749_v62 }
0x118c   :  { %v1722_v1 = vpop.permute.xlu0 %1721 }
0x118d   :  { %1753 = vrot.lane.b32.xlu1 %v1751_v63, %s4969_s23  ;;  %v1724_v2 = vmul.f32 %v4946_v0, %v1722_v1 }
0x118f   :  { %1726 = vrot.lane.b32.xlu0 %v1724_v2, %s4969_s23 }
0x11ff   :  { %v1754_v10 = vpop.permute.xlu1 %1753 }
0x1200   :  { %v1756_v11 = vadd.f32 %v1754_v10, %v1746_v4  ;;  %v4974_v4 = vmov -10000.0  }
0x1201   :  { %v1727_v15 = vpop.permute.xlu0 %1726 }
0x1202   :  { %4947 = vtanh.f32 %v1756_v11  ;;  %v1729_v16 = vadd.f32 %v1727_v15, %v1719_v14  ;;  %v1963_v54 = vrot.slane %v1756_v11, 2 }
0x1204   :  { %4949 = vtanh.f32 %v1729_v16  ;;  %v1936_v8 = vrot.slane %v1729_v16, 6 }
0x120f   :  { %v4948_v17 = vpop.eup %4947 }
0x1210   :  { %1759 = vrot.lane.b32.xlu1 %v4948_v17, %s4971_s10 }
0x1211   :  { %v4950_v18 = vpop.eup %4949 }
0x1212   :  { %1732 = vrot.lane.b32.xlu0 %v4950_v18, %s4971_s10 }
0x1282   :  { %v1760_v19 = vpop.permute.xlu1 %1759 }
0x1283   :  { %v1762_v21 = vmul.f32 %v4944_v61, %v1760_v19  ;;  %v5444_v19 = vld [vmem:[%s6733_s13] sm:$0x1f] }
0x1284   :  { %v1733_v24 = vpop.permute.xlu0 %1732 }
0x1285   :  { %v1852_v22 = vrot.slane %v1762_v21, 2  ;;  %v1735_v26 = vmul.f32 %v4946_v0, %v1733_v24 }
0x1287   :  { %1853 = vrot.lane.b32.xlu1 %v1852_v22, %s4972_s27  ;;  %v1773_v28 = vrot.slane %v1735_v26, 4 }
0x1289   :  { %1774 = vrot.lane.b32.xlu0 %v1773_v28, %s4972_s27 }
0x12f9   :  { %v1854_v30 = vpop.permute.xlu1 %1853 }
0x12fa   :  { %4812 = vmatmul.mubr.msk.f32.vlgmr.msra.gmra.mxu1 %vm60_vm0, %v1854_v30 }
0x12fb   :  { %v1775_v32 = vpop.permute.xlu0 %1774 }
0x12fc   :  { %4805 = vmatmul.mubr.msk.f32.vlgmr.msra.gmra.mxu0 %vm60_vm0, %v1775_v32 }
0x13ba   :  { %v1923_v33 = vpop.f32.mrf.mxu1 }
0x13bb   :  { %v1927_v34 = vadd.f32 %v1923_v33, %v5146_v20 }
0x13bc   :  { %v4813_v35 = vpop.f32.mrf.mxu1  ;;  %v1844_v36 = vpop.f32.mrf.mxu0 }
0x13bd   :  { %4951 = vtanh.f32 %v1927_v34  ;;  %v1849_v37 = vrot.slane %v1844_v36, 2  ;;  %v4611_v44 = vmul.f32 -1.442695, %v1927_v34 }
0x13be   :  { %v4806_v38 = vpop.f32.mrf.mxu0 }
0x13bf   :  { %v1851_v39 = vadd.f32 %v1849_v37, %v5150_v25 }
0x13c1   :  { %4953 = vtanh.f32 %v1851_v39  ;;  %v4610_v47 = vmul.f32 -1.442695, %v1851_v39 }
0x13c2   :  { %4955 = vpow2.f32 %v4611_v44 }
0x13c3   :  { %4957 = vpow2.f32 %v4610_v47 }
0x13ca   :  { %v4952_v40 = vpop.eup %4951 }
0x13cb   :  { %1967 = vrot.lane.b32.xlu0 %v4952_v40, %s4970_s7 }
0x13ce   :  { %v4954_v43 = vpop.eup %4953 }
0x13cf   :  { %1940 = vrot.lane.b32.xlu1 %v4954_v43, %s4970_s7  ;;  %v4956_v48 = vpop.eup %4955 }
0x13d0   :  { %v1958_v20 = vadd.f32 1.0, %v4956_v48  ;;  %v4958_v23 = vpop.eup %4957 }
0x13d1   :  { %v1931_v6 = vadd.f32 1.0, %v4958_v23 }
0x13d2   :  { %4959 = vrcp.f32 %v1958_v20 }
0x13d3   :  { %4961 = vrcp.f32 %v1931_v6 }
0x13df   :  { %v4960_v49 = vpop.eup %4959 }
0x13e0   :  { %v4962_v51 = vpop.eup %4961  ;;  %v1965_v9 = vmul.f32 %v4960_v49, %v1963_v54 }
0x13e1   :  { %v1938_v13 = vmul.f32 %v4962_v51, %v1936_v8 }
0x143d   :  { %v1968_v50 = vpop.permute.xlu0 %1967 }
0x143e   :  { %v1970_v25 = vmul.f32 %v4960_v49, %v1968_v50  ;;  %v4975_v50 = vmov 0  }
0x143f   :  { %4838 = vset.pattern.permute.xlu1 %v4975_v50  ;;  %4837 = vset.pattern.permute.xlu0 %v4975_v50 }
0x1440   :  { %1972 = vrot.lane.b32.xlu0 %v1970_v25, %s4969_s23 }
0x1441   :  { %v1941_v52 = vpop.permute.xlu1 %1940 }
0x1442   :  { %v1943_v29 = vmul.f32 %v4962_v51, %v1941_v52  ;;  %v4616_v52 = vld [vmem:[%s6734_s12] ss:$0 sm:$0xff] }
0x1444   :  { %1945 = vrot.lane.b32.xlu1 %v1943_v29, %s4969_s23 }
0x14b2   :  { %v1973_v12 = vpop.permute.xlu0 %1972 }
0x14b3   :  { %v1975_v55 = vadd.f32 %v1973_v12, %v1965_v9 }
0x14b5   :  { %4963 = vtanh.f32 %v1975_v55 }
0x14b6   :  { %v1946_v56 = vpop.permute.xlu1 %1945 }
0x14b7   :  { %v1948_v57 = vadd.f32 %v1946_v56, %v1938_v13 }
0x14b9   :  { %4965 = vtanh.f32 %v1948_v57 }
0x14c2   :  { %v4964_v59 = vpop.eup %4963 }
0x14c3   :  { %1978 = vrot.lane.b32.xlu0 %v4964_v59, %s4971_s10 }
0x14c6   :  { %v4966_v60 = vpop.eup %4965 }
0x14c7   :  { %664 = vrot.lane.b32.xlu0 %v5207_v45, %s4972_s27  ;;  %1951 = vrot.lane.b32.xlu1 %v4966_v60, %s4971_s10  ;;  %v1995_v45 = vld [vmem:[%s6732_s11 + $0x18] sm:$0xff] }
0x14c8   :  { %4814 = vmatprep.subr.mxu0 %v1995_v45 }
0x14c9   :  { %4815 = vmatpush3.msra.mxu0 %v1995_v45 }
0x14cb   :  { %1107 = vrot.lane.b32.xlu0 %v5281_v7, %s4972_s27  ;;  %888 = vrot.lane.b32.xlu1 %v5245_v31, %s4972_s27 }
0x14cf   :  { %1547 = vrot.lane.b32.xlu0 %v5352_v41, %s4972_s27  ;;  %1328 = vrot.lane.b32.xlu1 %v5316_v53, %s4972_s27  ;;  %v2172_v53 = vlaneseq }
0x14d1   :  { %v5428_v63 = vand.u32 127, %v2172_v53  ;;  %v5430_v0 = vshrl.u32 %v2172_v53, 7 }
0x14d3   :  { %670 = vrot.lane.b32.xlu0 %v5204_v42, %s4972_s27  ;;  %1769 = vrot.lane.b32.xlu1 %v1762_v21, %s4972_s27  ;;  %v1994_v42 = vld [vmem:[%s6732_s11 + $0x10] sm:$0xff]  ;;  %vm2174_vm6 = vcmp.eq.s32.totalorder %v5428_v63, 3  ;;  %v5438_v15 = vsub.s32 0, %v5430_v0  ;;  %v5472_v23 = vsub.s32 1, %v5430_v0  ;;  %v6739_v12 = vsub.s32 5, %v5430_v0 }
0x14d4   :  { %4816 = vmatprep.subr.mxu0 %v1994_v42  ;;  %v2175_v5 = vsel %vm2174_vm6, 0.0, %v4974_v4  ;;  %v6737_v55 = vsub.s32 7, %v5430_v0  ;;  %v6738_v57 = vsub.s32 6, %v5430_v0  ;;  %v5499_v45 = vsub.s32 2, %v5430_v0 }
0x14d5   :  { %4817 = vmatpush3.msra.mxu0 %v1994_v42  ;;  %v2287_v6 = vrot.slane %v5444_v19, %v5438_v15  ;;  %v5502_v42 = vsub.s32 3, %v5430_v0 }
0x14d7   :  { %1542 = vrot.lane.b32.xlu0 %v5355_v46, %s4972_s27  ;;  %449 = vrot.lane.b32.xlu1 %v5168_v58, %s4972_s27  ;;  %v1993_v58 = vld [vmem:[%s6732_s11 + $0x8] sm:$0xff]  ;;  %v4973_v46 = vmov 1966171168  }
0x14d8   :  { %4821 = vmatprep.subr.mxu1 %v1993_v58  ;;  %v2178_v61 = vunpack.c.l.s4 %v4973_v46 }
0x14d9   :  { %4822 = vmatpush3.msra.mxu1 %v1993_v58 }
0x14da   :  { %v2179_v2 = vunpack.c.0.s8 %v2178_v61 }
0x14db   :  { %893 = vrot.lane.b32.xlu1 %v5242_v27, %s4972_s27  ;;  %v1992_v27 = vld [vmem:[%s6732_s11] sm:$0xff] }
0x14dc   :  { %4823 = vmatprep.subr.mxu1 %v1992_v27  ;;  %v2182_v10 = vsub.s32 %v2179_v2, %v5430_v0 }
0x14dd   :  { %4824 = vmatpush3.msra.mxu1 %v1992_v27 }
0x14de   :  { %v2183_v14 = vrot.slane %v2175_v5, %v2182_v10 }
0x14df   :  { %1764 = vrot.lane.b32.xlu1 %v1735_v26, %s4972_s27 }
0x14e0   :  { %v2191_v17 = vrot.slane %v2183_v14, %v2182_v10  ;;  %v2184_v33 = vcombine.high %v2183_v14, %v2183_v14 }
0x14e2   :  { %v2202_v21 = vrot.slane %v2191_v17, %v5438_v15  ;;  %v2198_v35 = vrot.slane %v2184_v33, %v2182_v10 }
0x14e4   :  { %v5449_v24 = vadd.f32 %v2202_v21, %v5444_v19  ;;  %v2206_v37 = vrot.slane %v2198_v35, %v5438_v15 }
0x14e6   :  { %v2212_v30 = vsel %vm2211_vm7, %v5449_v24, -inf  ;;  %v5462_v39 = vadd.f32 %v2206_v37, %v5444_v19 }
0x14e8   :  { %v2215_v40 = vsel %vm2211_vm7, %v5462_v39, -inf }
0x1503   :  { %2213 = vmax.xlane.f32.xlu1 %v2212_v30 }
0x1514   :  { %2289 = vbcast.lane.b32.xlu1 %v2287_v6, 256 }
0x1535   :  { %v1979_v31 = vpop.permute.xlu0 %1978 }
0x1536   :  { %v1981_v7 = vmul.f32 %v4960_v49, %v1979_v31  ;;  %v2294_v49 = vrot.slane %v5444_v19, %v5472_v23  ;;  %v2301_v31 = vrot.slane %v5444_v19, %v5499_v45 }
0x1538   :  { %1988 = vrot.lane.b32.xlu0 %v1981_v7, %s4972_s27  ;;  %v2308_v7 = vrot.slane %v5444_v19, %v5502_v42 }
0x1539   :  { %v665_v41 = vpop.permute.xlu0 %664  ;;  %v1952_v62 = vpop.permute.xlu1 %1951 }
0x153a   :  { %668 = vst.msk [vmem:[#allocation2] sm:$0xc] %vm667_vm3, %v665_v41  ;;  %v1954_v1 = vmul.f32 %v4962_v51, %v1952_v62  ;;  %v5518_v41 = vsub.s32 4, %v5430_v0 }
0x153c   :  { %1983 = vrot.lane.b32.xlu0 %v1954_v1, %s4972_s27  ;;  %v5522_v46 = vrot.slane %v5444_v19, %v5518_v41 }
0x153d   :  { %v1108_v3 = vpop.permute.xlu0 %1107  ;;  %v889_v11 = vpop.permute.xlu1 %888 }
0x153e   :  { %1110 = vst.msk [vmem:[#allocation2] sm:$0xc0] %vm452_vm4, %v1108_v3  ;;  %6751 = vst [vmem:[#allocation6_spill] sm:$0xff] %v5522_v46 }
0x153f   :  { %891 = vst.msk [vmem:[#allocation2] sm:$0x30] %vm673_vm5, %v889_v11 }
0x1541   :  { %v1548_v16 = vpop.permute.xlu0 %1547  ;;  %v1329_v18 = vpop.permute.xlu1 %1328 }
0x1542   :  { %1550 = vst.msk [vmem:[#allocation3] sm:$0x30] %vm673_vm5, %v1548_v16 }
0x1543   :  { %1331 = vst.msk [vmem:[#allocation3] sm:$0xc0] %vm452_vm4, %v1329_v18 }
0x1545   :  { %v671_v22 = vpop.permute.xlu0 %670  ;;  %v1770_v26 = vpop.permute.xlu1 %1769 }
0x1546   :  { %674 = vst.msk [vmem:[#allocation3 + $0x8] sm:$0x30] %vm673_vm5, %v671_v22  ;;  %v1996_v28 = vld [vmem:[#allocation2] sm:$0xff] }
0x1547   :  { %1772 = vst.msk [vmem:[#allocation3] sm:$0xc] %vm667_vm3, %v1770_v26  ;;  %4825 = vmatprep.mubr.msk.f32.mxu1 %vm60_vm0, %v1996_v28 }
0x1549   :  { %v1543_v32 = vpop.permute.xlu0 %1542  ;;  %v450_v34 = vpop.permute.xlu1 %449 }
0x154a   :  { %1545 = vst.msk [vmem:[#allocation2 + $0x8] sm:$0xc] %vm667_vm3, %v1543_v32 }
0x154b   :  { %453 = vst.msk [vmem:[#allocation3 + $0x8] sm:$0xc0] %vm452_vm4, %v450_v34 }
0x154d   :  { %v894_v36 = vpop.permute.xlu1 %893 }
0x154e   :  { %896 = vst.msk [vmem:[#allocation3 + $0x8] sm:$0xc] %vm667_vm3, %v894_v36 }
0x1551   :  { %v1765_v38 = vpop.permute.xlu1 %1764 }
0x1552   :  { %1767 = vst.msk [vmem:[#allocation2 + $0x8] sm:$0x30] %vm673_vm5, %v1765_v38  ;;  %v5583_v38 = vsub.s32 %v5428_v63, %v5430_v0 }
0x1555   :  { %v1999_v48 = vld [vmem:[#allocation3 + $0x8] sm:$0xff] }
0x155b   :  { %2216 = vmax.xlane.f32.xlu0 %v2215_v40 }
0x1571   :  { %2296 = vbcast.lane.b32.xlu0 %v2294_v49, 256 }
0x158c   :  { %v5525_v61 = vpop.xlane.xlu1 %2213 }
0x158d   :  { %vm2218_vm12 = vcmp.eq.f32.partialorder %v5449_v24, %v5525_v61 }
0x1590   :  { %v5529_v1 = vpop.permute.xlu1 %2289 }
0x15aa   :  { %v1989_v43 = vpop.permute.xlu0 %1988 }
0x15ab   :  { %1991 = vst.msk [vmem:[#allocation3] sm:$0x3] %vm446_vm2, %v1989_v43 }
0x15ae   :  { %v1984_v44 = vpop.permute.xlu0 %1983 }
0x15af   :  { %1986 = vst.msk [vmem:[#allocation2 + $0x8] sm:$0xc0] %vm452_vm4, %v1984_v44 }
0x15b2   :  { %v1998_v47 = vld [vmem:[#allocation3] sm:$0xff] }
0x15b3   :  { %4818 = vmatprep.mubr.msk.f32.mxu0 %vm60_vm0, %v1998_v47 }
0x15b4   :  { %4819 = vmatmul.mubr.msk.f32.vlgmr.msra.gmra.mxu0 %vm60_vm0, %v1999_v48 }
0x15b6   :  { %v1997_v20 = vld [vmem:[#allocation2 + $0x8] sm:$0xff] }
0x15b7   :  { %4826 = vmatmul.mubr.msk.f32.vlgmr.msra.gmra.mxu1 %vm60_vm0, %v1997_v20  ;;  %vm2262_vm0 = vcmask 33792  }
0x15e4   :  { %v5527_v62 = vpop.xlane.xlu0 %2216 }
0x15e5   :  { %vm2219_vm13 = vcmp.eq.f32.partialorder %v5462_v39, %v5527_v62 }
0x15e8   :  { %v5531_v2 = vpop.permute.xlu0 %2296 }
0x1674   :  { %v4820_v25 = vpop.f32.mrf.mxu0 }
0x1676   :  { %v2072_v54 = vpop.f32.mrf.mxu0 }
0x1677   :  { %v4827_v51 = vpop.f32.mrf.mxu1 }
0x1678   :  { %v2159_v29 = vadd.f32 %v4827_v51, %v4820_v25 }
0x1679   :  { %v2153_v9 = vpop.f32.mrf.mxu1 }
0x167a   :  { %v5483_v8 = vadd.f32 %v4616_v52, %v2159_v29  ;;  %v2154_v13 = vadd.f32 %v2153_v9, %v2072_v54 }
0x167c   :  { %v5485_v56 = vadd.f32 %v4616_v52, %v2154_v13  ;;  %v5491_v59 = vrot.slane %v5483_v8, %v6739_v12  ;;  %v5496_v60 = vrot.slane %v5483_v8, %v6737_v55  ;;  %v5515_v53 = vrot.slane %v5483_v8, %v6738_v57 }
0x167e   :  { %6749 = vst [vmem:[#allocation4_spill] sm:$0xff] %v5496_v60  ;;  %v2275_v58 = vrot.slane %v5485_v56, %v5472_v23  ;;  %v2268_v27 = vrot.slane %v5485_v56, %v5438_v15  ;;  %6750 = vst [vmem:[#allocation5_spill] sm:$0xff] %v5515_v53 }
0x1680   :  { %2277 = vbcast.lane.b32.xlu1 %v2275_v58, 256  ;;  %2270 = vbcast.lane.b32.xlu0 %v2268_v27, 256 }
0x1684   :  { %2303 = vbcast.lane.b32.xlu1 %v2301_v31, 256  ;;  %2310 = vbcast.lane.b32.xlu0 %v2308_v7, 256 }
0x1688   :  { %2317 = vbcast.lane.b32.xlu1 %v5522_v46, 256 }
0x16f2   :  { %v2278_v3 = vpop.permute.xlu1 %2277  ;;  %v2271_v4 = vpop.permute.xlu0 %2270 }
0x16f3   :  { %v2281_v5 = vadd.f32 %v2271_v4, %v5525_v61  ;;  %v2282_v10 = vadd.f32 %v2278_v3, %v5527_v62 }
0x16f5   :  { %v5536_v11 = vadd.f32 %v5531_v2, %v2281_v5  ;;  %v5539_v14 = vadd.f32 %v5529_v1, %v2281_v5  ;;  %v5544_v16 = vadd.f32 %v5529_v1, %v2282_v10  ;;  %v5547_v17 = vadd.f32 %v5531_v2, %v2282_v10 }
0x16f6   :  { %v5549_v18 = vpop.permute.xlu1 %2303  ;;  %v5559_v22 = vpop.permute.xlu0 %2310 }
0x16f7   :  { %2348 = vperm.xlu1 %4838, %v5536_v11   ;;  %2345 = vperm.xlu0 %4837, %v5539_v14   ;;  %v5554_v19 = vadd.f32 %v5549_v18, %v2281_v5  ;;  %v5557_v21 = vadd.f32 %v5549_v18, %v2282_v10  ;;  %v5564_v26 = vadd.f32 %v5559_v22, %v2282_v10 }
0x16f8   :  { %v5567_v28 = vadd.f32 %v5559_v22, %v2281_v5 }
0x16fa   :  { %v5569_v30 = vpop.permute.xlu1 %2317 }
0x16fb   :  { %2360 = vperm.xlu1 %4838, %v5544_v16   ;;  %2363 = vperm.xlu0 %4837, %v5547_v17   ;;  %v5574_v32 = vadd.f32 %v5569_v30, %v2282_v10  ;;  %v5577_v33 = vadd.f32 %v5569_v30, %v2281_v5 }
0x16ff   :  { %2351 = vperm.xlu1 %4838, %v5554_v19   ;;  %2366 = vperm.xlu0 %4837, %v5557_v21  }
0x1703   :  { %2369 = vperm.xlu0 %4837, %v5564_v26   ;;  %2354 = vperm.xlu1 %4838, %v5567_v28  }
0x1707   :  { %2372 = vperm.xlu0 %4837, %v5574_v32   ;;  %2357 = vperm.xlu1 %4838, %v5577_v33  }
0x1772   :  { %v2349_v34 = vpop.permute.xlu1 %2348  ;;  %v2346_v35 = vpop.permute.xlu0 %2345 }
0x1773   :  { %v2381_v44 = vrot.slane %v2349_v34, %v5583_v38  ;;  %v2377_v47 = vrot.slane %v2346_v35, %v5583_v38 }
0x1775   :  { %v2414_v29 = vsel %vm2260_vm8, %v2381_v44, %v2377_v47 }
0x1776   :  { %v2361_v36 = vpop.permute.xlu1 %2360  ;;  %v2364_v37 = vpop.permute.xlu0 %2363 }
0x1777   :  { %v2397_v48 = vrot.slane %v2361_v36, %v5583_v38  ;;  %v2401_v20 = vrot.slane %v2364_v37, %v5583_v38  ;;  %v2637_v36 = vrot.slane %v5485_v56, %v5502_v42  ;;  %v2630_v37 = vrot.slane %v5485_v56, %v5499_v45 }
0x1779   :  { %v2421_v54 = vsel %vm2260_vm8, %v2401_v20, %v2397_v48 }
0x177a   :  { %v2352_v40 = vpop.permute.xlu1 %2351  ;;  %v2367_v43 = vpop.permute.xlu0 %2366 }
0x177b   :  { %v2385_v50 = vrot.slane %v2352_v40, %v5583_v38  ;;  %v2405_v25 = vrot.slane %v2367_v43, %v5583_v38 }
0x177d   :  { %v2416_v31 = vsel %vm2415_vm9, %v2385_v50, %v2414_v29  ;;  %v2422_v7 = vsel %vm2415_vm9, %v2405_v25, %v2421_v54 }
0x177e   :  { %v2355_v6 = vpop.permute.xlu1 %2354  ;;  %v2370_v49 = vpop.permute.xlu0 %2369 }
0x177f   :  { %v2389_v51 = vrot.slane %v2355_v6, %v5583_v38  ;;  %v2409_v52 = vrot.slane %v2370_v49, %v5583_v38 }
0x1781   :  { %v2418_v3 = vsel %vm2417_vm10, %v2389_v51, %v2416_v31  ;;  %v2423_v4 = vsel %vm2417_vm10, %v2409_v52, %v2422_v7 }
0x1782   :  { %v2358_v9 = vpop.permute.xlu1 %2357  ;;  %v2373_v13 = vpop.permute.xlu0 %2372 }
0x1783   :  { %v2393_v58 = vrot.slane %v2358_v9, %v5583_v38  ;;  %v2413_v27 = vrot.slane %v2373_v13, %v5583_v38 }
0x1785   :  { %v2420_v5 = vsel %vm2419_vm11, %v2393_v58, %v2418_v3  ;;  %v2424_v10 = vsel %vm2419_vm11, %v2413_v27, %v2423_v4  ;;  %v2945_v58 = vrot.slane %v5485_v56, %v5518_v41 }
0x1786   :  { %v2427_v34 = vsel %vm2211_vm7, %v2420_v5, -inf  ;;  %v2430_v35 = vsel %vm2211_vm7, %v2424_v10, -inf }
0x1787   :  { %2428 = vmax.xlane.f32.xlu1 %v2427_v34  ;;  %2431 = vmax.xlane.f32.xlu0 %v2430_v35 }
0x1798   :  { %2639 = vbcast.lane.b32.xlu1 %v2637_v36, 256 }
0x179d   :  { %2632 = vbcast.lane.b32.xlu0 %v2630_v37, 256 }
0x1810   :  { %v5609_v40 = vpop.xlane.xlu1 %2428  ;;  %v5611_v43 = vpop.xlane.xlu0 %2431 }
0x1814   :  { %v2640_v44 = vpop.permute.xlu1 %2639  ;;  %v2633_v47 = vpop.permute.xlu0 %2632 }
0x1815   :  { %v2643_v48 = vadd.f32 %v2633_v47, %v5609_v40  ;;  %v2644_v20 = vadd.f32 %v2640_v44, %v5611_v43 }
0x1817   :  { %v5616_v6 = vadd.f32 %v2643_v48, %v5531_v2  ;;  %v5619_v49 = vadd.f32 %v2643_v48, %v5529_v1  ;;  %v5624_v50 = vadd.f32 %v2644_v20, %v5531_v2  ;;  %v5627_v25 = vadd.f32 %v2644_v20, %v5529_v1 }
0x1818   :  { %v5632_v51 = vadd.f32 %v2644_v20, %v5549_v18  ;;  %v5635_v52 = vadd.f32 %v2643_v48, %v5549_v18  ;;  %v5640_v29 = vadd.f32 %v2644_v20, %v5559_v22  ;;  %v5643_v54 = vadd.f32 %v2643_v48, %v5559_v22 }
0x1819   :  { %2669 = vperm.xlu0 %4837, %v5616_v6   ;;  %2666 = vperm.xlu1 %4838, %v5619_v49   ;;  %v5648_v9 = vadd.f32 %v2644_v20, %v5569_v30  ;;  %v5651_v13 = vadd.f32 %v2643_v48, %v5569_v30 }
0x181d   :  { %2684 = vperm.xlu0 %4837, %v5624_v50   ;;  %2681 = vperm.xlu1 %4838, %v5627_v25  }
0x1821   :  { %2687 = vperm.xlu0 %4837, %v5632_v51   ;;  %2672 = vperm.xlu1 %4838, %v5635_v52  }
0x1825   :  { %2690 = vperm.xlu0 %4837, %v5640_v29   ;;  %2675 = vperm.xlu1 %4838, %v5643_v54  }
0x1829   :  { %2693 = vperm.xlu0 %4837, %v5648_v9   ;;  %2678 = vperm.xlu1 %4838, %v5651_v13  }
0x182d   :  { %2947 = vbcast.lane.b32.xlu0 %v2945_v58, 256 }
0x1894   :  { %v2670_v27 = vpop.permute.xlu0 %2669  ;;  %v2667_v31 = vpop.permute.xlu1 %2666 }
0x1895   :  { %v2702_v10 = vrot.slane %v2670_v27, %v5583_v38  ;;  %v2698_v34 = vrot.slane %v2667_v31, %v5583_v38 }
0x1897   :  { %v2735_v55 = vsel %vm2260_vm8, %v2702_v10, %v2698_v34 }
0x1898   :  { %v2685_v7 = vpop.permute.xlu0 %2684  ;;  %v2682_v3 = vpop.permute.xlu1 %2681 }
0x1899   :  { %v2722_v35 = vrot.slane %v2685_v7, %v5583_v38  ;;  %v2718_v36 = vrot.slane %v2682_v3, %v5583_v38 }
0x189b   :  { %v2739_v27 = vsel %vm2260_vm8, %v2722_v35, %v2718_v36  ;;  %v2220_v36 = vsel %vm2218_vm12, %v5428_v63, 5 }
0x189c   :  { %v2688_v4 = vpop.permute.xlu0 %2687  ;;  %v2673_v5 = vpop.permute.xlu1 %2672 }
0x189d   :  { %v2726_v47 = vrot.slane %v2688_v4, %v5583_v38  ;;  %v2706_v48 = vrot.slane %v2673_v5, %v5583_v38 }
0x189f   :  { %v2740_v7 = vsel %vm2415_vm9, %v2726_v47, %v2739_v27  ;;  %v2736_v3 = vsel %vm2415_vm9, %v2706_v48, %v2735_v55  ;;  %v6752_v55 = vsub.s32 5, %v5430_v0 }
0x18a0   :  { %v2691_v37 = vpop.permute.xlu0 %2690  ;;  %v2676_v44 = vpop.permute.xlu1 %2675 }
0x18a1   :  { %v2730_v20 = vrot.slane %v2691_v37, %v5583_v38  ;;  %v2710_v58 = vrot.slane %v2676_v44, %v5583_v38 }
0x18a3   :  { %v2741_v5 = vsel %vm2417_vm10, %v2730_v20, %v2740_v7  ;;  %v2737_v37 = vsel %vm2417_vm10, %v2710_v58, %v2736_v3 }
0x18a4   :  { %v2694_v57 = vpop.permute.xlu0 %2693  ;;  %v2679_v31 = vpop.permute.xlu1 %2678 }
0x18a5   :  { %v2734_v12 = vrot.slane %v2694_v57, %v5583_v38  ;;  %v2714_v4 = vrot.slane %v2679_v31, %v5583_v38  ;;  %v2952_v57 = vrot.slane %v5485_v56, %v6752_v55 }
0x18a7   :  { %v2742_v44 = vsel %vm2419_vm11, %v2734_v12, %v2741_v5  ;;  %v2738_v10 = vsel %vm2419_vm11, %v2714_v4, %v2737_v37  ;;  %v2222_v12 = vsel %vm2211_vm7, %v2220_v36, 2147483647 }
0x18a8   :  { %v2748_v34 = vsel %vm2211_vm7, %v2742_v44, -inf  ;;  %v2745_v35 = vsel %vm2211_vm7, %v2738_v10, -inf  ;;  %v2224_v47 = vshra.s32 %v2222_v12, 16  ;;  %v2948_v20 = vpop.permute.xlu0 %2947  ;;  %v2221_v44 = vsel %vm2219_vm13, %v5428_v63, 5 }
0x18a9   :  { %2749 = vmax.xlane.f32.xlu0 %v2748_v34  ;;  %2746 = vmax.xlane.f32.xlu1 %v2745_v35  ;;  %v2237_v10 = vsel %vm2211_vm7, %v2221_v44, 2147483647  ;;  %v2223_v35 = vand.u32 65535, %v2222_v12 }
0x18aa   :  { %v2226_v48 = vcvt.s32.f32 %v2224_v47  ;;  %v2239_v34 = vshra.s32 %v2237_v10, 16 }
0x18ab   :  { %v2225_v36 = vcvt.s32.f32 %v2223_v35 }
0x18ac   :  { %v2241_v55 = vcvt.s32.f32 %v2239_v34  ;;  %v2238_v34 = vand.u32 65535, %v2237_v10 }
0x18ba   :  { %2954 = vbcast.lane.b32.xlu1 %v2952_v57, 256 }
0x18de   :  { %2227 = vmin.xlane.f32.xlu1 %v2226_v48 }
0x1932   :  { %v5684_v58 = vpop.xlane.xlu1 %2746  ;;  %v5690_v7 = vpop.xlane.xlu0 %2749 }
0x1933   :  { %v2958_v27 = vadd.f32 %v2948_v20, %v5684_v58  ;;  %v6757_v20 = vsub.s32 6, %v5430_v0 }
0x1935   :  { %v5688_v31 = vadd.f32 %v2958_v27, %v5531_v2  ;;  %v5740_v10 = vadd.f32 %v2958_v27, %v5559_v22 }
0x1936   :  { %v2955_v3 = vpop.permute.xlu1 %2954 }
0x1937   :  { %v2959_v24 = vadd.f32 %v2955_v3, %v5690_v7  ;;  %2984 = vperm.xlu0 %4837, %v5688_v31   ;;  %v3260_v3 = vrot.slane %v5485_v56, %v6757_v20 }
0x1939   :  { %v5695_v61 = vadd.f32 %v2959_v24, %v5531_v2  ;;  %v5699_v4 = vadd.f32 %v2959_v24, %v5549_v18  ;;  %v5703_v5 = vadd.f32 %v2959_v24, %v5559_v22  ;;  %v5707_v37 = vadd.f32 %v2959_v24, %v5569_v30 }
0x193a   :  { %v5732_v20 = vadd.f32 %v2959_v24, %v5529_v1  ;;  %v6761_v24 = vsub.s32 7, %v5430_v0 }
0x193b   :  { %6753 = vst [vmem:[#allocation7_spill] sm:$0xff] %v5695_v61  ;;  %2999 = vperm.xlu0 %4837, %v5695_v61   ;;  %6754 = vst [vmem:[#allocation8_spill] sm:$0xff] %v5699_v4 }
0x193c   :  { %6755 = vst [vmem:[#allocation9_spill] sm:$0xff] %v5703_v5  ;;  %6756 = vst [vmem:[#allocation10_spill] sm:$0xff] %v5707_v37 }
0x193d   :  { %6758 = vst [vmem:[#allocation11_spill] sm:$0xff] %v5732_v20 }
0x193f   :  { %3002 = vperm.xlu0 %4837, %v5699_v4  }
0x1943   :  { %3005 = vperm.xlu0 %4837, %v5703_v5  }
0x1947   :  { %3008 = vperm.xlu0 %4837, %v5707_v37  }
0x1966   :  { %2242 = vmin.xlane.f32.xlu0 %v2241_v55 }
0x1967   :  { %v2228_v57 = vpop.xlane.xlu1 %2227 }
0x1968   :  { %vm2229_vm14 = vcmp.eq.f32.partialorder %v2226_v48, %v2228_v57  ;;  %v2240_v48 = vcvt.s32.f32 %v2238_v34  ;;  %v3267_v34 = vrot.slane %v5485_v56, %v6761_v24 }
0x1969   :  { %v2230_v47 = vsel %vm2229_vm14, %v2225_v36, inf }
0x196a   :  { %2231 = vmin.xlane.f32.xlu1 %v2230_v47  ;;  %v5728_v47 = vadd.f32 %v2958_v27, %v5529_v1 }
0x197c   :  { %3262 = vbcast.lane.b32.xlu0 %v3260_v3, 256  ;;  %v5736_v3 = vadd.f32 %v2958_v27, %v5549_v18 }
0x197e   :  { %6759 = vst [vmem:[#allocation12_spill] sm:$0xff] %v5736_v3 }
0x19b2   :  { %v5717_v53 = vpop.permute.xlu0 %2984 }
0x19b6   :  { %v5719_v39 = vpop.permute.xlu0 %2999 }
0x19ba   :  { %v5721_v62 = vpop.permute.xlu0 %3002 }
0x19be   :  { %v5723_v44 = vpop.permute.xlu0 %3005 }
0x19c2   :  { %v5725_v12 = vpop.permute.xlu0 %3008 }
0x19ef   :  { %v2243_v35 = vpop.xlane.xlu0 %2242 }
0x19f0   :  { %vm2244_vm15 = vcmp.eq.f32.partialorder %v2241_v55, %v2243_v35  ;;  %v5744_v55 = vadd.f32 %v2958_v27, %v5569_v30  ;;  %v2249_v46 = vcvt.f32.s32 %v2243_v35  ;;  %v2450_v35 = vrot.slane %v5609_v40, %v5502_v42 }
0x19f1   :  { %v2245_v36 = vsel %vm2244_vm15, %v2240_v48, inf }
0x19f2   :  { %2246 = vmin.xlane.f32.xlu1 %v2245_v36  ;;  %6760 = vst [vmem:[#allocation13_spill] sm:$0xff] %v5744_v55  ;;  %v2234_v36 = vcvt.f32.s32 %v2228_v57  ;;  %vm2488_vm3 = vcmp.eq.f32.partialorder %v5567_v28, %v2450_v35  ;;  %v2466_v28 = vrot.slane %v5611_v43, %v5499_v45 }
0x19f3   :  { %v2232_v48 = vpop.xlane.xlu1 %2231 }
0x19f4   :  { %v2233_v60 = vcvt.f32.s32 %v2232_v48  ;;  %v2235_v37 = vshll.u32 %v2234_v36, 16  ;;  %vm2492_vm12 = vcmp.eq.f32.partialorder %v5557_v21, %v2466_v28 }
0x19f6   :  { %v2236_v5 = vadd.s32 %v2235_v37, %v2233_v60  ;;  %v2438_v37 = vrot.slane %v5609_v40, %v5438_v15 }
0x19f8   :  { %vm2485_vm2 = vcmp.eq.f32.partialorder %v5539_v14, %v2438_v37  ;;  %v2454_v14 = vrot.slane %v5609_v40, %v5518_v41 }
0x19fa   :  { %vm2489_vm6 = vcmp.eq.f32.partialorder %v5577_v33, %v2454_v14  ;;  %v2470_v33 = vrot.slane %v5611_v43, %v5502_v42 }
0x19fc   :  { %vm2493_vm15 = vcmp.eq.f32.partialorder %v5564_v26, %v2470_v33 }
0x1a03   :  { %2981 = vperm.xlu1 %4838, %v5728_v47  }
0x1a07   :  { %2996 = vperm.xlu1 %4838, %v5732_v20   ;;  %v2250_v20 = vshll.u32 %v2249_v46, 16 }
0x1a0b   :  { %2987 = vperm.xlu1 %4838, %v5736_v3  }
0x1a0f   :  { %2990 = vperm.xlu1 %4838, %v5740_v10  }
0x1a13   :  { %2993 = vperm.xlu1 %4838, %v5744_v55   ;;  %v2255_v55 = vrot.slane %v2236_v5, %v5583_v38  ;;  %v2442_v5 = vrot.slane %v5609_v40, %v5472_v23 }
0x1a15   :  { %vm2486_vm1 = vcmp.eq.f32.partialorder %v5536_v11, %v2442_v5  ;;  %v2458_v11 = vrot.slane %v5611_v43, %v5438_v15 }
0x1a17   :  { %3269 = vbcast.lane.b32.xlu1 %v3267_v34, 256  ;;  %vm2490_vm5 = vcmp.eq.f32.partialorder %v5544_v16, %v2458_v11  ;;  %v2474_v16 = vrot.slane %v5611_v43, %v5518_v41 }
0x1a19   :  { %vm2494_vm14 = vcmp.eq.f32.partialorder %v5574_v32, %v2474_v16 }
0x1a1b   :  { %2496 = vbcast.lane.b32.xlu1 %v5428_v63, 256 }
0x1a7b   :  { %v2247_v4 = vpop.xlane.xlu1 %2246 }
0x1a7c   :  { %v2248_v61 = vcvt.f32.s32 %v2247_v4 }
0x1a7e   :  { %v2251_v27 = vadd.s32 %v2250_v20, %v2248_v61  ;;  %v2446_v20 = vrot.slane %v5609_v40, %v5499_v45 }
0x1a7f   :  { %v5751_v3 = vpop.permute.xlu1 %2981 }
0x1a80   :  { %v2259_v0 = vrot.slane %v2251_v27, %v5583_v38  ;;  %vm2487_vm4 = vcmp.eq.f32.partialorder %v5554_v19, %v2446_v20  ;;  %v2462_v19 = vrot.slane %v5611_v43, %v5472_v23  ;;  %v3263_v43 = vpop.permute.xlu0 %3262 }
0x1a82   :  { %v2261_v56 = vsel %vm2260_vm8, %v2259_v0, %v2255_v55  ;;  %vm2491_vm13 = vcmp.eq.f32.partialorder %v5547_v17, %v2462_v19  ;;  %v3037_v19 = vrot.slane %v5719_v39, %v5583_v38 }
0x1a83   :  { %2263 = vst.msk [vmem:[%s6735_s14] sm:$0x3] %vm2262_vm0, %v2261_v56  ;;  %v5760_v63 = vpop.permute.xlu1 %2996  ;;  %v3576_v56 = vrot.slane %v5483_v8, %v5438_v15 }
0x1a87   :  { %v5762_v46 = vpop.permute.xlu1 %2987 }
0x1a88   :  { %v3021_v16 = vrot.slane %v5762_v46, %v5583_v38 }
0x1a8b   :  { %v5764_v60 = vpop.permute.xlu1 %2990 }
0x1a8f   :  { %v5766_v61 = vpop.permute.xlu1 %2993 }
0x1a93   :  { %v5768_v4 = vpop.permute.xlu1 %3269 }
0x1a97   :  { %v5774_v57 = vpop.permute.xlu1 %2496 }
0x1a98   :  { %v2499_v55 = vsel %vm2486_vm1, %v5774_v57, 5  ;;  %v2498_v24 = vsel %vm2485_vm2, %v5774_v57, 5  ;;  %v2501_v34 = vsel %vm2488_vm3, %v5774_v57, 5  ;;  %v2500_v48 = vsel %vm2487_vm4, %v5774_v57, 5 }
0x1a99   :  { %2512 = vperm.xlu1 %4838, %v2499_v55   ;;  %2509 = vperm.xlu0 %4837, %v2498_v24   ;;  %v2503_v36 = vsel %vm2490_vm5, %v5774_v57, 5  ;;  %v2502_v40 = vsel %vm2489_vm6, %v5774_v57, 5  ;;  %v2505_v27 = vsel %vm2492_vm12, %v5774_v57, 5  ;;  %v2504_v0 = vsel %vm2491_vm13, %v5774_v57, 5 }
0x1a9a   :  { %v2507_v21 = vsel %vm2494_vm14, %v5774_v57, 5  ;;  %v2506_v17 = vsel %vm2493_vm15, %v5774_v57, 5 }
0x1a9d   :  { %2518 = vperm.xlu1 %4838, %v2501_v34   ;;  %2515 = vperm.xlu0 %4837, %v2500_v48   ;;  %v3033_v34 = vrot.slane %v5760_v63, %v5583_v38 }
0x1a9f   :  { %v3054_v63 = vsel %vm2260_vm8, %v3037_v19, %v3033_v34 }
0x1aa1   :  { %2524 = vperm.xlu1 %4838, %v2503_v36   ;;  %2521 = vperm.xlu0 %4837, %v2502_v40   ;;  %v3013_v36 = vrot.slane %v5751_v3, %v5583_v38  ;;  %v3041_v3 = vrot.slane %v5721_v62, %v5583_v38 }
0x1aa5   :  { %2530 = vperm.xlu1 %4838, %v2505_v27   ;;  %2527 = vperm.xlu0 %4837, %v2504_v0   ;;  %v3017_v27 = vrot.slane %v5717_v53, %v5583_v38  ;;  %v3025_v0 = vrot.slane %v5764_v60, %v5583_v38  ;;  %v3055_v53 = vsel %vm2415_vm9, %v3041_v3, %v3054_v63 }
0x1aa7   :  { %v3050_v46 = vsel %vm2260_vm8, %v3017_v27, %v3013_v36 }
0x1aa9   :  { %2536 = vperm.xlu1 %4838, %v2507_v21   ;;  %2533 = vperm.xlu0 %4837, %v2506_v17   ;;  %v3029_v21 = vrot.slane %v5766_v61, %v5583_v38  ;;  %v3049_v61 = vrot.slane %v5725_v12, %v5583_v38 }
0x1aad   :  { %3578 = vbcast.lane.b32.xlu1 %v3576_v56, 256  ;;  %v3051_v56 = vsel %vm2415_vm9, %v3021_v16, %v3050_v46 }
0x1aae   :  { %v3052_v60 = vsel %vm2417_vm10, %v3025_v0, %v3051_v56 }
0x1b14   :  { %v2513_v5 = vpop.permute.xlu1 %2512  ;;  %v2510_v37 = vpop.permute.xlu0 %2509 }
0x1b15   :  { %v2545_v35 = vrot.slane %v2513_v5, %v5583_v38  ;;  %v2541_v20 = vrot.slane %v2510_v37, %v5583_v38  ;;  %v3045_v37 = vrot.slane %v5723_v44, %v5583_v38  ;;  %v3583_v44 = vrot.slane %v5483_v8, %v5472_v23 }
0x1b17   :  { %v2578_v24 = vsel %vm2260_vm8, %v2545_v35, %v2541_v20  ;;  %v3053_v35 = vsel %vm2419_vm11, %v3029_v21, %v3052_v60  ;;  %v3056_v62 = vsel %vm2417_vm10, %v3045_v37, %v3055_v53 }
0x1b18   :  { %v2519_v32 = vpop.permute.xlu1 %2518  ;;  %v2516_v55 = vpop.permute.xlu0 %2515  ;;  %v3060_v20 = vsel %vm2211_vm7, %v3053_v35, -inf }
0x1b19   :  { %v2549_v26 = vrot.slane %v2516_v55, %v5583_v38  ;;  %v2553_v11 = vrot.slane %v2519_v32, %v5583_v38  ;;  %v3057_v32 = vsel %vm2419_vm11, %v3049_v61, %v3056_v62 }
0x1b1a   :  { %v3063_v55 = vsel %vm2211_vm7, %v3057_v32, -inf }
0x1b1b   :  { %v2579_v14 = vsel %vm2415_vm9, %v2549_v26, %v2578_v24 }
0x1b1c   :  { %v2522_v48 = vpop.permute.xlu0 %2521  ;;  %v2580_v40 = vsel %vm2417_vm10, %v2553_v11, %v2579_v14  ;;  %v2525_v3 = vpop.permute.xlu1 %2524 }
0x1b1d   :  { %v2557_v28 = vrot.slane %v2522_v48, %v5583_v38  ;;  %v2561_v46 = vrot.slane %v2525_v3, %v5583_v38 }
0x1b1f   :  { %v2581_v33 = vsel %vm2419_vm11, %v2557_v28, %v2580_v40 }
0x1b20   :  { %v2586_v39 = vsel %vm2211_vm7, %v2581_v33, 2147483647  ;;  %v2528_v26 = vpop.permute.xlu0 %2527  ;;  %v2531_v21 = vpop.permute.xlu1 %2530 }
0x1b21   :  { %v2588_v17 = vshra.s32 %v2586_v39, 16  ;;  %v2587_v11 = vand.u32 65535, %v2586_v39  ;;  %v2569_v56 = vrot.slane %v2531_v21, %v5583_v38 }
0x1b23   :  { %v2590_v5 = vcvt.s32.f32 %v2588_v17  ;;  %v2589_v34 = vcvt.s32.f32 %v2587_v11  ;;  %v2565_v17 = vrot.slane %v2528_v26, %v5583_v38  ;;  %v2768_v26 = vrot.slane %v5684_v58, %v5502_v42 }
0x1b24   :  { %v2534_v24 = vpop.permute.xlu0 %2533  ;;  %v2537_v53 = vpop.permute.xlu1 %2536 }
0x1b25   :  { %2591 = vmin.xlane.f32.xlu0 %v2590_v5  ;;  %v2573_v37 = vrot.slane %v2534_v24, %v5583_v38  ;;  %v2577_v60 = vrot.slane %v2537_v53, %v5583_v38  ;;  %vm2806_vm3 = vcmp.eq.f32.partialorder %v5643_v54, %v2768_v26 }
0x1b26   :  { %v2816_v11 = vsel %vm2806_vm3, %v5774_v57, 5 }
0x1b29   :  { %3061 = vmax.xlane.f32.xlu0 %v3060_v20 }
0x1b2d   :  { %3064 = vmax.xlane.f32.xlu0 %v3063_v55 }
0x1b43   :  { %3585 = vbcast.lane.b32.xlu0 %v3583_v44, 256  ;;  %v2756_v44 = vrot.slane %v5684_v58, %v5438_v15 }
0x1b45   :  { %vm2803_vm2 = vcmp.eq.f32.partialorder %v5619_v49, %v2756_v44 }
0x1b46   :  { %v2813_v24 = vsel %vm2803_vm2, %v5774_v57, 5 }
0x1bae   :  { %v5856_v14 = vpop.xlane.xlu0 %2591 }
0x1baf   :  { %vm2593_vm1 = vcmp.eq.f32.partialorder %v2590_v5, %v5856_v14  ;;  %v2582_v5 = vsel %vm2260_vm8, %v2565_v17, %v2561_v46 }
0x1bb0   :  { %v2594_v12 = vsel %vm2593_vm1, %v2589_v34, inf  ;;  %v2583_v35 = vsel %vm2415_vm9, %v2569_v56, %v2582_v5  ;;  %v3898_v34 = vrot.slane %v5483_v8, %v5502_v42 }
0x1bb1   :  { %2595 = vmin.xlane.f32.xlu1 %v2594_v12  ;;  %v2584_v62 = vsel %vm2417_vm10, %v2573_v37, %v2583_v35  ;;  %v5928_v12 = vpop.permute.xlu1 %3578 }
0x1bb2   :  { %v5859_v48 = vpop.xlane.xlu0 %3061  ;;  %v2585_v61 = vsel %vm2419_vm11, %v2577_v60, %v2584_v62 }
0x1bb3   :  { %v5862_v28 = vadd.f32 %v3263_v43, %v5859_v48  ;;  %v2601_v20 = vsel %vm2211_vm7, %v2585_v61, 2147483647 }
0x1bb4   :  { %v2603_v32 = vshra.s32 %v2601_v20, 16 }
0x1bb5   :  { %v5866_v19 = vadd.f32 %v5862_v28, %v5529_v1  ;;  %v5875_v16 = vadd.f32 %v5862_v28, %v5531_v2  ;;  %v5888_v27 = vadd.f32 %v5862_v28, %v5549_v18  ;;  %v5897_v63 = vadd.f32 %v5862_v28, %v5559_v22 }
0x1bb6   :  { %v5868_v36 = vpop.xlane.xlu0 %3064  ;;  %v2605_v55 = vcvt.s32.f32 %v2603_v32 }
0x1bb7   :  { %v3274_v40 = vadd.f32 %v5768_v4, %v5868_v36 }
0x1bb9   :  { %v5879_v43 = vadd.f32 %v3274_v40, %v5529_v1  ;;  %v5883_v33 = vadd.f32 %v3274_v40, %v5531_v2  ;;  %v5892_v4 = vadd.f32 %v3274_v40, %v5549_v18  ;;  %v5901_v0 = vadd.f32 %v3274_v40, %v5559_v22 }
0x1bba   :  { %v5905_v39 = vadd.f32 %v3274_v40, %v5569_v30 }
0x1bc2   :  { %3296 = vperm.xlu1 %4838, %v5866_v19  }
0x1bc6   :  { %3299 = vperm.xlu1 %4838, %v5875_v16  }
0x1bca   :  { %3311 = vperm.xlu1 %4838, %v5879_v43  }
0x1bce   :  { %3314 = vperm.xlu1 %4838, %v5883_v33  }
0x1bd2   :  { %3302 = vperm.xlu1 %4838, %v5888_v27  }
0x1bd6   :  { %3317 = vperm.xlu1 %4838, %v5892_v4  }
0x1bda   :  { %3305 = vperm.xlu1 %4838, %v5897_v63  }
0x1bde   :  { %3320 = vperm.xlu1 %4838, %v5901_v0  }
0x1be2   :  { %3323 = vperm.xlu1 %4838, %v5905_v39  }
0x1c06   :  { %2606 = vmin.xlane.f32.xlu1 %v2605_v55 }
0x1c17   :  { %2824 = vperm.xlu1 %4838, %v2813_v24  }
0x1c1b   :  { %2833 = vperm.xlu1 %4838, %v2816_v11  }
0x1c1f   :  { %3900 = vbcast.lane.b32.xlu1 %v3898_v34, 256  ;;  %v2602_v34 = vand.u32 65535, %v2601_v20 }
0x1c3a   :  { %v2596_v40 = vpop.xlane.xlu1 %2595 }
0x1c3e   :  { %v5930_v3 = vpop.permute.xlu1 %3296 }
0x1c42   :  { %v5932_v49 = vpop.permute.xlu1 %3299 }
0x1c46   :  { %v3312_v21 = vpop.permute.xlu1 %3311 }
0x1c47   :  { %v3348_v60 = vrot.slane %v3312_v21, %v5583_v38 }
0x1c4a   :  { %v3315_v17 = vpop.permute.xlu1 %3314 }
0x1c4b   :  { %v3352_v5 = vrot.slane %v3315_v17, %v5583_v38 }
0x1c4d   :  { %v3369_v62 = vsel %vm2260_vm8, %v3352_v5, %v3348_v60  ;;  %v5950_v5 = vadd.f32 %v5862_v28, %v5569_v30  ;;  %v2780_v60 = vrot.slane %v5690_v7, %v5472_v23 }
0x1c4e   :  { %v5934_v46 = vpop.permute.xlu1 %3302 }
0x1c4f   :  { %vm2809_vm13 = vcmp.eq.f32.partialorder %v5624_v50, %v2780_v60 }
0x1c52   :  { %v3318_v56 = vpop.permute.xlu1 %3317 }
0x1c53   :  { %v3356_v37 = vrot.slane %v3318_v56, %v5583_v38  ;;  %v2604_v56 = vcvt.s32.f32 %v2602_v34 }
0x1c55   :  { %v3370_v32 = vsel %vm2415_vm9, %v3356_v37, %v3369_v62  ;;  %v2764_v37 = vrot.slane %v5684_v58, %v5499_v45  ;;  %v2598_v62 = vcvt.f32.s32 %v5856_v14 }
0x1c56   :  { %v5936_v54 = vpop.permute.xlu1 %3305 }
0x1c57   :  { %vm2805_vm6 = vcmp.eq.f32.partialorder %v5635_v52, %v2764_v37  ;;  %v2819_v52 = vsel %vm2809_vm13, %v5774_v57, 5 }
0x1c58   :  { %v2815_v28 = vsel %vm2805_vm6, %v5774_v57, 5 }
0x1c5a   :  { %v3321_v53 = vpop.permute.xlu1 %3320 }
0x1c5b   :  { %v3360_v35 = vrot.slane %v3321_v53, %v5583_v38  ;;  %v2760_v53 = vrot.slane %v5684_v58, %v5472_v23 }
0x1c5d   :  { %v3371_v26 = vsel %vm2417_vm10, %v3360_v35, %v3370_v32  ;;  %vm2804_vm5 = vcmp.eq.f32.partialorder %v5616_v6, %v2760_v53  ;;  %v2788_v35 = vrot.slane %v5690_v7, %v5502_v42  ;;  %v2597_v32 = vcvt.f32.s32 %v2596_v40 }
0x1c5e   :  { %v3324_v61 = vpop.permute.xlu1 %3323  ;;  %v2814_v20 = vsel %vm2804_vm5, %v5774_v57, 5 }
0x1c5f   :  { %v3364_v44 = vrot.slane %v3324_v61, %v5583_v38  ;;  %vm2811_vm14 = vcmp.eq.f32.partialorder %v5640_v29, %v2788_v35  ;;  %v3586_v61 = vpop.permute.xlu0 %3585 }
0x1c61   :  { %v3372_v24 = vsel %vm2419_vm11, %v3364_v44, %v3371_v26  ;;  %v2599_v44 = vshll.u32 %v2598_v62, 16  ;;  %v3332_v62 = vrot.slane %v5932_v49, %v5583_v38 }
0x1c62   :  { %v3378_v11 = vsel %vm2211_vm7, %v3372_v24, -inf }
0x1c63   :  { %3379 = vmax.xlane.f32.xlu1 %v3378_v11  ;;  %v2600_v24 = vadd.s32 %v2599_v44, %v2597_v32 }
0x1c65   :  { %v2619_v29 = vrot.slane %v2600_v24, %v5583_v38  ;;  %v3340_v24 = vrot.slane %v5936_v54, %v5583_v38 }
0x1c8f   :  { %v2607_v17 = vpop.xlane.xlu1 %2606 }
0x1c90   :  { %vm2608_vm4 = vcmp.eq.f32.partialorder %v2605_v55, %v2607_v17  ;;  %v2772_v55 = vrot.slane %v5684_v58, %v5518_v41  ;;  %v2821_v58 = vsel %vm2811_vm14, %v5774_v57, 5  ;;  %v2613_v50 = vcvt.f32.s32 %v2607_v17 }
0x1c91   :  { %v2609_v21 = vsel %vm2608_vm4, %v2604_v56, inf }
0x1c92   :  { %2610 = vmin.xlane.f32.xlu0 %v2609_v21  ;;  %vm2807_vm12 = vcmp.eq.f32.partialorder %v5651_v13, %v2772_v55  ;;  %v3891_v13 = vrot.slane %v5483_v8, %v5499_v45  ;;  %v2614_v11 = vshll.u32 %v2613_v50, 16  ;;  %v3336_v50 = vrot.slane %v5934_v46, %v5583_v38 }
0x1c93   :  { %v2817_v6 = vsel %vm2807_vm12, %v5774_v57, 5  ;;  %v2825_v40 = vpop.permute.xlu1 %2824 }
0x1ca8   :  { %3308 = vperm.xlu0 %4837, %v5950_v5  }
0x1cac   :  { %2827 = vperm.xlu0 %4837, %v2814_v20   ;;  %v2856_v20 = vrot.slane %v2825_v40, %v5583_v38 }
0x1cb0   :  { %2830 = vperm.xlu0 %4837, %v2815_v28   ;;  %v2834_v28 = vpop.permute.xlu1 %2833 }
0x1cb4   :  { %2836 = vperm.xlu0 %4837, %v2817_v6  }
0x1cb8   :  { %2842 = vperm.xlu0 %4837, %v2819_v52   ;;  %v2868_v52 = vrot.slane %v2834_v28, %v5583_v38 }
0x1cbc   :  { %2848 = vperm.xlu0 %4837, %v2821_v58  }
0x1cc0   :  { %3893 = vbcast.lane.b32.xlu0 %v3891_v13, 256 }
0x1d1b   :  { %v2611_v26 = vpop.xlane.xlu0 %2610 }
0x1d1c   :  { %v2612_v34 = vcvt.f32.s32 %v2611_v26  ;;  %v3328_v26 = vrot.slane %v5930_v3, %v5583_v38 }
0x1d1e   :  { %v2615_v56 = vadd.s32 %v2614_v11, %v2612_v34  ;;  %v3365_v49 = vsel %vm2260_vm8, %v3332_v62, %v3328_v26 }
0x1d20   :  { %v2623_v21 = vrot.slane %v2615_v56, %v5583_v38 }
0x1d22   :  { %v2624_v53 = vsel %vm2260_vm8, %v2623_v21, %v2619_v29  ;;  %v3366_v29 = vsel %vm2415_vm9, %v3336_v50, %v3365_v49 }
0x1d23   :  { %4617 = vst.msk [vmem:[%s6735_s14 + $0x2] sm:$0x3] %vm2262_vm0, %v2624_v53  ;;  %v3309_v14 = vpop.permute.xlu0 %3308  ;;  %v3367_v46 = vsel %vm2417_vm10, %v3340_v24, %v3366_v29 }
0x1d24   :  { %v3344_v34 = vrot.slane %v3309_v14, %v5583_v38 }
0x1d26   :  { %v3368_v53 = vsel %vm2419_vm11, %v3344_v34, %v3367_v46  ;;  %v2776_v34 = vrot.slane %v5690_v7, %v5438_v15  ;;  %v3083_v46 = vrot.slane %v5859_v48, %v5502_v42 }
0x1d27   :  { %v2828_v17 = vpop.permute.xlu0 %2827  ;;  %v3375_v3 = vsel %vm2211_vm7, %v3368_v53, -inf }
0x1d28   :  { %v2860_v37 = vrot.slane %v2828_v17, %v5583_v38  ;;  %vm2808_vm1 = vcmp.eq.f32.partialorder %v5627_v25, %v2776_v34  ;;  %vm3121_vm5 = vcmp.eq.f32.partialorder %v5740_v10, %v3083_v46 }
0x1d29   :  { %v2818_v49 = vsel %vm2808_vm1, %v5774_v57, 5 }
0x1d2a   :  { %v2893_v6 = vsel %vm2260_vm8, %v2860_v37, %v2856_v20  ;;  %v6015_v37 = vpop.permute.xlu1 %3900 }
0x1d2b   :  { %v2831_v55 = vpop.permute.xlu0 %2830 }
0x1d2c   :  { %v2864_v60 = vrot.slane %v2831_v55, %v5583_v38 }
0x1d2e   :  { %v2894_v35 = vsel %vm2415_vm9, %v2864_v60, %v2893_v6  ;;  %v6027_v6 = vpop.xlane.xlu1 %3379 }
0x1d2f   :  { %v2837_v58 = vpop.permute.xlu0 %2836  ;;  %v2895_v32 = vsel %vm2417_vm10, %v2868_v52, %v2894_v35  ;;  %v3590_v35 = vadd.f32 %v3586_v61, %v6027_v6 }
0x1d30   :  { %v2872_v13 = vrot.slane %v2837_v58, %v5583_v38 }
0x1d31   :  { %v6049_v61 = vadd.f32 %v3590_v35, %v5531_v2  ;;  %v6053_v62 = vadd.f32 %v3590_v35, %v5549_v18  ;;  %v6061_v50 = vadd.f32 %v3590_v35, %v5569_v30 }
0x1d32   :  { %v2896_v44 = vsel %vm2419_vm11, %v2872_v13, %v2895_v32  ;;  %v6044_v13 = vadd.f32 %v3590_v35, %v5529_v1  ;;  %v6057_v32 = vadd.f32 %v3590_v35, %v5559_v22 }
0x1d33   :  { %v2901_v11 = vsel %vm2211_vm7, %v2896_v44, 2147483647  ;;  %v6007_v40 = vpop.permute.xlu0 %2842 }
0x1d34   :  { %v2903_v56 = vshra.s32 %v2901_v11, 16  ;;  %v2902_v44 = vand.u32 65535, %v2901_v11  ;;  %v2792_v11 = vrot.slane %v5690_v7, %v5518_v41 }
0x1d36   :  { %v2905_v21 = vcvt.s32.f32 %v2903_v56  ;;  %v2904_v26 = vcvt.s32.f32 %v2902_v44  ;;  %v2784_v56 = vrot.slane %v5690_v7, %v5499_v45  ;;  %vm2812_vm3 = vcmp.eq.f32.partialorder %v5648_v9, %v2792_v11 }
0x1d37   :  { %v6009_v54 = vpop.permute.xlu0 %2848  ;;  %v2822_v25 = vsel %vm2812_vm3, %v5774_v57, 5  ;;  %v3131_v7 = vsel %vm3121_vm5, %v5774_v57, 5 }
0x1d38   :  { %2906 = vmin.xlane.f32.xlu0 %v2905_v21  ;;  %vm2810_vm2 = vcmp.eq.f32.partialorder %v5632_v51, %v2784_v56 }
0x1d39   :  { %v2820_v29 = vsel %vm2810_vm2, %v5774_v57, 5 }
0x1d3b   :  { %v6011_v17 = vpop.permute.xlu0 %3893 }
0x1d3c   :  { %3376 = vmax.xlane.f32.xlu0 %v3375_v3 }
0x1dc1   :  { %v6013_v14 = vpop.xlane.xlu0 %2906 }
0x1dc2   :  { %vm2908_vm15 = vcmp.eq.f32.partialorder %v2905_v21, %v6013_v14  ;;  %v3075_v21 = vrot.slane %v5859_v48, %v5472_v23 }
0x1dc3   :  { %v2909_v24 = vsel %vm2908_vm15, %v2904_v26, inf }
0x1dc4   :  { %vm3119_vm4 = vcmp.eq.f32.partialorder %v5688_v31, %v3075_v21 }
0x1dc5   :  { %v6017_v20 = vpop.xlane.xlu0 %3376  ;;  %v3129_v51 = vsel %vm3119_vm4, %v5774_v57, 5 }
0x1dc6   :  { %v3589_v55 = vadd.f32 %v5928_v12, %v6017_v20 }
0x1dc8   :  { %v6022_v28 = vadd.f32 %v3589_v55, %v5549_v18  ;;  %v6025_v60 = vadd.f32 %v3589_v55, %v5529_v1  ;;  %v6033_v52 = vadd.f32 %v3589_v55, %v5559_v22  ;;  %v6036_v58 = vadd.f32 %v3589_v55, %v5531_v2 }
0x1dc9   :  { %v6041_v12 = vadd.f32 %v3589_v55, %v5569_v30 }
0x1dca   :  { %3618 = vperm.xlu0 %4837, %v6022_v28   ;;  %3612 = vperm.xlu1 %4838, %v6025_v60  }
0x1dce   :  { %3621 = vperm.xlu0 %4837, %v6033_v52   ;;  %3615 = vperm.xlu1 %4838, %v6036_v58  }
0x1dd2   :  { %3624 = vperm.xlu0 %4837, %v6041_v12   ;;  %3627 = vperm.xlu1 %4838, %v6044_v13  }
0x1dd6   :  { %3630 = vperm.xlu1 %4838, %v6049_v61  }
0x1dda   :  { %3633 = vperm.xlu1 %4838, %v6053_v62  }
0x1dde   :  { %3636 = vperm.xlu1 %4838, %v6057_v32  }
0x1de2   :  { %3639 = vperm.xlu1 %4838, %v6061_v50  }
0x1e06   :  { %2910 = vmin.xlane.f32.xlu1 %v2909_v24 }
0x1e17   :  { %2839 = vperm.xlu1 %4838, %v2818_v49  }
0x1e1b   :  { %2845 = vperm.xlu1 %4838, %v2820_v29  }
0x1e1f   :  { %2851 = vperm.xlu1 %4838, %v2822_v25  }
0x1e23   :  { %3142 = vperm.xlu1 %4838, %v3129_v51  }
0x1e27   :  { %3148 = vperm.xlu1 %4838, %v3131_v7   ;;  %v2880_v7 = vrot.slane %v6007_v40, %v5583_v38 }
0x1e2b   :  { %4215 = vbcast.lane.b32.xlu1 %v5491_v59, 256 }
0x1e45   :  { %v6086_v53 = vpop.permute.xlu1 %3612 }
0x1e49   :  { %v6088_v9 = vpop.permute.xlu1 %3615 }
0x1e4d   :  { %v3628_v3 = vpop.permute.xlu1 %3627 }
0x1e4e   :  { %v3664_v24 = vrot.slane %v3628_v3, %v5583_v38 }
0x1e51   :  { %v3631_v55 = vpop.permute.xlu1 %3630 }
0x1e52   :  { %v3668_v35 = vrot.slane %v3631_v55, %v5583_v38 }
0x1e54   :  { %v3685_v34 = vsel %vm2260_vm8, %v3668_v35, %v3664_v24 }
0x1e55   :  { %v3634_v31 = vpop.permute.xlu1 %3633 }
0x1e56   :  { %v3672_v26 = vrot.slane %v3634_v31, %v5583_v38 }
0x1e58   :  { %v3686_v59 = vsel %vm2415_vm9, %v3672_v26, %v3685_v34 }
0x1e59   :  { %v3637_v44 = vpop.permute.xlu1 %3636 }
0x1e5a   :  { %v3676_v10 = vrot.slane %v3637_v44, %v5583_v38  ;;  %v2888_v44 = vrot.slane %v6009_v54, %v5583_v38 }
0x1e5c   :  { %v3687_v11 = vsel %vm2417_vm10, %v3676_v10, %v3686_v59 }
0x1e5d   :  { %v3640_v56 = vpop.permute.xlu1 %3639 }
0x1e5e   :  { %v3680_v49 = vrot.slane %v3640_v56, %v5583_v38 }
0x1e60   :  { %v3688_v29 = vsel %vm2419_vm11, %v3680_v49, %v3687_v11  ;;  %v6112_v49 = vpop.permute.xlu0 %3618 }
0x1e61   :  { %v3694_v21 = vsel %vm2211_vm7, %v3688_v29, -inf }
0x1e62   :  { %3695 = vmax.xlane.f32.xlu1 %v3694_v21 }
0x1e64   :  { %v6114_v11 = vpop.permute.xlu0 %3621 }
0x1e68   :  { %v6116_v29 = vpop.permute.xlu0 %3624 }
0x1e8f   :  { %v2911_v25 = vpop.xlane.xlu1 %2910 }
0x1e93   :  { %v2840_v46 = vpop.permute.xlu1 %2839 }
0x1e94   :  { %v2876_v51 = vrot.slane %v2840_v46, %v5583_v38 }
0x1e96   :  { %v2897_v31 = vsel %vm2260_vm8, %v2880_v7, %v2876_v51  ;;  %v3071_v7 = vrot.slane %v5859_v48, %v5438_v15 }
0x1e97   :  { %v2846_v3 = vpop.permute.xlu1 %2845 }
0x1e98   :  { %v2884_v55 = vrot.slane %v2846_v3, %v5583_v38  ;;  %vm3118_vm12 = vcmp.eq.f32.partialorder %v5728_v47, %v3071_v7  ;;  %v3079_v3 = vrot.slane %v5859_v48, %v5499_v45 }
0x1e9a   :  { %v2898_v35 = vsel %vm2415_vm9, %v2884_v55, %v2897_v31  ;;  %v3128_v55 = vsel %vm3118_vm12, %v5774_v57, 5  ;;  %v6762_v31 = vld [vmem:[#allocation12_spill] sm:$0xff] }
0x1e9b   :  { %v2852_v26 = vpop.permute.xlu1 %2851  ;;  %v2899_v10 = vsel %vm2417_vm10, %v2888_v44, %v2898_v35  ;;  %vm3120_vm13 = vcmp.eq.f32.partialorder %v6762_v31, %v3079_v3  ;;  %v3087_v35 = vrot.slane %v5859_v48, %v5518_v41  ;;  %v4206_v48 = vrot.slane %v5483_v8, %v5518_v41 }
0x1e9c   :  { %v2892_v24 = vrot.slane %v2852_v26, %v5583_v38  ;;  %v3130_v44 = vsel %vm3120_vm13, %v5774_v57, 5  ;;  %v6763_v26 = vld [vmem:[#allocation13_spill] sm:$0xff] }
0x1e9d   :  { %vm3122_vm14 = vcmp.eq.f32.partialorder %v6763_v26, %v3087_v35 }
0x1e9e   :  { %v2900_v34 = vsel %vm2419_vm11, %v2892_v24, %v2899_v10  ;;  %v3095_v24 = vrot.slane %v5868_v36, %v5472_v23  ;;  %v3132_v47 = vsel %vm3122_vm14, %v5774_v57, 5  ;;  %v6764_v10 = vld [vmem:[#allocation7_spill] sm:$0xff] }
0x1e9f   :  { %v2916_v56 = vsel %vm2211_vm7, %v2900_v34, 2147483647 }
0x1ea0   :  { %v2918_v40 = vshra.s32 %v2916_v56, 16  ;;  %v2917_v21 = vand.u32 65535, %v2916_v56  ;;  %vm3124_vm15 = vcmp.eq.f32.partialorder %v6764_v10, %v3095_v24  ;;  %v3103_v56 = vrot.slane %v5868_v36, %v5502_v42  ;;  %v3143_v24 = vpop.permute.xlu1 %3142 }
0x1ea1   :  { %v3134_v34 = vsel %vm3124_vm15, %v5774_v57, 5  ;;  %v3175_v10 = vrot.slane %v3143_v24, %v5583_v38 }
0x1ea2   :  { %v2920_v59 = vcvt.s32.f32 %v2918_v40  ;;  %v2919_v46 = vcvt.s32.f32 %v2917_v21  ;;  %v6765_v40 = vld [vmem:[#allocation9_spill] sm:$0xff]  ;;  %v2913_v21 = vcvt.f32.s32 %v6013_v14 }
0x1ea3   :  { %vm3126_vm1 = vcmp.eq.f32.partialorder %v6765_v40, %v3103_v56  ;;  %v3644_v40 = vrot.slane %v6086_v53, %v5583_v38 }
0x1ea4   :  { %2921 = vmin.xlane.f32.xlu0 %v2920_v59  ;;  %v2914_v7 = vshll.u32 %v2913_v21, 16  ;;  %v3149_v56 = vpop.permute.xlu1 %3148 }
0x1f2d   :  { %v2922_v54 = vpop.xlane.xlu0 %2921 }
0x1f2e   :  { %vm2923_vm6 = vcmp.eq.f32.partialorder %v2920_v59, %v2922_v54  ;;  %v3136_v59 = vsel %vm3126_vm1, %v5774_v57, 5 }
0x1f2f   :  { %v2924_v51 = vsel %vm2923_vm6, %v2919_v46, inf  ;;  %v2912_v46 = vcvt.f32.s32 %v2911_v25 }
0x1f30   :  { %2925 = vmin.xlane.f32.xlu0 %v2924_v51  ;;  %v2928_v51 = vcvt.f32.s32 %v2922_v54  ;;  %v3648_v54 = vrot.slane %v6088_v9, %v5583_v38  ;;  %v3652_v9 = vrot.slane %v6112_v49, %v5583_v38 }
0x1f32   :  { %v2929_v31 = vshll.u32 %v2928_v51, 16  ;;  %v3183_v51 = vrot.slane %v3149_v56, %v5583_v38 }
0x1f46   :  { %3139 = vperm.xlu0 %4837, %v3128_v55   ;;  %v2915_v55 = vadd.s32 %v2914_v7, %v2912_v46  ;;  %v3681_v46 = vsel %vm2260_vm8, %v3648_v54, %v3644_v40 }
0x1f47   :  { %v3682_v53 = vsel %vm2415_vm9, %v3652_v9, %v3681_v46 }
0x1f48   :  { %v2934_v26 = vrot.slane %v2915_v55, %v5583_v38 }
0x1f4a   :  { %3145 = vperm.xlu0 %4837, %v3130_v44  }
0x1f4e   :  { %3151 = vperm.xlu0 %4837, %v3132_v47  }
0x1f52   :  { %3157 = vperm.xlu0 %4837, %v3134_v34  }
0x1f56   :  { %4208 = vbcast.lane.b32.xlu0 %v4206_v48, 256 }
0x1f5a   :  { %3163 = vperm.xlu0 %4837, %v3136_v59  }
0x1fb9   :  { %v2926_v3 = vpop.xlane.xlu0 %2925 }
0x1fba   :  { %v2927_v35 = vcvt.f32.s32 %v2926_v3 }
0x1fbc   :  { %v2930_v44 = vadd.s32 %v2929_v31, %v2927_v35  ;;  %v3656_v35 = vrot.slane %v6114_v11, %v5583_v38 }
0x1fbe   :  { %v2938_v8 = vrot.slane %v2930_v44, %v5583_v38  ;;  %v3683_v24 = vsel %vm2417_vm10, %v3656_v35, %v3682_v53  ;;  %v3091_v35 = vrot.slane %v5868_v36, %v5438_v15 }
0x1fc0   :  { %v2939_v47 = vsel %vm2260_vm8, %v2938_v8, %v2934_v26  ;;  %v3660_v26 = vrot.slane %v6116_v29, %v5583_v38 }
0x1fc1   :  { %4618 = vst.msk [vmem:[%s6735_s14 + $0x4] sm:$0x3] %vm2262_vm0, %v2939_v47  ;;  %v3140_v14 = vpop.permute.xlu0 %3139 }
0x1fc2   :  { %v3171_v25 = vrot.slane %v3140_v14, %v5583_v38  ;;  %v3684_v47 = vsel %vm2419_vm11, %v3660_v26, %v3683_v24  ;;  %v6767_v26 = vld [vmem:[#allocation11_spill] sm:$0xff] }
0x1fc3   :  { %v3691_v14 = vsel %vm2211_vm7, %v3684_v47, -inf  ;;  %vm3123_vm3 = vcmp.eq.f32.partialorder %v6767_v26, %v3091_v35  ;;  %v6768_v47 = vld [vmem:[#allocation8_spill] sm:$0xff] }
0x1fc4   :  { %v3208_v59 = vsel %vm2260_vm8, %v3175_v10, %v3171_v25  ;;  %v6173_v25 = vpop.permute.xlu1 %4215  ;;  %v3133_v24 = vsel %vm3123_vm3, %v5774_v57, 5 }
0x1fc5   :  { %v3146_v34 = vpop.permute.xlu0 %3145 }
0x1fc6   :  { %v3179_v48 = vrot.slane %v3146_v34, %v5583_v38 }
0x1fc8   :  { %v3209_v21 = vsel %vm2415_vm9, %v3179_v48, %v3208_v59  ;;  %v6175_v54 = vpop.xlane.xlu1 %3695 }
0x1fc9   :  { %v3152_v7 = vpop.permute.xlu0 %3151  ;;  %v3210_v55 = vsel %vm2417_vm10, %v3183_v51, %v3209_v21  ;;  %v6179_v11 = vadd.f32 %v6015_v37, %v6175_v54 }
0x1fca   :  { %v3187_v3 = vrot.slane %v3152_v7, %v5583_v38 }
0x1fcb   :  { %v6183_v29 = vadd.f32 %v6179_v11, %v5531_v2  ;;  %v6188_v10 = vadd.f32 %v6179_v11, %v5549_v18  ;;  %v6193_v34 = vadd.f32 %v6179_v11, %v5559_v22  ;;  %v6218_v7 = vadd.f32 %v6179_v11, %v5529_v1 }
0x1fcc   :  { %v3211_v31 = vsel %vm2419_vm11, %v3187_v3, %v3210_v55 }
0x1fcd   :  { %v3216_v44 = vsel %vm2211_vm7, %v3211_v31, 2147483647  ;;  %v6196_v37 = vpop.permute.xlu0 %3157 }
0x1fce   :  { %v3218_v8 = vshra.s32 %v3216_v44, 16  ;;  %v3217_v55 = vand.u32 65535, %v3216_v44  ;;  %v3107_v44 = vrot.slane %v5868_v36, %v5518_v41 }
0x1fd0   :  { %v3220_v49 = vcvt.s32.f32 %v3218_v8  ;;  %v3219_v31 = vcvt.s32.f32 %v3217_v55  ;;  %v3099_v8 = vrot.slane %v5868_v36, %v5499_v45 }
0x1fd1   :  { %v6198_v56 = vpop.permute.xlu0 %4208 }
0x1fd2   :  { %3221 = vmin.xlane.f32.xlu0 %v3220_v49  ;;  %vm3125_vm4 = vcmp.eq.f32.partialorder %v6768_v47, %v3099_v8 }
0x1fd5   :  { %v6200_v48 = vpop.permute.xlu0 %3163 }
0x1fd6   :  { %3692 = vmax.xlane.f32.xlu0 %v3691_v14  ;;  %v6769_v14 = vld [vmem:[#allocation10_spill] sm:$0xff] }
0x1fd7   :  { %vm3127_vm5 = vcmp.eq.f32.partialorder %v6769_v14, %v3107_v44 }
0x1fd8   :  { %v3137_v55 = vsel %vm3127_vm5, %v5774_v57, 5 }
0x1fec   :  { %3945 = vperm.xlu0 %4837, %v6183_v29  }
0x1ff0   :  { %3948 = vperm.xlu0 %4837, %v6188_v10  }
0x1ff4   :  { %3951 = vperm.xlu0 %4837, %v6193_v34  }
0x205b   :  { %v6202_v40 = vpop.xlane.xlu0 %3221 }
0x205c   :  { %vm3223_vm2 = vcmp.eq.f32.partialorder %v3220_v49, %v6202_v40  ;;  %v3135_v49 = vsel %vm3125_vm4, %v5774_v57, 5 }
0x205d   :  { %v3224_v53 = vsel %vm3223_vm2, %v3219_v31, inf  ;;  %v3398_v31 = vrot.slane %v6017_v20, %v5502_v42 }
0x205f   :  { %v6204_v59 = vpop.xlane.xlu0 %3692  ;;  %vm3436_vm12 = vcmp.eq.f32.partialorder %v5897_v63, %v3398_v31 }
0x2060   :  { %v3904_v21 = vadd.f32 %v6011_v17, %v6204_v59  ;;  %v3446_v36 = vsel %vm3436_vm12, %v5774_v57, 5 }
0x2062   :  { %v6209_v46 = vadd.f32 %v3904_v21, %v5529_v1  ;;  %v6213_v51 = vadd.f32 %v3904_v21, %v5531_v2  ;;  %v6222_v9 = vadd.f32 %v3904_v21, %v5549_v18  ;;  %v6226_v17 = vadd.f32 %v3904_v21, %v5559_v22 }
0x2063   :  { %v6230_v3 = vadd.f32 %v3904_v21, %v5569_v30  ;;  %v3390_v21 = vrot.slane %v6017_v20, %v5472_v23 }
0x2064   :  { %3927 = vperm.xlu1 %4838, %v6209_v46  }
0x2065   :  { %6766 = vst [vmem:[#allocation12_spill] sm:$0xff] %v6230_v3  ;;  %vm3434_vm6 = vcmp.eq.f32.partialorder %v5875_v16, %v3390_v21 }
0x2067   :  { %v3946_v26 = vpop.permute.xlu0 %3945 }
0x2068   :  { %3930 = vperm.xlu1 %4838, %v6213_v51   ;;  %v3983_v14 = vrot.slane %v3946_v26, %v5583_v38 }
0x206b   :  { %v3949_v44 = vpop.permute.xlu0 %3948 }
0x206c   :  { %3942 = vperm.xlu1 %4838, %v6218_v7   ;;  %v3987_v63 = vrot.slane %v3949_v44, %v5583_v38 }
0x2070   :  { %3933 = vperm.xlu1 %4838, %v6222_v9  }
0x2074   :  { %3936 = vperm.xlu1 %4838, %v6226_v17  }
0x2078   :  { %3939 = vperm.xlu1 %4838, %v6230_v3  }
0x209c   :  { %3225 = vmin.xlane.f32.xlu1 %v3224_v53  ;;  %v3444_v53 = vsel %vm3434_vm6, %v5774_v57, 5 }
0x20ad   :  { %3154 = vperm.xlu1 %4838, %v3133_v24  }
0x20b1   :  { %3160 = vperm.xlu1 %4838, %v3135_v49  }
0x20b5   :  { %3166 = vperm.xlu1 %4838, %v3137_v55  }
0x20b9   :  { %3457 = vperm.xlu1 %4838, %v3444_v53  }
0x20bd   :  { %3463 = vperm.xlu1 %4838, %v3446_v36  }
0x20df   :  { %v3928_v35 = vpop.permute.xlu1 %3927 }
0x20e0   :  { %v3959_v24 = vrot.slane %v3928_v35, %v5583_v38 }
0x20e3   :  { %v3931_v8 = vpop.permute.xlu1 %3930 }
0x20e4   :  { %v3963_v47 = vrot.slane %v3931_v8, %v5583_v38 }
0x20e6   :  { %v3996_v16 = vsel %vm2260_vm8, %v3963_v47, %v3959_v24 }
0x20e7   :  { %v3943_v49 = vpop.permute.xlu1 %3942 }
0x20e8   :  { %v3979_v21 = vrot.slane %v3943_v49, %v5583_v38 }
0x20ea   :  { %v4000_v55 = vsel %vm2260_vm8, %v3983_v14, %v3979_v21  ;;  %v3228_v14 = vcvt.f32.s32 %v6202_v40  ;;  %v3203_v40 = vrot.slane %v6200_v48, %v5583_v38  ;;  %v3386_v48 = vrot.slane %v6017_v20, %v5438_v15 }
0x20eb   :  { %v3934_v31 = vpop.permute.xlu1 %3933  ;;  %v6262_v53 = vsel %vm2415_vm9, %v3987_v63, %v4000_v55 }
0x20ec   :  { %v3967_v36 = vrot.slane %v3934_v31, %v5583_v38  ;;  %v3229_v63 = vshll.u32 %v3228_v14, 16  ;;  %vm3433_vm14 = vcmp.eq.f32.partialorder %v5866_v19, %v3386_v48  ;;  %v3410_v19 = vrot.slane %v6027_v6, %v5472_v23 }
0x20ee   :  { %v3997_v35 = vsel %vm2415_vm9, %v3967_v36, %v3996_v16  ;;  %v3195_v36 = vrot.slane %v6196_v37, %v5583_v38  ;;  %vm3439_vm2 = vcmp.eq.f32.partialorder %v5883_v33, %v3410_v19 }
0x20ef   :  { %v3937_v8 = vpop.permute.xlu1 %3936 }
0x20f0   :  { %v3971_v24 = vrot.slane %v3937_v8, %v5583_v38 }
0x20f2   :  { %v3998_v47 = vsel %vm2417_vm10, %v3971_v24, %v3997_v35 }
0x20f3   :  { %v3940_v26 = vpop.permute.xlu1 %3939 }
0x20f4   :  { %v3975_v49 = vrot.slane %v3940_v26, %v5583_v38 }
0x20f6   :  { %v6270_v44 = vsel %vm2419_vm11, %v3975_v49, %v3998_v47 }
0x2125   :  { %v3226_v21 = vpop.xlane.xlu1 %3225 }
0x2126   :  { %v3227_v55 = vcvt.f32.s32 %v3226_v21 }
0x2128   :  { %v3230_v3 = vadd.s32 %v3229_v63, %v3227_v55 }
0x2129   :  { %v3155_v31 = vpop.permute.xlu1 %3154 }
0x212a   :  { %v3191_v16 = vrot.slane %v3155_v31, %v5583_v38  ;;  %v3952_v31 = vpop.permute.xlu0 %3951 }
0x212b   :  { %v3991_v48 = vrot.slane %v3952_v31, %v5583_v38 }
0x212c   :  { %v3212_v24 = vsel %vm2260_vm8, %v3195_v36, %v3191_v16 }
0x212d   :  { %v3161_v8 = vpop.permute.xlu1 %3160 }
0x212e   :  { %v3199_v35 = vrot.slane %v3161_v8, %v5583_v38 }
0x2130   :  { %v3213_v47 = vsel %vm2415_vm9, %v3199_v35, %v3212_v24  ;;  %v3443_v24 = vsel %vm3433_vm14, %v5774_v57, 5 }
0x2131   :  { %v3167_v26 = vpop.permute.xlu1 %3166  ;;  %v3214_v14 = vsel %vm2417_vm10, %v3203_v40, %v3213_v47  ;;  %v3394_v47 = vrot.slane %v6017_v20, %v5499_v45  ;;  %v6293_v40 = vadd.f32 %v6179_v11, %v5569_v30  ;;  %v3418_v11 = vrot.slane %v6027_v6, %v5502_v42 }
0x2132   :  { %v3207_v49 = vrot.slane %v3167_v26, %v5583_v38  ;;  %v3402_v26 = vrot.slane %v6017_v20, %v5518_v41 }
0x2133   :  { %vm3435_vm15 = vcmp.eq.f32.partialorder %v5888_v27, %v3394_v47  ;;  %v3449_v27 = vsel %vm3439_vm2, %v5774_v57, 5  ;;  %vm3441_vm3 = vcmp.eq.f32.partialorder %v5901_v0, %v3418_v11 }
0x2134   :  { %v3215_v21 = vsel %vm2419_vm11, %v3207_v49, %v3214_v14  ;;  %v3445_v49 = vsel %vm3435_vm15, %v5774_v57, 5  ;;  %vm3437_vm1 = vcmp.eq.f32.partialorder %v5950_v5, %v3402_v26  ;;  %v3451_v20 = vsel %vm3441_vm3, %v5774_v57, 5 }
0x2135   :  { %v3231_v63 = vsel %vm2211_vm7, %v3215_v21, 2147483647  ;;  %v3447_v14 = vsel %vm3437_vm1, %v5774_v57, 5 }
0x2136   :  { %v3233_v37 = vshra.s32 %v3231_v63, 16  ;;  %v3232_v8 = vand.u32 65535, %v3231_v63 }
0x2138   :  { %v3235_v55 = vcvt.s32.f32 %v3233_v37  ;;  %v3234_v36 = vcvt.s32.f32 %v3232_v8  ;;  %v3249_v8 = vrot.slane %v3230_v3, %v5583_v38  ;;  %v4002_v3 = vsel %vm2417_vm10, %v3991_v48, %v6262_v53 }
0x213a   :  { %3236 = vmin.xlane.f32.xlu0 %v3235_v55 }
0x21c3   :  { %v3237_v16 = vpop.xlane.xlu0 %3236 }
0x21c4   :  { %vm3238_vm13 = vcmp.eq.f32.partialorder %v3235_v55, %v3237_v16  ;;  %v3243_v5 = vcvt.f32.s32 %v3237_v16 }
0x21c5   :  { %v3239_v35 = vsel %vm3238_vm13, %v3234_v36, inf }
0x21c6   :  { %3240 = vmin.xlane.f32.xlu0 %v3239_v35  ;;  %v3244_v63 = vshll.u32 %v3243_v5, 16  ;;  %v3458_v35 = vpop.permute.xlu1 %3457 }
0x21ca   :  { %v3464_v11 = vpop.permute.xlu1 %3463 }
0x21cb   :  { %v3498_v5 = vrot.slane %v3464_v11, %v5583_v38 }
0x21dc   :  { %3454 = vperm.xlu0 %4837, %v3443_v24  }
0x21e0   :  { %3954 = vperm.xlu0 %4837, %v6293_v40  }
0x21e4   :  { %3460 = vperm.xlu0 %4837, %v3445_v49   ;;  %v3490_v49 = vrot.slane %v3458_v35, %v5583_v38 }
0x21e8   :  { %3466 = vperm.xlu0 %4837, %v3447_v14  }
0x21ec   :  { %3472 = vperm.xlu0 %4837, %v3449_v27  }
0x21f0   :  { %3478 = vperm.xlu0 %4837, %v3451_v20  }
0x224f   :  { %v3241_v21 = vpop.xlane.xlu0 %3240 }
0x2250   :  { %v3242_v37 = vcvt.f32.s32 %v3241_v21 }
0x2252   :  { %v3245_v55 = vadd.s32 %v3244_v63, %v3242_v37 }
0x2254   :  { %v3253_v33 = vrot.slane %v3245_v55, %v5583_v38 }
0x2256   :  { %v3254_v36 = vsel %vm2260_vm8, %v3253_v33, %v3249_v8 }
0x2257   :  { %4619 = vst.msk [vmem:[%s6735_s14 + $0x6] sm:$0x3] %vm2262_vm0, %v3254_v36  ;;  %v3455_v0 = vpop.permute.xlu0 %3454  ;;  %v4006_v36 = vsel %vm2211_vm7, %v6270_v44, -inf }
0x2258   :  { %v3486_v47 = vrot.slane %v3455_v0, %v5583_v38 }
0x225a   :  { %v3523_v31 = vsel %vm2260_vm8, %v3490_v49, %v3486_v47 }
0x225b   :  { %v3955_v16 = vpop.permute.xlu0 %3954 }
0x225c   :  { %v3995_v24 = vrot.slane %v3955_v16, %v5583_v38 }
0x225e   :  { %v4003_v26 = vsel %vm2419_vm11, %v3995_v24, %v4002_v3 }
0x225f   :  { %v3461_v19 = vpop.permute.xlu0 %3460  ;;  %v4009_v14 = vsel %vm2211_vm7, %v4003_v26, -inf }
0x2260   :  { %v3494_v27 = vrot.slane %v3461_v19, %v5583_v38  ;;  %4010 = vmax.xlane.f32.xlu1 %v4009_v14 }
0x2262   :  { %v3524_v20 = vsel %vm2415_vm9, %v3494_v27, %v3523_v31 }
0x2263   :  { %v3467_v21 = vpop.permute.xlu0 %3466  ;;  %v3525_v63 = vsel %vm2417_vm10, %v3498_v5, %v3524_v20  ;;  %v3422_v5 = vrot.slane %v6027_v6, %v5518_v41 }
0x2264   :  { %v3502_v53 = vrot.slane %v3467_v21, %v5583_v38 }
0x2265   :  { %vm3442_vm12 = vcmp.eq.f32.partialorder %v5905_v39, %v3422_v5 }
0x2266   :  { %v3526_v37 = vsel %vm2419_vm11, %v3502_v53, %v3525_v63  ;;  %v3706_v53 = vrot.slane %v6204_v59, %v5472_v23  ;;  %v3722_v63 = vrot.slane %v6175_v54, %v5438_v15 }
0x2267   :  { %v3531_v55 = vsel %vm2211_vm7, %v3526_v37, 2147483647  ;;  %v6341_v48 = vpop.permute.xlu0 %3472 }
0x2268   :  { %v3533_v8 = vshra.s32 %v3531_v55, 16  ;;  %v3532_v27 = vand.u32 65535, %v3531_v55  ;;  %vm3750_vm13 = vcmp.eq.f32.partialorder %v6036_v58, %v3706_v53  ;;  %vm3754_vm14 = vcmp.eq.f32.partialorder %v6044_v13, %v3722_v63 }
0x2269   :  { %v3764_v39 = vsel %vm3754_vm14, %v5774_v57, 5 }
0x226a   :  { %v3535_v33 = vcvt.s32.f32 %v3533_v8  ;;  %v3730_v8 = vrot.slane %v6175_v54, %v5499_v45 }
0x226b   :  { %v6352_v44 = vpop.permute.xlu0 %3478 }
0x226c   :  { %3536 = vmin.xlane.f32.xlu0 %v3535_v33  ;;  %vm3756_vm3 = vcmp.eq.f32.partialorder %v6053_v62, %v3730_v8  ;;  %v3510_v8 = vrot.slane %v6341_v48, %v5583_v38 }
0x2270   :  { %4007 = vmax.xlane.f32.xlu0 %v4006_v36 }
0x22e9   :  { %v6335_v0 = vpop.xlane.xlu1 %4010 }
0x22ea   :  { %v6339_v35 = vadd.f32 %v6173_v25, %v6335_v0  ;;  %v4041_v55 = vrot.slane %v6335_v0, %v5472_v23 }
0x22ec   :  { %v6345_v16 = vadd.f32 %v6339_v35, %v5531_v2  ;;  %v6350_v24 = vadd.f32 %v6339_v35, %v5549_v18  ;;  %v6357_v25 = vadd.f32 %v6339_v35, %v5559_v22  ;;  %v6376_v14 = vadd.f32 %v6339_v35, %v5529_v1 }
0x22ed   :  { %vm4070_vm2 = vcmp.eq.f32.partialorder %v6183_v29, %v4041_v55 }
0x22ee   :  { %4260 = vperm.xlu0 %4837, %v6345_v16  }
0x22f2   :  { %4263 = vperm.xlu0 %4837, %v6350_v24  }
0x22f5   :  { %v6359_v47 = vpop.xlane.xlu0 %3536 }
0x22f6   :  { %4266 = vperm.xlu0 %4837, %v6357_v25   ;;  %vm3538_vm4 = vcmp.eq.f32.partialorder %v3535_v33, %v6359_v47  ;;  %v4045_v33 = vrot.slane %v6335_v0, %v5499_v45 }
0x22f9   :  { %v6362_v3 = vpop.xlane.xlu0 %4007 }
0x22fa   :  { %v4219_v26 = vadd.f32 %v6198_v56, %v6362_v3  ;;  %v4021_v37 = vrot.slane %v6362_v3, %v5472_v23 }
0x22fc   :  { %v6367_v49 = vadd.f32 %v4219_v26, %v5529_v1  ;;  %v6371_v19 = vadd.f32 %v4219_v26, %v5531_v2  ;;  %v6380_v11 = vadd.f32 %v4219_v26, %v5549_v18  ;;  %v6384_v56 = vadd.f32 %v4219_v26, %v5559_v22 }
0x22fd   :  { %v6388_v2 = vadd.f32 %v4219_v26, %v5569_v30  ;;  %v3534_v1 = vcvt.s32.f32 %v3532_v27  ;;  %v3406_v18 = vrot.slane %v6027_v6, %v5438_v15  ;;  %v3414_v22 = vrot.slane %v6027_v6, %v5499_v45 }
0x22fe   :  { %4242 = vperm.xlu1 %4838, %v6367_v49   ;;  %v3726_v6 = vrot.slane %v6175_v54, %v5472_v23  ;;  %vm4065_vm1 = vcmp.eq.f32.partialorder %v6213_v51, %v4021_v37  ;;  %v3766_v51 = vsel %vm3756_vm3, %v5774_v57, 5 }
0x22ff   :  { %v3539_v31 = vsel %vm3538_vm4, %v3534_v1, inf  ;;  %vm3438_vm5 = vcmp.eq.f32.partialorder %v5879_v43, %v3406_v18  ;;  %vm3440_vm6 = vcmp.eq.f32.partialorder %v5892_v4, %v3414_v22  ;;  %v3452_v43 = vsel %vm3442_vm12, %v5774_v57, 5 }
0x2300   :  { %v3448_v20 = vsel %vm3438_vm5, %v5774_v57, 5  ;;  %v3450_v21 = vsel %vm3440_vm6, %v5774_v57, 5  ;;  %v3760_v4 = vsel %vm3750_vm13, %v5774_v57, 5  ;;  %vm3755_vm15 = vcmp.eq.f32.partialorder %v6049_v61, %v3726_v6 }
0x2301   :  { %v3765_v58 = vsel %vm3755_vm15, %v5774_v57, 5  ;;  %v4075_v13 = vsel %vm4065_vm1, %v5774_v57, 5  ;;  %v4080_v61 = vsel %vm4070_vm2, %v5774_v57, 5  ;;  %vm4071_vm4 = vcmp.eq.f32.partialorder %v6188_v10, %v4045_v33 }
0x2302   :  { %4245 = vperm.xlu1 %4838, %v6371_v19   ;;  %v4081_v36 = vsel %vm4071_vm4, %v5774_v57, 5 }
0x2306   :  { %4257 = vperm.xlu1 %4838, %v6376_v14  }
0x230a   :  { %4248 = vperm.xlu1 %4838, %v6380_v11  }
0x230e   :  { %4251 = vperm.xlu1 %4838, %v6384_v56  }
0x2312   :  { %4254 = vperm.xlu1 %4838, %v6388_v2  }
0x2336   :  { %3540 = vmin.xlane.f32.xlu1 %v3539_v31 }
0x2347   :  { %3469 = vperm.xlu1 %4838, %v3448_v20  }
0x234b   :  { %3475 = vperm.xlu1 %4838, %v3450_v21  }
0x234f   :  { %3481 = vperm.xlu1 %4838, %v3452_v43  }
0x2353   :  { %3773 = vperm.xlu1 %4838, %v3760_v4   ;;  %v3543_v4 = vcvt.f32.s32 %v6359_v47  ;;  %v3518_v47 = vrot.slane %v6352_v44, %v5583_v38 }
0x2357   :  { %3785 = vperm.xlu1 %4838, %v3764_v39   ;;  %v3544_v39 = vshll.u32 %v3543_v4, 16 }
0x235b   :  { %3788 = vperm.xlu1 %4838, %v3765_v58  }
0x235f   :  { %4088 = vperm.xlu1 %4838, %v4075_v13  }
0x2363   :  { %4103 = vperm.xlu1 %4838, %v4080_v61  }
0x2367   :  { %3791 = vperm.xlu1 %4838, %v3766_v51  }
0x236b   :  { %4106 = vperm.xlu1 %4838, %v4081_v36  }
0x2379   :  { %v4243_v29 = vpop.permute.xlu1 %4242 }
0x237a   :  { %v4274_v27 = vrot.slane %v4243_v29, %v5583_v38 }
0x237d   :  { %v4246_v26 = vpop.permute.xlu1 %4245 }
0x237e   :  { %v4278_v1 = vrot.slane %v4246_v26, %v5583_v38 }
0x2380   :  { %v4311_v31 = vsel %vm2260_vm8, %v4278_v1, %v4274_v27 }
0x2381   :  { %v4258_v62 = vpop.permute.xlu1 %4257 }
0x2385   :  { %v4249_v18 = vpop.permute.xlu1 %4248 }
0x2386   :  { %v4282_v22 = vrot.slane %v4249_v18, %v5583_v38 }
0x2388   :  { %v4312_v20 = vsel %vm2415_vm9, %v4282_v22, %v4311_v31  ;;  %v6460_v22 = vadd.f32 %v6339_v35, %v5569_v30 }
0x2389   :  { %v4252_v5 = vpop.permute.xlu1 %4251 }
0x238a   :  { %v4286_v10 = vrot.slane %v4252_v5, %v5583_v38 }
0x238c   :  { %v4313_v21 = vsel %vm2417_vm10, %v4286_v10, %v4312_v20  ;;  %v4261_v20 = vpop.permute.xlu0 %4260 }
0x238d   :  { %v4255_v53 = vpop.permute.xlu1 %4254  ;;  %v4298_v4 = vrot.slane %v4261_v20, %v5583_v38  ;;  %v3718_v20 = vrot.slane %v6204_v59, %v5518_v41 }
0x238e   :  { %v4290_v43 = vrot.slane %v4255_v53, %v5583_v38 }
0x2390   :  { %v6441_v63 = vsel %vm2419_vm11, %v4290_v43, %v4313_v21  ;;  %v4264_v44 = vpop.permute.xlu0 %4263  ;;  %v4294_v21 = vrot.slane %v4258_v62, %v5583_v38 }
0x2391   :  { %v4302_v35 = vrot.slane %v4264_v44, %v5583_v38  ;;  %v4033_v44 = vrot.slane %v6362_v3, %v5518_v41 }
0x2392   :  { %v4315_v30 = vsel %vm2260_vm8, %v4298_v4, %v4294_v21 }
0x2394   :  { %v4267_v5 = vpop.permute.xlu0 %4266 }
0x23bf   :  { %v3541_v6 = vpop.xlane.xlu1 %3540 }
0x23c0   :  { %v3542_v37 = vcvt.f32.s32 %v3541_v6 }
0x23c2   :  { %v6444_v58 = vadd.s32 %v3544_v39, %v3542_v37  ;;  %v4316_v39 = vsel %vm2415_vm9, %v4302_v35, %v4315_v30  ;;  %v4306_v37 = vrot.slane %v4267_v5, %v5583_v38  ;;  %v6770_v5 = vld [vmem:[#allocation12_spill] sm:$0xff] }
0x23c3   :  { %v3470_v55 = vpop.permute.xlu1 %3469 }
0x23c4   :  { %v3506_v13 = vrot.slane %v3470_v55, %v5583_v38 }
0x23c6   :  { %v3527_v51 = vsel %vm2260_vm8, %v3510_v8, %v3506_v13  ;;  %v4317_v13 = vsel %vm2417_vm10, %v4306_v37, %v4316_v39 }
0x23c7   :  { %v3476_v61 = vpop.permute.xlu1 %3475 }
0x23c8   :  { %v3514_v33 = vrot.slane %v3476_v61, %v5583_v38 }
0x23ca   :  { %v3528_v36 = vsel %vm2415_vm9, %v3514_v33, %v3527_v51  ;;  %v3702_v33 = vrot.slane %v6204_v59, %v5438_v15  ;;  %v3734_v51 = vrot.slane %v6175_v54, %v5502_v42 }
0x23cb   :  { %v3482_v29 = vpop.permute.xlu1 %3481  ;;  %v3529_v27 = vsel %vm2417_vm10, %v3518_v47, %v3528_v36  ;;  %v4049_v47 = vrot.slane %v6335_v0, %v5502_v42 }
0x23cc   :  { %v3522_v26 = vrot.slane %v3482_v29, %v5583_v38  ;;  %vm3749_vm6 = vcmp.eq.f32.partialorder %v6025_v60, %v3702_v33  ;;  %vm3757_vm12 = vcmp.eq.f32.partialorder %v6057_v32, %v3734_v51 }
0x23cd   :  { %v3759_v36 = vsel %vm3749_vm6, %v5774_v57, 5  ;;  %v3767_v29 = vsel %vm3757_vm12, %v5774_v57, 5  ;;  %vm4072_vm13 = vcmp.eq.f32.partialorder %v6193_v34, %v4049_v47  ;;  %v4321_v34 = vsel %vm2211_vm7, %v6441_v63, -inf }
0x23ce   :  { %v3530_v1 = vsel %vm2419_vm11, %v3522_v26, %v3529_v27  ;;  %v3738_v26 = vrot.slane %v6175_v54, %v5518_v41  ;;  %v4082_v60 = vsel %vm4072_vm13, %v5774_v57, 5  ;;  %v4053_v27 = vrot.slane %v6335_v0, %v5518_v41 }
0x23cf   :  { %v3546_v31 = vsel %vm2211_vm7, %v3530_v1, 2147483647  ;;  %v4017_v54 = vrot.slane %v6362_v3, %v5438_v15  ;;  %v4025_v63 = vrot.slane %v6362_v3, %v5499_v45  ;;  %vm3753_vm12 = vcmp.eq.f32.partialorder %v6041_v12, %v3718_v20  ;;  %v6539_v30 = vpop.permute.xlu1 %3773 }
0x23d0   :  { %v3548_v48 = vshra.s32 %v3546_v31, 16  ;;  %v3547_v10 = vand.u32 65535, %v3546_v31  ;;  %vm3758_vm14 = vcmp.eq.f32.partialorder %v6061_v50, %v3738_v26  ;;  %vm4073_vm15 = vcmp.eq.f32.partialorder %v6293_v40, %v4053_v27 }
0x23d1   :  { %v3768_v32 = vsel %vm3758_vm14, %v5774_v57, 5  ;;  %v4083_v1 = vsel %vm4073_vm15, %v5774_v57, 5  ;;  %vm4064_vm1 = vcmp.eq.f32.partialorder %v6209_v46, %v4017_v54  ;;  %v4037_v50 = vrot.slane %v6335_v0, %v5438_v15 }
0x23d2   :  { %v3550_v18 = vcvt.s32.f32 %v3548_v48  ;;  %v3549_v43 = vcvt.s32.f32 %v3547_v10  ;;  %v4074_v31 = vsel %vm4064_vm1, %v5774_v57, 5  ;;  %v3710_v40 = vrot.slane %v6204_v59, %v5499_v45 }
0x23d3   :  { %vm4069_vm2 = vcmp.eq.f32.partialorder %v6218_v7, %v4037_v50  ;;  %vm4066_vm4 = vcmp.eq.f32.partialorder %v6222_v9, %v4025_v63  ;;  %v3714_v0 = vrot.slane %v6204_v59, %v5502_v42  ;;  %vm4068_vm13 = vcmp.eq.f32.partialorder %v6770_v5, %v4033_v44  ;;  %v6541_v35 = vpop.permute.xlu1 %3785 }
0x23d4   :  { %3551 = vmin.xlane.f32.xlu0 %v3550_v18  ;;  %v4079_v48 = vsel %vm4069_vm2, %v5774_v57, 5  ;;  %vm3751_vm3 = vcmp.eq.f32.partialorder %v6022_v28, %v3710_v40  ;;  %v4076_v7 = vsel %vm4066_vm4, %v5774_v57, 5  ;;  %v4078_v10 = vsel %vm4068_vm13, %v5774_v57, 5 }
0x23d5   :  { %v3761_v46 = vsel %vm3751_vm3, %v5774_v57, 5  ;;  %v3564_v12 = vrot.slane %v6444_v58, %v5583_v38 }
0x23ea   :  { %4269 = vperm.xlu0 %4837, %v6460_v22  }
0x245d   :  { %v6464_v53 = vpop.xlane.xlu0 %3551 }
0x245e   :  { %vm3553_vm5 = vcmp.eq.f32.partialorder %v3550_v18, %v6464_v53  ;;  %v4029_v18 = vrot.slane %v6362_v3, %v5502_v42 }
0x245f   :  { %v3554_v6 = vsel %vm3553_vm5, %v3549_v43, inf  ;;  %vm3752_vm5 = vcmp.eq.f32.partialorder %v6033_v52, %v3714_v0  ;;  %v3763_v52 = vsel %vm3753_vm12, %v5774_v57, 5  ;;  %v3822_v0 = vrot.slane %v6541_v35, %v5583_v38 }
0x2460   :  { %3555 = vmin.xlane.f32.xlu0 %v3554_v6  ;;  %v3762_v28 = vsel %vm3752_vm5, %v5774_v57, 5  ;;  %vm4067_vm6 = vcmp.eq.f32.partialorder %v6226_v17, %v4029_v18  ;;  %v3558_v17 = vcvt.f32.s32 %v6464_v53  ;;  %v6543_v53 = vpop.permute.xlu1 %3788 }
0x2461   :  { %v4077_v9 = vsel %vm4067_vm6, %v5774_v57, 5  ;;  %v3826_v44 = vrot.slane %v6543_v53, %v5583_v38 }
0x2462   :  { %v3559_v59 = vshll.u32 %v3558_v17, 16 }
0x2463   :  { %v3843_v53 = vsel %vm2260_vm8, %v3826_v44, %v3822_v0 }
0x2464   :  { %v6545_v39 = vpop.permute.xlu1 %4088 }
0x2465   :  { %v4270_v55 = vpop.permute.xlu0 %4269 }
0x2466   :  { %v4310_v62 = vrot.slane %v4270_v55, %v5583_v38 }
0x2468   :  { %v4318_v8 = vsel %vm2419_vm11, %v4310_v62, %v4317_v13  ;;  %v6547_v37 = vpop.permute.xlu1 %4103 }
0x2469   :  { %v4324_v61 = vsel %vm2211_vm7, %v4318_v8, -inf }
0x246a   :  { %4325 = vmax.xlane.f32.xlu1 %v4324_v61 }
0x246c   :  { %v6549_v58 = vpop.permute.xlu1 %3791 }
0x246d   :  { %v3830_v17 = vrot.slane %v6549_v58, %v5583_v38 }
0x246f   :  { %v3844_v58 = vsel %vm2415_vm9, %v3830_v17, %v3843_v53  ;;  %v6773_v53 = vld [vmem:[#allocation5_spill] sm:$0xff] }
0x2470   :  { %v6551_v55 = vpop.permute.xlu1 %4106 }
0x2476   :  { %3770 = vperm.xlu0 %4837, %v3759_v36  }
0x247b   :  { %3794 = vperm.xlu1 %4838, %v3767_v29  }
0x247f   :  { %4109 = vperm.xlu1 %4838, %v4082_v60  }
0x2483   :  { %3797 = vperm.xlu1 %4838, %v3768_v32  }
0x2487   :  { %4112 = vperm.xlu1 %4838, %v4083_v1  }
0x2495   :  { %4322 = vmax.xlane.f32.xlu0 %v4321_v34 }
0x24ab   :  { %4085 = vperm.xlu0 %4837, %v4074_v31  }
0x24af   :  { %4100 = vperm.xlu0 %4837, %v4079_v48  }
0x24b3   :  { %3776 = vperm.xlu0 %4837, %v3761_v46  }
0x24b7   :  { %4091 = vperm.xlu0 %4837, %v4076_v7   ;;  %v4141_v7 = vrot.slane %v6547_v37, %v5583_v38 }
0x24bb   :  { %3779 = vperm.xlu0 %4837, %v3762_v28  }
0x24bf   :  { %4094 = vperm.xlu0 %4837, %v4077_v9  }
0x24c3   :  { %3782 = vperm.xlu0 %4837, %v3763_v52   ;;  %v4121_v52 = vrot.slane %v6545_v39, %v5583_v38 }
0x24c7   :  { %4097 = vperm.xlu0 %4837, %v4078_v10  }
0x24e9   :  { %v3556_v21 = vpop.xlane.xlu0 %3555 }
0x24ea   :  { %v3557_v43 = vcvt.f32.s32 %v3556_v21 }
0x24ec   :  { %v3560_v4 = vadd.s32 %v3559_v59, %v3557_v43 }
0x24ee   :  { %v3568_v6 = vrot.slane %v3560_v4, %v5583_v38  ;;  %v4145_v4 = vrot.slane %v6551_v55, %v5583_v38 }
0x24f0   :  { %v3569_v3 = vsel %vm2260_vm8, %v3568_v6, %v3564_v12 }
0x24f1   :  { %4620 = vst.msk [vmem:[%s6735_s14 + $0x8] sm:$0x3] %vm2262_vm0, %v3569_v3  ;;  %v3771_v62 = vpop.permute.xlu0 %3770 }
0x24f2   :  { %v3802_v48 = vrot.slane %v3771_v62, %v5583_v38 }
0x24f3   :  { %v6553_v13 = vpop.xlane.xlu1 %4325 }
0x24f4   :  { %v4356_v51 = vrot.slane %v6553_v13, %v5472_v23  ;;  %v4352_v36 = vrot.slane %v6553_v13, %v5438_v15  ;;  %v4360_v26 = vrot.slane %v6553_v13, %v5499_v45  ;;  %v4364_v60 = vrot.slane %v6553_v13, %v5502_v42 }
0x24f5   :  { %v4368_v32 = vrot.slane %v6553_v13, %v5518_v41 }
0x24f6   :  { %vm4385_vm1 = vcmp.eq.f32.partialorder %v6345_v16, %v4356_v51  ;;  %vm4384_vm2 = vcmp.eq.f32.partialorder %v6376_v14, %v4352_v36  ;;  %vm4386_vm3 = vcmp.eq.f32.partialorder %v6350_v24, %v4360_v26  ;;  %vm4387_vm5 = vcmp.eq.f32.partialorder %v6357_v25, %v4364_v60 }
0x24f7   :  { %vm4388_vm12 = vcmp.eq.f32.partialorder %v6460_v22, %v4368_v32  ;;  %v3806_v22 = vrot.slane %v6539_v30, %v5583_v38 }
0x24f8   :  { %v4398_v54 = vsel %vm4388_vm12, %v5774_v57, 5 }
0x24f9   :  { %v3839_v18 = vsel %vm2260_vm8, %v3806_v22, %v3802_v48 }
0x251e   :  { %v6555_v8 = vpop.xlane.xlu0 %4322 }
0x251f   :  { %v4336_v61 = vrot.slane %v6555_v8, %v5472_v23  ;;  %v4332_v33 = vrot.slane %v6555_v8, %v5438_v15  ;;  %v4340_v15 = vrot.slane %v6555_v8, %v5499_v45  ;;  %v4344_v16 = vrot.slane %v6555_v8, %v5502_v42 }
0x2520   :  { %v4396_v45 = vsel %vm4386_vm3, %v5774_v57, 5  ;;  %v4348_v24 = vrot.slane %v6555_v8, %v5518_v41  ;;  %v4397_v42 = vsel %vm4387_vm5, %v5774_v57, 5  ;;  %v3795_v41 = vpop.permute.xlu1 %3794 }
0x2521   :  { %vm4380_vm14 = vcmp.eq.f32.partialorder %v6371_v19, %v4336_v61  ;;  %vm4379_vm15 = vcmp.eq.f32.partialorder %v6367_v49, %v4332_v33  ;;  %v4395_v19 = vsel %vm4385_vm1, %v5774_v57, 5  ;;  %v4394_v49 = vsel %vm4384_vm2, %v5774_v57, 5 }
0x2522   :  { %v4390_v47 = vsel %vm4380_vm14, %v5774_v57, 5  ;;  %v4389_v29 = vsel %vm4379_vm15, %v5774_v57, 5  ;;  %vm4381_vm4 = vcmp.eq.f32.partialorder %v6380_v11, %v4340_v15  ;;  %vm4382_vm6 = vcmp.eq.f32.partialorder %v6384_v56, %v4344_v16 }
0x2523   :  { %4403 = vperm.xlu1 %4838, %v4390_v47   ;;  %4400 = vperm.xlu0 %4837, %v4389_v29   ;;  %v4391_v27 = vsel %vm4381_vm4, %v5774_v57, 5  ;;  %v4392_v1 = vsel %vm4382_vm6, %v5774_v57, 5  ;;  %vm4383_vm13 = vcmp.eq.f32.partialorder %v6388_v2, %v4348_v24  ;;  %v3834_v12 = vrot.slane %v3795_v41, %v5583_v38 }
0x2524   :  { %v4393_v25 = vsel %vm4383_vm13, %v5774_v57, 5  ;;  %v4110_v31 = vpop.permute.xlu1 %4109 }
0x2525   :  { %v4149_v55 = vrot.slane %v4110_v31, %v5583_v38  ;;  %v3845_v51 = vsel %vm2417_vm10, %v3834_v12, %v3844_v58 }
0x2526   :  { %v4086_v23 = vpop.permute.xlu0 %4085 }
0x2527   :  { %4418 = vperm.xlu1 %4838, %v4395_v19   ;;  %4415 = vperm.xlu0 %4837, %v4394_v49   ;;  %v4117_v20 = vrot.slane %v4086_v23, %v5583_v38 }
0x2528   :  { %v3798_v28 = vpop.permute.xlu1 %3797 }
0x2529   :  { %v3838_v30 = vrot.slane %v3798_v28, %v5583_v38  ;;  %v4154_v35 = vsel %vm2260_vm8, %v4121_v52, %v4117_v20 }
0x252a   :  { %v4101_v14 = vpop.permute.xlu0 %4100 }
0x252b   :  { %4421 = vperm.xlu1 %4838, %v4396_v45   ;;  %4406 = vperm.xlu0 %4837, %v4391_v27   ;;  %v4137_v2 = vrot.slane %v4101_v14, %v5583_v38  ;;  %v3846_v47 = vsel %vm2419_vm11, %v3838_v30, %v3845_v51 }
0x252c   :  { %v4113_v62 = vpop.permute.xlu1 %4112  ;;  %v3862_v19 = vsel %vm2211_vm7, %v3846_v47, 2147483647 }
0x252d   :  { %v4158_v21 = vsel %vm2260_vm8, %v4141_v7, %v4137_v2  ;;  %v4153_v26 = vrot.slane %v4113_v62, %v5583_v38  ;;  %v3864_v14 = vshra.s32 %v3862_v19, 16  ;;  %v3863_v58 = vand.u32 65535, %v3862_v19 }
0x252e   :  { %v3777_v11 = vpop.permute.xlu0 %3776  ;;  %v4159_v39 = vsel %vm2415_vm9, %v4145_v4, %v4158_v21 }
0x252f   :  { %4424 = vperm.xlu1 %4838, %v4397_v42   ;;  %4409 = vperm.xlu0 %4837, %v4392_v1   ;;  %v3810_v63 = vrot.slane %v3777_v11, %v5583_v38  ;;  %v4160_v29 = vsel %vm2417_vm10, %v4149_v55, %v4159_v39  ;;  %v3866_v24 = vcvt.s32.f32 %v3864_v14  ;;  %v6771_v42 = vld [vmem:[#allocation4_spill] sm:$0xff] }
0x2530   :  { %v4161_v49 = vsel %vm2419_vm11, %v4153_v26, %v4160_v29 }
0x2531   :  { %v3840_v5 = vsel %vm2415_vm9, %v3810_v63, %v3839_v18  ;;  %v6652_v45 = vsel %vm2211_vm7, %v4161_v49, 2147483647 }
0x2532   :  { %v4092_v34 = vpop.permute.xlu0 %4091  ;;  %v4179_v32 = vshra.s32 %v6652_v45, 16  ;;  %v4178_v19 = vand.u32 65535, %v6652_v45 }
0x2533   :  { %4427 = vperm.xlu1 %4838, %v4398_v54   ;;  %4412 = vperm.xlu0 %4837, %v4393_v25   ;;  %v4125_v10 = vrot.slane %v4092_v34, %v5583_v38 }
0x2534   :  { %v6659_v11 = vcvt.s32.f32 %v4179_v32 }
0x2535   :  { %v4155_v37 = vsel %vm2415_vm9, %v4125_v10, %v4154_v35  ;;  %v6772_v35 = vld [vmem:[#allocation6_spill] sm:$0xff] }
0x2536   :  { %v3780_v56 = vpop.permute.xlu0 %3779 }
0x2537   :  { %v3814_v46 = vrot.slane %v3780_v56, %v5583_v38 }
0x2539   :  { %v3841_v59 = vsel %vm2417_vm10, %v3814_v46, %v3840_v5 }
0x253a   :  { %v4095_v50 = vpop.permute.xlu0 %4094 }
0x253b   :  { %v4129_v43 = vrot.slane %v4095_v50, %v5583_v38 }
0x253d   :  { %v4156_v61 = vsel %vm2417_vm10, %v4129_v43, %v4155_v37 }
0x253e   :  { %v3783_v40 = vpop.permute.xlu0 %3782 }
0x253f   :  { %v3818_v57 = vrot.slane %v3783_v40, %v5583_v38 }
0x2541   :  { %v3842_v6 = vsel %vm2419_vm11, %v3818_v57, %v3841_v59 }
0x2542   :  { %v4098_v9 = vpop.permute.xlu0 %4097  ;;  %v6635_v33 = vsel %vm2211_vm7, %v3842_v6, 2147483647 }
0x2543   :  { %v4133_v3 = vrot.slane %v4098_v9, %v5583_v38  ;;  %v3849_v15 = vshra.s32 %v6635_v33, 16  ;;  %v3848_v55 = vand.u32 65535, %v6635_v33  ;;  %v4180_v33 = vcvt.s32.f32 %v4178_v19 }
0x2545   :  { %v4157_v36 = vsel %vm2419_vm11, %v4133_v3, %v4156_v61  ;;  %v6648_v60 = vcvt.s32.f32 %v3849_v15  ;;  %v3865_v61 = vcvt.s32.f32 %v3863_v58  ;;  %v3850_v51 = vcvt.s32.f32 %v3848_v55 }
0x2546   :  { %v6644_v23 = vsel %vm2211_vm7, %v4157_v36, 2147483647 }
0x2547   :  { %v4164_v16 = vshra.s32 %v6644_v23, 16  ;;  %v4163_v36 = vand.u32 65535, %v6644_v23 }
0x2549   :  { %v6655_v27 = vcvt.s32.f32 %v4164_v16  ;;  %v4165_v15 = vcvt.s32.f32 %v4163_v36 }
0x2552   :  { %3852 = vmin.xlane.f32.xlu0 %v6648_v60 }
0x2556   :  { %4167 = vmin.xlane.f32.xlu0 %v6655_v27 }
0x2557   :  { %3867 = vmin.xlane.f32.xlu1 %v3866_v24 }
0x255a   :  { %4182 = vmin.xlane.f32.xlu0 %v6659_v11 }
0x2568   :  { %4530 = vbcast.lane.b32.xlu1 %v6771_v42, 256 }
0x259e   :  { %v4404_v1 = vpop.permute.xlu1 %4403  ;;  %v4401_v34 = vpop.permute.xlu0 %4400 }
0x259f   :  { %v4436_v50 = vrot.slane %v4404_v1, %v5583_v38  ;;  %v4432_v31 = vrot.slane %v4401_v34, %v5583_v38 }
0x25a1   :  { %v4469_v7 = vsel %vm2260_vm8, %v4436_v50, %v4432_v31 }
0x25a2   :  { %v4419_v54 = vpop.permute.xlu1 %4418  ;;  %v4416_v25 = vpop.permute.xlu0 %4415 }
0x25a3   :  { %v4456_v40 = vrot.slane %v4419_v54, %v5583_v38  ;;  %v4452_v48 = vrot.slane %v4416_v25, %v5583_v38 }
0x25a5   :  { %v4473_v18 = vsel %vm2260_vm8, %v4456_v40, %v4452_v48 }
0x25a6   :  { %v4422_v56 = vpop.permute.xlu1 %4421  ;;  %v4407_v41 = vpop.permute.xlu0 %4406 }
0x25a7   :  { %v4460_v2 = vrot.slane %v4422_v56, %v5583_v38  ;;  %v4440_v46 = vrot.slane %v4407_v41, %v5583_v38 }
0x25a9   :  { %v4474_v9 = vsel %vm2415_vm9, %v4460_v2, %v4473_v18  ;;  %v4470_v44 = vsel %vm2415_vm9, %v4440_v46, %v4469_v7 }
0x25aa   :  { %v4425_v63 = vpop.permute.xlu1 %4424  ;;  %v4410_v22 = vpop.permute.xlu0 %4409 }
0x25ab   :  { %v4464_v57 = vrot.slane %v4425_v63, %v5583_v38  ;;  %v4444_v0 = vrot.slane %v4410_v22, %v5583_v38 }
0x25ad   :  { %v4475_v10 = vsel %vm2417_vm10, %v4464_v57, %v4474_v9  ;;  %v4471_v17 = vsel %vm2417_vm10, %v4444_v0, %v4470_v44 }
0x25ae   :  { %v4428_v28 = vpop.permute.xlu1 %4427  ;;  %v4413_v20 = vpop.permute.xlu0 %4412 }
0x25af   :  { %v4468_v52 = vrot.slane %v4428_v28, %v5583_v38  ;;  %v4448_v5 = vrot.slane %v4413_v20, %v5583_v38 }
0x25b1   :  { %v4476_v21 = vsel %vm2419_vm11, %v4468_v52, %v4475_v10  ;;  %v4472_v59 = vsel %vm2419_vm11, %v4448_v5, %v4471_v17 }
0x25b2   :  { %v4492_v43 = vsel %vm2211_vm7, %v4476_v21, 2147483647  ;;  %v4477_v4 = vsel %vm2211_vm7, %v4472_v59, 2147483647 }
0x25b3   :  { %v4494_v12 = vshra.s32 %v4492_v43, 16  ;;  %v4479_v6 = vshra.s32 %v4477_v4, 16  ;;  %v4493_v14 = vand.u32 65535, %v4492_v43  ;;  %v4478_v23 = vand.u32 65535, %v4477_v4 }
0x25b5   :  { %v4496_v3 = vcvt.s32.f32 %v4494_v12  ;;  %v4481_v30 = vcvt.s32.f32 %v4479_v6  ;;  %v4495_v42 = vcvt.s32.f32 %v4493_v14 }
0x25b7   :  { %4497 = vmin.xlane.f32.xlu1 %v4496_v3  ;;  %4482 = vmin.xlane.f32.xlu0 %v4481_v30 }
0x25c8   :  { %4542 = vbcast.lane.b32.xlu1 %v6772_v35, 256 }
0x25cd   :  { %4523 = vbcast.lane.b32.xlu0 %v6773_v53, 256 }
0x25db   :  { %v3853_v39 = vpop.xlane.xlu0 %3852 }
0x25dc   :  { %vm3854_vm9 = vcmp.eq.f32.partialorder %v6648_v60, %v3853_v39  ;;  %v3859_v50 = vcvt.f32.s32 %v3853_v39 }
0x25dd   :  { %v3855_v29 = vsel %vm3854_vm9, %v3850_v51, inf }
0x25de   :  { %v3860_v63 = vshll.u32 %v3859_v50, 16 }
0x25df   :  { %v4168_v62 = vpop.xlane.xlu0 %4167 }
0x25e0   :  { %v3868_v37 = vpop.xlane.xlu1 %3867  ;;  %vm4169_vm7 = vcmp.eq.f32.partialorder %v6655_v27, %v4168_v62  ;;  %v4480_v27 = vcvt.s32.f32 %v4478_v23  ;;  %v4174_v57 = vcvt.f32.s32 %v4168_v62 }
0x25e1   :  { %vm3869_vm10 = vcmp.eq.f32.partialorder %v3866_v24, %v3868_v37  ;;  %v4170_v49 = vsel %vm4169_vm7, %v4165_v15, inf  ;;  %v3874_v31 = vcvt.f32.s32 %v3868_v37 }
0x25e2   :  { %v3870_v47 = vsel %vm3869_vm10, %v3865_v61, inf  ;;  %v4175_v9 = vshll.u32 %v4174_v57, 16 }
0x25e3   :  { %v4183_v26 = vpop.xlane.xlu0 %4182  ;;  %v3875_v22 = vshll.u32 %v3874_v31, 16 }
0x25e4   :  { %vm4184_vm11 = vcmp.eq.f32.partialorder %v6659_v11, %v4183_v26  ;;  %v4531_v16 = vpop.permute.xlu1 %4530 }
0x25e5   :  { %v4185_v60 = vsel %vm4184_vm11, %v4180_v33, inf  ;;  %v4535_v56 = vadd.f32 %v4531_v16, %v6553_v13 }
0x25ec   :  { %3871 = vmin.xlane.f32.xlu0 %v3870_v47  ;;  %3856 = vmin.xlane.f32.xlu1 %v3855_v29 }
0x25f0   :  { %4171 = vmin.xlane.f32.xlu0 %v4170_v49 }
0x25f4   :  { %4186 = vmin.xlane.f32.xlu0 %v4185_v60 }
0x2640   :  { %v4498_v32 = vpop.xlane.xlu1 %4497  ;;  %v4483_v24 = vpop.xlane.xlu0 %4482 }
0x2641   :  { %vm4499_vm14 = vcmp.eq.f32.partialorder %v4496_v3, %v4498_v32  ;;  %vm4484_vm15 = vcmp.eq.f32.partialorder %v4481_v30, %v4483_v24  ;;  %v4504_v12 = vcvt.f32.s32 %v4498_v32  ;;  %v4489_v6 = vcvt.f32.s32 %v4483_v24 }
0x2642   :  { %v4500_v1 = vsel %vm4499_vm14, %v4495_v42, inf  ;;  %v4485_v34 = vsel %vm4484_vm15, %v4480_v27, inf }
0x2643   :  { %4501 = vmin.xlane.f32.xlu0 %v4500_v1  ;;  %4486 = vmin.xlane.f32.xlu1 %v4485_v34  ;;  %v4505_v35 = vshll.u32 %v4504_v12, 16  ;;  %v4490_v53 = vshll.u32 %v4489_v6, 16 }
0x2644   :  { %v4524_v45 = vpop.permute.xlu0 %4523  ;;  %v4543_v54 = vpop.permute.xlu1 %4542 }
0x2645   :  { %v4534_v11 = vadd.f32 %v4524_v45, %v6555_v8  ;;  %v4546_v41 = vadd.f32 %v4543_v54, %v4535_v56  ;;  %v4189_v8 = vcvt.f32.s32 %v4183_v26 }
0x2647   :  { %v4545_v25 = vadd.f32 %v4543_v54, %v4534_v11  ;;  %v4190_v5 = vshll.u32 %v4189_v8, 16 }
0x2654   :  { %4550 = vperm.xlu1 %4838, %v4545_v25  }
0x2659   :  { %4553 = vperm.xlu0 %4837, %v4546_v41  }
0x2675   :  { %v3857_v40 = vpop.xlane.xlu1 %3856  ;;  %v3872_v48 = vpop.xlane.xlu0 %3871 }
0x2676   :  { %v3858_v2 = vcvt.f32.s32 %v3857_v40  ;;  %v3873_v46 = vcvt.f32.s32 %v3872_v48 }
0x2678   :  { %v3861_v0 = vadd.s32 %v3860_v63, %v3858_v2  ;;  %v3876_v7 = vadd.s32 %v3875_v22, %v3873_v46 }
0x2679   :  { %v4172_v18 = vpop.xlane.xlu0 %4171 }
0x267a   :  { %v3880_v28 = vrot.slane %v3861_v0, %v5583_v38  ;;  %v3884_v20 = vrot.slane %v3876_v7, %v5583_v38  ;;  %v4173_v13 = vcvt.f32.s32 %v4172_v18 }
0x267c   :  { %v3885_v44 = vsel %vm2260_vm8, %v3884_v20, %v3880_v28  ;;  %v4176_v10 = vadd.s32 %v4175_v9, %v4173_v13 }
0x267d   :  { %4621 = vst.msk [vmem:[%s6735_s14 + $0xa] sm:$0x3] %vm2262_vm0, %v3885_v44  ;;  %v4187_v52 = vpop.xlane.xlu0 %4186 }
0x267e   :  { %v4188_v17 = vcvt.f32.s32 %v4187_v52  ;;  %v4195_v59 = vrot.slane %v4176_v10, %v5583_v38 }
0x2680   :  { %v4191_v21 = vadd.s32 %v4190_v5, %v4188_v17 }
0x2682   :  { %v4199_v43 = vrot.slane %v4191_v21, %v5583_v38 }
0x2684   :  { %v4200_v4 = vsel %vm2260_vm8, %v4199_v43, %v4195_v59 }
0x2685   :  { %4622 = vst.msk [vmem:[%s6735_s14 + $0xc] sm:$0x3] %vm2262_vm0, %v4200_v4 }
0x26cc   :  { %v4487_v3 = vpop.xlane.xlu1 %4486  ;;  %v4502_v30 = vpop.xlane.xlu0 %4501 }
0x26cd   :  { %v4488_v39 = vcvt.f32.s32 %v4487_v3  ;;  %v4503_v37 = vcvt.f32.s32 %v4502_v30 }
0x26cf   :  { %v4491_v58 = vadd.s32 %v4490_v53, %v4488_v39  ;;  %v4506_v55 = vadd.s32 %v4505_v35, %v4503_v37 }
0x26d0   :  { %v4551_v51 = vpop.permute.xlu1 %4550 }
0x26d1   :  { %v4510_v62 = vrot.slane %v4491_v58, %v5583_v38  ;;  %v4514_v61 = vrot.slane %v4506_v55, %v5583_v38  ;;  %v4558_v29 = vrot.slane %v4551_v51, %v5583_v38 }
0x26d3   :  { %v4515_v36 = vsel %vm2260_vm8, %v4514_v61, %v4510_v62 }
0x26d4   :  { %4623 = vst.msk [vmem:[%s6735_s14 + $0xe] sm:$0x3] %vm2262_vm0, %v4515_v36  ;;  %v4554_v47 = vpop.permute.xlu0 %4553 }
0x26d5   :  { %v4562_v26 = vrot.slane %v4554_v47, %v5583_v38 }
0x26d7   :  { %v4563_v15 = vsel %vm2260_vm8, %v4562_v26, %v4558_v29 }
0x26d8   :  { %4565 = vst.msk [vmem:[%s6736_s15] sm:$0x3] %vm2262_vm0, %v4563_v15 }

</bundles_post_ra>
